<compile_context>
chip_gen: v7x
topology: tpu7x:2x2x1
jax: 0.10.0
libtpu: 0.0.40
codegen_flags: <defaults>
</compile_context>

<pallas_src>
import functools
import math

import jax
import jax.numpy as jnp
from jax.experimental import pallas as pl
from jax.experimental.pallas import tpu as pltpu

# ---------------- small synthetic config ----------------
HIDDEN = 32
NUM_HEADS = 4
HEAD_DIM = HIDDEN // NUM_HEADS
INTERMEDIATE = 64
NUM_LAYERS = 2
IMAGE_SIZE = 16
PATCH_SIZE = 8
NUM_CHANNELS = 4
NUM_PATCHES = (IMAGE_SIZE // PATCH_SIZE) ** 2          # 4
PATCH_DIM = NUM_CHANNELS * PATCH_SIZE * PATCH_SIZE     # 256
LN_EPS = 1e-6
BATCH = 2

_GELU_C = math.sqrt(2.0 / math.pi)                     # hoisted constant


# ---------------- in-kernel helpers ----------------
def _layernorm(x, w, b, eps):
    mean = jnp.mean(x, axis=-1, keepdims=True)
    var = jnp.mean(jnp.square(x - mean), axis=-1, keepdims=True)
    return (x - mean) * jax.lax.rsqrt(var + eps) * w + b


def _gelu_tanh(x):
    # ACT2FN["gelu_pytorch_tanh"]
    return 0.5 * x * (1.0 + jnp.tanh(_GELU_C * (x + 0.044715 * x * x * x)))


def _mha_into(ctx_ref, q, k, v, num_heads, head_dim):
    """Multi-head attention; q:(Q,H), k/v:(S,H). Each head writes its lane
    slice of the VMEM scratch `ctx_ref` directly (no concat, no transposes)."""
    scale = head_dim ** -0.5
    nq = q.shape[0]
    for h in range(num_heads):
        sl = slice(h * head_dim, (h + 1) * head_dim)
        scores = jnp.einsum("qd,kd->qk", q[:, sl], k[:, sl],
                            preferred_element_type=jnp.float32) * scale
        probs = jax.nn.softmax(scores, axis=-1)
        ctx_ref[0:nq, sl] = jnp.dot(probs, v[:, sl],
                                    preferred_element_type=jnp.float32)
    return ctx_ref[0:nq, :]


# ---------------- fused Pallas kernel (whole forward, one image / grid step) --
def _siglip_kernel(patches_ref, patch_w_ref, patch_b_ref, pos_ref,
                   wqkv_ref, bqkv_ref, wo_ref, w1_ref, b1_ref, w2_ref, lvec_ref,
                   probe_ref, hwq_ref, hwkv_ref, hwo_ref, hw1_ref, hb1_ref,
                   hw2_ref, hvec_ref,
                   last_ref, pooled_ref, ctx_sc,
                   *, num_layers, num_heads, head_dim, eps):
    H = patch_w_ref.shape[1]

    # ---- patch embedding (Conv2d as matmul) + position embedding ----
    p = patches_ref[0]                                               # (P, K)
    x = jnp.dot(p, patch_w_ref[...], preferred_element_type=jnp.float32)
    x = x + patch_b_ref[...] + pos_ref[...]                          # (P, H)

    # ---- encoder layers (statically unrolled, weights stacked on axis 0) ----
    for l in range(num_layers):
        vec = lvec_ref[l]                                            # (6, H)
        ln1w, ln1b = vec[0:1, :], vec[1:2, :]
        bo = vec[2:3, :]
        ln2w, ln2b = vec[3:4, :], vec[4:5, :]
        b2 = vec[5:6, :]

        h = _layernorm(x, ln1w, ln1b, eps)
        qkv = jnp.dot(h, wqkv_ref[l],
                      preferred_element_type=jnp.float32) + bqkv_ref[l]
        q = qkv[:, 0 * H:1 * H]
        k = qkv[:, 1 * H:2 * H]
        v = qkv[:, 2 * H:3 * H]
        ctx = _mha_into(ctx_sc, q, k, v, num_heads, head_dim)        # (P, H)
        attn = jnp.dot(ctx, wo_ref[l],
                       preferred_element_type=jnp.float32) + bo
        x = x + attn

        h2 = _layernorm(x, ln2w, ln2b, eps)
        h2 = jnp.dot(h2, w1_ref[l],
                     preferred_element_type=jnp.float32) + b1_ref[l]
        h2 = _gelu_tanh(h2)
        h2 = jnp.dot(h2, w2_ref[l],
                     preferred_element_type=jnp.float32) + b2
        x = x + h2

    # ---- post_layernorm ----
    hvec = hvec_ref[...]                                             # (9, H)
    plnw, plnb = hvec[0:1, :], hvec[1:2, :]
    x = _layernorm(x, plnw, plnb, eps)
    last_ref[0] = x

    # ---- multihead attention pooling head ----
    hbq = hvec[2:3, :]
    hbk = hvec[3:4, :]
    hbv = hvec[4:5, :]
    hbo = hvec[5:6, :]
    hlnw, hlnb = hvec[6:7, :], hvec[7:8, :]
    hb2 = hvec[8:9, :]

    q = jnp.dot(probe_ref[...], hwq_ref[...],
                preferred_element_type=jnp.float32) + hbq            # (1, H)
    kv = jnp.dot(x, hwkv_ref[...], preferred_element_type=jnp.float32)
    k = kv[:, :H] + hbk
    v = kv[:, H:] + hbv
    ctx = _mha_into(ctx_sc, q, k, v, num_heads, head_dim)            # (1, H)
    attn = jnp.dot(ctx, hwo_ref[...],
                   preferred_element_type=jnp.float32) + hbo
    resid = attn
    hh = _layernorm(attn, hlnw, hlnb, eps)
    hh = jnp.dot(hh, hw1_ref[...],
                 preferred_element_type=jnp.float32) + hb1_ref[...]
    hh = _gelu_tanh(hh)
    hh = jnp.dot(hh, hw2_ref[...], preferred_element_type=jnp.float32) + hb2
    pooled_ref[0] = resid + hh                                       # (1, H)


# ---------------- wrapper (single pallas_call) ----------------
def siglip_vision_transformer(pixel_values, params):
    B, C, Hh, Ww = pixel_values.shape
    gh, gw = Hh // PATCH_SIZE, Ww // PATCH_SIZE
    # unfold into non-overlapping patches, channel-major within a patch
    # (matches Conv2d(kernel=stride=ps) flattening order: (c, kh, kw))
    patches = pixel_values.reshape(B, C, gh, PATCH_SIZE, gw, PATCH_SIZE)
    patches = patches.transpose(0, 2, 4, 1, 3, 5).reshape(
        B, gh * gw, C * PATCH_SIZE * PATCH_SIZE)
    P, K = patches.shape[1], patches.shape[2]
    H = HIDDEN

    lp, hp = params["layers"], params["head"]
    inputs = (patches, params["patch_w"], params["patch_b"], params["pos_emb"],
              lp["wqkv"], lp["bqkv"], lp["wo"], lp["w1"], lp["b1"], lp["w2"],
              lp["lvec"],
              hp["probe"], hp["hwq"], hp["hwkv"], hp["hwo"], hp["hw1"],
              hp["hb1"], hp["hw2"], hp["hvec"])

    def full_spec(a):
        n = a.ndim
        return pl.BlockSpec(a.shape, lambda b, _n=n: (0,) * _n)

    in_specs = ([pl.BlockSpec((1, P, K), lambda b: (b, 0, 0))]
                + [full_spec(a) for a in inputs[1:]])

    kern = functools.partial(_siglip_kernel, num_layers=NUM_LAYERS,
                             num_heads=NUM_HEADS, head_dim=HEAD_DIM, eps=LN_EPS)

    last, pooled = pl.pallas_call(
        kern,
        out_shape=(jax.ShapeDtypeStruct((B, P, H), jnp.float32),
                   jax.ShapeDtypeStruct((B, 1, H), jnp.float32)),
        grid=(B,),
        in_specs=in_specs,
        out_specs=(pl.BlockSpec((1, P, H), lambda b: (b, 0, 0)),
                   pl.BlockSpec((1, 1, H), lambda b: (b, 0, 0))),
        scratch_shapes=[pltpu.VMEM((P, H), jnp.float32)],
        compiler_params=pltpu.CompilerParams(
            dimension_semantics=("parallel",)),
    )(*inputs)
    return last, pooled[:, 0, :]


# ---------------- parameter init (deterministic, synthetic, packed layout) ----
def init_params(key):
    def nrm(k, shape, scale=0.02):
        return jax.random.normal(k, shape, jnp.float32) * scale

    keys = jax.random.split(key, 64)
    ki = iter(keys)

    # patch embedding: torch Conv2d weight (H, C, ps, ps) -> (C*ps*ps, H)
    conv_w = nrm(next(ki), (HIDDEN, NUM_CHANNELS, PATCH_SIZE, PATCH_SIZE))
    patch_w = conv_w.reshape(HIDDEN, PATCH_DIM).T          # (K, H)
    patch_b = nrm(next(ki), (1, HIDDEN))
    pos_emb = nrm(next(ki), (NUM_PATCHES, HIDDEN))

    def linear(k, din, dout):
        kw, kb = jax.random.split(k)
        return nrm(kw, (din, dout)), nrm(kb, (dout,))

    wqkv_l, bqkv_l, wo_l, w1_l, b1_l, w2_l, lvec_l = [], [], [], [], [], [], []
    for _ in range(NUM_LAYERS):
        wq, bq = linear(next(ki), HIDDEN, HIDDEN)
        wk, bk = linear(next(ki), HIDDEN, HIDDEN)
        wv, bv = linear(next(ki), HIDDEN, HIDDEN)
        wo, bo = linear(next(ki), HIDDEN, HIDDEN)
        w1, b1 = linear(next(ki), HIDDEN, INTERMEDIATE)
        w2, b2 = linear(next(ki), INTERMEDIATE, HIDDEN)
        ln1w, ln1b = jnp.ones((HIDDEN,)), jnp.zeros((HIDDEN,))
        ln2w, ln2b = jnp.ones((HIDDEN,)), jnp.zeros((HIDDEN,))
        wqkv_l.append(jnp.concatenate([wq, wk, wv], axis=1))      # (H, 3H)
        bqkv_l.append(jnp.concatenate([bq, bk, bv])[None, :])     # (1, 3H)
        wo_l.append(wo)
        w1_l.append(w1)
        b1_l.append(b1[None, :])
        w2_l.append(w2)
        lvec_l.append(jnp.stack([ln1w, ln1b, bo, ln2w, ln2b, b2]))  # (6, H)

    layers = {"wqkv": jnp.stack(wqkv_l), "bqkv": jnp.stack(bqkv_l),
              "wo": jnp.stack(wo_l), "w1": jnp.stack(w1_l),
              "b1": jnp.stack(b1_l), "w2": jnp.stack(w2_l),
              "lvec": jnp.stack(lvec_l)}

    # pooling head: torch MultiheadAttention in_proj split into q/k/v
    probe = jax.random.normal(next(ki), (1, HIDDEN), jnp.float32)
    hwq, hbq = linear(next(ki), HIDDEN, HIDDEN)
    hwk, hbk = linear(next(ki), HIDDEN, HIDDEN)
    hwv, hbv = linear(next(ki), HIDDEN, HIDDEN)
    hwo, hbo = linear(next(ki), HIDDEN, HIDDEN)
    hw1, hb1 = linear(next(ki), HIDDEN, INTERMEDIATE)
    hw2, hb2 = linear(next(ki), INTERMEDIATE, HIDDEN)
    plnw, plnb = jnp.ones((HIDDEN,)), jnp.zeros((HIDDEN,))
    hlnw, hlnb = jnp.ones((HIDDEN,)), jnp.zeros((HIDDEN,))
    head = {"probe": probe,
            "hwq": hwq,
            "hwkv": jnp.concatenate([hwk, hwv], axis=1),          # (H, 2H)
            "hwo": hwo, "hw1": hw1, "hb1": hb1[None, :], "hw2": hw2,
            "hvec": jnp.stack([plnw, plnb, hbq, hbk, hbv, hbo,
                               hlnw, hlnb, hb2])}                 # (9, H)

    return {"patch_w": patch_w, "patch_b": patch_b, "pos_emb": pos_emb,
            "layers": layers, "head": head}


if __name__ == "__main__":
    key = jax.random.PRNGKey(0)
    kp, kx = jax.random.split(key)
    params = init_params(kp)
    pixel_values = jax.random.normal(
        kx, (BATCH, NUM_CHANNELS, IMAGE_SIZE, IMAGE_SIZE), jnp.float32)

    fwd = jax.jit(siglip_vision_transformer)
    last, pooled = fwd(pixel_values, params)
    jax.block_until_ready((last, pooled))

    assert last.shape == (BATCH, NUM_PATCHES, HIDDEN)
    assert pooled.shape == (BATCH, HIDDEN)
    # TODO(synk): attention_dropout / output_attentions plumbing omitted
    # (inference-mode identity / not returned by this kernel).
    print("KERNEL_OK")
</pallas_src>

<mosaic_0001>
module attributes {stable_mosaic.version = 11 : i64} {
  func.func @_siglip_kernel(%arg0: i32, %arg1: memref<1x4x256xf32, #tpu.memory_space<vmem>>, %arg2: memref<256x32xf32, #tpu.memory_space<vmem>>, %arg3: memref<1x32xf32, #tpu.memory_space<vmem>>, %arg4: memref<4x32xf32, #tpu.memory_space<vmem>>, %arg5: memref<2x32x96xf32, #tpu.memory_space<vmem>>, %arg6: memref<2x1x96xf32, #tpu.memory_space<vmem>>, %arg7: memref<2x32x32xf32, #tpu.memory_space<vmem>>, %arg8: memref<2x32x64xf32, #tpu.memory_space<vmem>>, %arg9: memref<2x1x64xf32, #tpu.memory_space<vmem>>, %arg10: memref<2x64x32xf32, #tpu.memory_space<vmem>>, %arg11: memref<2x6x32xf32, #tpu.memory_space<vmem>>, %arg12: memref<1x32xf32, #tpu.memory_space<vmem>>, %arg13: memref<32x32xf32, #tpu.memory_space<vmem>>, %arg14: memref<32x64xf32, #tpu.memory_space<vmem>>, %arg15: memref<32x32xf32, #tpu.memory_space<vmem>>, %arg16: memref<32x64xf32, #tpu.memory_space<vmem>>, %arg17: memref<1x64xf32, #tpu.memory_space<vmem>>, %arg18: memref<64x32xf32, #tpu.memory_space<vmem>>, %arg19: memref<9x32xf32, #tpu.memory_space<vmem>>, %arg20: memref<1x4x32xf32, #tpu.memory_space<vmem>>, %arg21: memref<1x1x32xf32, #tpu.memory_space<vmem>>, %arg22: memref<4x32xf32, #tpu.memory_space<vmem>>) attributes {dimension_semantics = [#tpu.dimension_semantics<parallel>], iteration_bounds = array<i64: 2>, scalar_prefetch = 0 : i64, scratch_operands = 1 : i64, tpu.core_type = #tpu.core_type<tc>, window_params = [{transform_indices = @transform_0, window_bounds = array<i64: 1, 4, 256>}, {pipeline_mode = #tpu.pipeline_mode<synchronous>, transform_indices = @transform_1, window_bounds = array<i64: 256, 32>}, {pipeline_mode = #tpu.pipeline_mode<synchronous>, transform_indices = @transform_2, window_bounds = array<i64: 1, 32>}, {pipeline_mode = #tpu.pipeline_mode<synchronous>, transform_indices = @transform_3, window_bounds = array<i64: 4, 32>}, {pipeline_mode = #tpu.pipeline_mode<synchronous>, transform_indices = @transform_4, window_bounds = array<i64: 2, 32, 96>}, {pipeline_mode = #tpu.pipeline_mode<synchronous>, transform_indices = @transform_5, window_bounds = array<i64: 2, 1, 96>}, {pipeline_mode = #tpu.pipeline_mode<synchronous>, transform_indices = @transform_6, window_bounds = array<i64: 2, 32, 32>}, {pipeline_mode = #tpu.pipeline_mode<synchronous>, transform_indices = @transform_7, window_bounds = array<i64: 2, 32, 64>}, {pipeline_mode = #tpu.pipeline_mode<synchronous>, transform_indices = @transform_8, window_bounds = array<i64: 2, 1, 64>}, {pipeline_mode = #tpu.pipeline_mode<synchronous>, transform_indices = @transform_9, window_bounds = array<i64: 2, 64, 32>}, {pipeline_mode = #tpu.pipeline_mode<synchronous>, transform_indices = @transform_10, window_bounds = array<i64: 2, 6, 32>}, {pipeline_mode = #tpu.pipeline_mode<synchronous>, transform_indices = @transform_11, window_bounds = array<i64: 1, 32>}, {pipeline_mode = #tpu.pipeline_mode<synchronous>, transform_indices = @transform_12, window_bounds = array<i64: 32, 32>}, {pipeline_mode = #tpu.pipeline_mode<synchronous>, transform_indices = @transform_13, window_bounds = array<i64: 32, 64>}, {pipeline_mode = #tpu.pipeline_mode<synchronous>, transform_indices = @transform_14, window_bounds = array<i64: 32, 32>}, {pipeline_mode = #tpu.pipeline_mode<synchronous>, transform_indices = @transform_15, window_bounds = array<i64: 32, 64>}, {pipeline_mode = #tpu.pipeline_mode<synchronous>, transform_indices = @transform_16, window_bounds = array<i64: 1, 64>}, {pipeline_mode = #tpu.pipeline_mode<synchronous>, transform_indices = @transform_17, window_bounds = array<i64: 64, 32>}, {pipeline_mode = #tpu.pipeline_mode<synchronous>, transform_indices = @transform_18, window_bounds = array<i64: 9, 32>}, {transform_indices = @transform_19, window_bounds = array<i64: 1, 4, 32>}, {transform_indices = @transform_20, window_bounds = array<i64: 1, 1, 32>}]} {
    %c0 = arith.constant 0 : index
    %c0_0 = arith.constant 0 : index
    %c0_1 = arith.constant 0 : index
    %0 = vector.load %arg1[%c0, %c0_0, %c0_1] : memref<1x4x256xf32, #tpu.memory_space<vmem>>, vector<1x4x256xf32>
    %1 = vector.shape_cast %0 : vector<1x4x256xf32> to vector<4x256xf32>
    %c0_2 = arith.constant 0 : index
    %c0_3 = arith.constant 0 : index
    %2 = vector.load %arg2[%c0_2, %c0_3] : memref<256x32xf32, #tpu.memory_space<vmem>>, vector<256x32xf32>
    %cst = arith.constant dense<0.000000e+00> : vector<4x32xf32>
    %3 = tpu.matmul %1, %2, %cst {dimension_numbers = #tpu.dot_dimension_numbers<[1], [0], [0], [1], [0, 0, 1, 1], [], []>} : vector<4x256xf32>, vector<256x32xf32>, vector<4x32xf32> -> vector<4x32xf32>
    %c0_4 = arith.constant 0 : index
    %c0_5 = arith.constant 0 : index
    %4 = vector.load %arg3[%c0_4, %c0_5] : memref<1x32xf32, #tpu.memory_space<vmem>>, vector<1x32xf32>
    %5 = vector.broadcast %4 : vector<1x32xf32> to vector<4x32xf32>
    %6 = arith.addf %3, %5 : vector<4x32xf32>
    %c0_6 = arith.constant 0 : index
    %c0_7 = arith.constant 0 : index
    %7 = vector.load %arg4[%c0_6, %c0_7] : memref<4x32xf32, #tpu.memory_space<vmem>>, vector<4x32xf32>
    %8 = arith.addf %6, %7 : vector<4x32xf32>
    %c0_8 = arith.constant 0 : index
    %c0_9 = arith.constant 0 : index
    %c0_10 = arith.constant 0 : index
    %9 = vector.load %arg11[%c0_8, %c0_9, %c0_10] : memref<2x6x32xf32, #tpu.memory_space<vmem>>, vector<1x6x32xf32>
    %10 = vector.shape_cast %9 : vector<1x6x32xf32> to vector<6x32xf32>
    %11 = vector.extract_strided_slice %10 {offsets = [0, 0], sizes = [1, 32], strides = [1, 1]} : vector<6x32xf32> to vector<1x32xf32>
    %12 = vector.extract_strided_slice %10 {offsets = [1, 0], sizes = [1, 32], strides = [1, 1]} : vector<6x32xf32> to vector<1x32xf32>
    %13 = vector.extract_strided_slice %10 {offsets = [2, 0], sizes = [1, 32], strides = [1, 1]} : vector<6x32xf32> to vector<1x32xf32>
    %14 = vector.extract_strided_slice %10 {offsets = [3, 0], sizes = [1, 32], strides = [1, 1]} : vector<6x32xf32> to vector<1x32xf32>
    %15 = vector.extract_strided_slice %10 {offsets = [4, 0], sizes = [1, 32], strides = [1, 1]} : vector<6x32xf32> to vector<1x32xf32>
    %16 = vector.extract_strided_slice %10 {offsets = [5, 0], sizes = [1, 32], strides = [1, 1]} : vector<6x32xf32> to vector<1x32xf32>
    %cst_11 = arith.constant dense<0.000000e+00> : vector<4xf32>
    %17 = vector.multi_reduction <add>, %8, %cst_11 [1] : vector<4x32xf32> to vector<4xf32>
    %18 = vector.shape_cast %17 : vector<4xf32> to vector<4x1xf32>
    %cst_12 = arith.constant 3.200000e+01 : f32
    %19 = vector.broadcast %cst_12 : f32 to vector<4x1xf32>
    %20 = arith.divf %18, %19 : vector<4x1xf32>
    %21 = vector.broadcast %20 : vector<4x1xf32> to vector<4x32xf32>
    %22 = arith.subf %8, %21 : vector<4x32xf32>
    %23 = arith.mulf %22, %22 : vector<4x32xf32>
    %cst_13 = arith.constant dense<0.000000e+00> : vector<4xf32>
    %24 = vector.multi_reduction <add>, %23, %cst_13 [1] : vector<4x32xf32> to vector<4xf32>
    %25 = vector.shape_cast %24 : vector<4xf32> to vector<4x1xf32>
    %cst_14 = arith.constant 3.200000e+01 : f32
    %26 = vector.broadcast %cst_14 : f32 to vector<4x1xf32>
    %27 = arith.divf %25, %26 : vector<4x1xf32>
    %28 = vector.broadcast %20 : vector<4x1xf32> to vector<4x32xf32>
    %29 = arith.subf %8, %28 : vector<4x32xf32>
    %cst_15 = arith.constant 9.99999997E-7 : f32
    %30 = vector.broadcast %cst_15 : f32 to vector<4x1xf32>
    %31 = arith.addf %27, %30 : vector<4x1xf32>
    %32 = math.rsqrt %31 : vector<4x1xf32>
    %33 = vector.broadcast %32 : vector<4x1xf32> to vector<4x32xf32>
    %34 = arith.mulf %29, %33 : vector<4x32xf32>
    %35 = vector.broadcast %11 : vector<1x32xf32> to vector<4x32xf32>
    %36 = arith.mulf %34, %35 : vector<4x32xf32>
    %37 = vector.broadcast %12 : vector<1x32xf32> to vector<4x32xf32>
    %38 = arith.addf %36, %37 : vector<4x32xf32>
    %c0_16 = arith.constant 0 : index
    %c0_17 = arith.constant 0 : index
    %c0_18 = arith.constant 0 : index
    %39 = vector.load %arg5[%c0_16, %c0_17, %c0_18] : memref<2x32x96xf32, #tpu.memory_space<vmem>>, vector<1x32x96xf32>
    %40 = vector.shape_cast %39 : vector<1x32x96xf32> to vector<32x96xf32>
    %cst_19 = arith.constant dense<0.000000e+00> : vector<4x96xf32>
    %41 = tpu.matmul %38, %40, %cst_19 {dimension_numbers = #tpu.dot_dimension_numbers<[1], [0], [0], [1], [0, 0, 1, 1], [], []>} : vector<4x32xf32>, vector<32x96xf32>, vector<4x96xf32> -> vector<4x96xf32>
    %c0_20 = arith.constant 0 : index
    %c0_21 = arith.constant 0 : index
    %c0_22 = arith.constant 0 : index
    %42 = vector.load %arg6[%c0_20, %c0_21, %c0_22] : memref<2x1x96xf32, #tpu.memory_space<vmem>>, vector<1x1x96xf32>
    %43 = vector.shape_cast %42 : vector<1x1x96xf32> to vector<1x96xf32>
    %44 = vector.broadcast %43 : vector<1x96xf32> to vector<4x96xf32>
    %45 = arith.addf %41, %44 : vector<4x96xf32>
    %46 = vector.extract_strided_slice %45 {offsets = [0, 0], sizes = [4, 32], strides = [1, 1]} : vector<4x96xf32> to vector<4x32xf32>
    %47 = vector.extract_strided_slice %45 {offsets = [0, 32], sizes = [4, 32], strides = [1, 1]} : vector<4x96xf32> to vector<4x32xf32>
    %48 = vector.extract_strided_slice %45 {offsets = [0, 64], sizes = [4, 32], strides = [1, 1]} : vector<4x96xf32> to vector<4x32xf32>
    %49 = vector.extract_strided_slice %46 {offsets = [0, 0], sizes = [4, 8], strides = [1, 1]} : vector<4x32xf32> to vector<4x8xf32>
    %50 = vector.extract_strided_slice %47 {offsets = [0, 0], sizes = [4, 8], strides = [1, 1]} : vector<4x32xf32> to vector<4x8xf32>
    "tpu.trace_start"() <{level = 10 : i32, message = "qd,kd->qk"}> : () -> ()
    %cst_23 = arith.constant dense<0.000000e+00> : vector<4x4xf32>
    %51 = tpu.matmul %49, %50, %cst_23 {dimension_numbers = #tpu.dot_dimension_numbers<[1], [1], [0], [0], [0, 0, 1, 0], [], []>} : vector<4x8xf32>, vector<4x8xf32>, vector<4x4xf32> -> vector<4x4xf32>
    "tpu.trace_stop"() : () -> ()
    %cst_24 = arith.constant 0.353553385 : f32
    %52 = vector.broadcast %cst_24 : f32 to vector<4x4xf32>
    %53 = arith.mulf %51, %52 : vector<4x4xf32>
    %cst_25 = arith.constant dense<0xFF800000> : vector<4xf32>
    %54 = vector.multi_reduction <maximumf>, %53, %cst_25 [1] : vector<4x4xf32> to vector<4xf32>
    %cst_26 = arith.constant 0xFF800000 : f32
    %55 = vector.broadcast %cst_26 : f32 to vector<4xf32>
    %56 = arith.maximumf %55, %54 : vector<4xf32>
    %57 = vector.shape_cast %56 : vector<4xf32> to vector<4x1xf32>
    %58 = vector.broadcast %57 : vector<4x1xf32> to vector<4x4xf32>
    %59 = arith.subf %53, %58 : vector<4x4xf32>
    %60 = math.exp %59 : vector<4x4xf32>
    %cst_27 = arith.constant dense<0.000000e+00> : vector<4xf32>
    %61 = vector.multi_reduction <add>, %60, %cst_27 [1] : vector<4x4xf32> to vector<4xf32>
    %62 = vector.shape_cast %61 : vector<4xf32> to vector<4x1xf32>
    %63 = vector.broadcast %62 : vector<4x1xf32> to vector<4x4xf32>
    %64 = arith.divf %60, %63 : vector<4x4xf32>
    %65 = vector.extract_strided_slice %48 {offsets = [0, 0], sizes = [4, 8], strides = [1, 1]} : vector<4x32xf32> to vector<4x8xf32>
    %cst_28 = arith.constant dense<0.000000e+00> : vector<4x8xf32>
    %66 = tpu.matmul %64, %65, %cst_28 {dimension_numbers = #tpu.dot_dimension_numbers<[1], [0], [0], [1], [0, 0, 1, 1], [], []>} : vector<4x4xf32>, vector<4x8xf32>, vector<4x8xf32> -> vector<4x8xf32>
    %c0_29 = arith.constant 0 : index
    %c0_30 = arith.constant 0 : index
    %67 = vector.load %arg22[%c0_29, %c0_30] : memref<4x32xf32, #tpu.memory_space<vmem>>, vector<4x8xf32>
    tpu.vector_store %arg22[%c0_29, %c0_30], %66 {strides = array<i32>} : memref<4x32xf32, #tpu.memory_space<vmem>>, vector<4x8xf32>,
    %68 = vector.extract_strided_slice %46 {offsets = [0, 8], sizes = [4, 8], strides = [1, 1]} : vector<4x32xf32> to vector<4x8xf32>
    %69 = vector.extract_strided_slice %47 {offsets = [0, 8], sizes = [4, 8], strides = [1, 1]} : vector<4x32xf32> to vector<4x8xf32>
    "tpu.trace_start"() <{level = 10 : i32, message = "qd,kd->qk"}> : () -> ()
    %cst_31 = arith.constant dense<0.000000e+00> : vector<4x4xf32>
    %70 = tpu.matmul %68, %69, %cst_31 {dimension_numbers = #tpu.dot_dimension_numbers<[1], [1], [0], [0], [0, 0, 1, 0], [], []>} : vector<4x8xf32>, vector<4x8xf32>, vector<4x4xf32> -> vector<4x4xf32>
    "tpu.trace_stop"() : () -> ()
    %cst_32 = arith.constant 0.353553385 : f32
    %71 = vector.broadcast %cst_32 : f32 to vector<4x4xf32>
    %72 = arith.mulf %70, %71 : vector<4x4xf32>
    %cst_33 = arith.constant dense<0xFF800000> : vector<4xf32>
    %73 = vector.multi_reduction <maximumf>, %72, %cst_33 [1] : vector<4x4xf32> to vector<4xf32>
    %cst_34 = arith.constant 0xFF800000 : f32
    %74 = vector.broadcast %cst_34 : f32 to vector<4xf32>
    %75 = arith.maximumf %74, %73 : vector<4xf32>
    %76 = vector.shape_cast %75 : vector<4xf32> to vector<4x1xf32>
    %77 = vector.broadcast %76 : vector<4x1xf32> to vector<4x4xf32>
    %78 = arith.subf %72, %77 : vector<4x4xf32>
    %79 = math.exp %78 : vector<4x4xf32>
    %cst_35 = arith.constant dense<0.000000e+00> : vector<4xf32>
    %80 = vector.multi_reduction <add>, %79, %cst_35 [1] : vector<4x4xf32> to vector<4xf32>
    %81 = vector.shape_cast %80 : vector<4xf32> to vector<4x1xf32>
    %82 = vector.broadcast %81 : vector<4x1xf32> to vector<4x4xf32>
    %83 = arith.divf %79, %82 : vector<4x4xf32>
    %84 = vector.extract_strided_slice %48 {offsets = [0, 8], sizes = [4, 8], strides = [1, 1]} : vector<4x32xf32> to vector<4x8xf32>
    %cst_36 = arith.constant dense<0.000000e+00> : vector<4x8xf32>
    %85 = tpu.matmul %83, %84, %cst_36 {dimension_numbers = #tpu.dot_dimension_numbers<[1], [0], [0], [1], [0, 0, 1, 1], [], []>} : vector<4x4xf32>, vector<4x8xf32>, vector<4x8xf32> -> vector<4x8xf32>
    %c0_37 = arith.constant 0 : index
    %c8 = arith.constant 8 : index
    %86 = vector.load %arg22[%c0_37, %c8] : memref<4x32xf32, #tpu.memory_space<vmem>>, vector<4x8xf32>
    tpu.vector_store %arg22[%c0_37, %c8], %85 {strides = array<i32>} : memref<4x32xf32, #tpu.memory_space<vmem>>, vector<4x8xf32>,
    %87 = vector.extract_strided_slice %46 {offsets = [0, 16], sizes = [4, 8], strides = [1, 1]} : vector<4x32xf32> to vector<4x8xf32>
    %88 = vector.extract_strided_slice %47 {offsets = [0, 16], sizes = [4, 8], strides = [1, 1]} : vector<4x32xf32> to vector<4x8xf32>
    "tpu.trace_start"() <{level = 10 : i32, message = "qd,kd->qk"}> : () -> ()
    %cst_38 = arith.constant dense<0.000000e+00> : vector<4x4xf32>
    %89 = tpu.matmul %87, %88, %cst_38 {dimension_numbers = #tpu.dot_dimension_numbers<[1], [1], [0], [0], [0, 0, 1, 0], [], []>} : vector<4x8xf32>, vector<4x8xf32>, vector<4x4xf32> -> vector<4x4xf32>
    "tpu.trace_stop"() : () -> ()
    %cst_39 = arith.constant 0.353553385 : f32
    %90 = vector.broadcast %cst_39 : f32 to vector<4x4xf32>
    %91 = arith.mulf %89, %90 : vector<4x4xf32>
    %cst_40 = arith.constant dense<0xFF800000> : vector<4xf32>
    %92 = vector.multi_reduction <maximumf>, %91, %cst_40 [1] : vector<4x4xf32> to vector<4xf32>
    %cst_41 = arith.constant 0xFF800000 : f32
    %93 = vector.broadcast %cst_41 : f32 to vector<4xf32>
    %94 = arith.maximumf %93, %92 : vector<4xf32>
    %95 = vector.shape_cast %94 : vector<4xf32> to vector<4x1xf32>
    %96 = vector.broadcast %95 : vector<4x1xf32> to vector<4x4xf32>
    %97 = arith.subf %91, %96 : vector<4x4xf32>
    %98 = math.exp %97 : vector<4x4xf32>
    %cst_42 = arith.constant dense<0.000000e+00> : vector<4xf32>
    %99 = vector.multi_reduction <add>, %98, %cst_42 [1] : vector<4x4xf32> to vector<4xf32>
    %100 = vector.shape_cast %99 : vector<4xf32> to vector<4x1xf32>
    %101 = vector.broadcast %100 : vector<4x1xf32> to vector<4x4xf32>
    %102 = arith.divf %98, %101 : vector<4x4xf32>
    %103 = vector.extract_strided_slice %48 {offsets = [0, 16], sizes = [4, 8], strides = [1, 1]} : vector<4x32xf32> to vector<4x8xf32>
    %cst_43 = arith.constant dense<0.000000e+00> : vector<4x8xf32>
    %104 = tpu.matmul %102, %103, %cst_43 {dimension_numbers = #tpu.dot_dimension_numbers<[1], [0], [0], [1], [0, 0, 1, 1], [], []>} : vector<4x4xf32>, vector<4x8xf32>, vector<4x8xf32> -> vector<4x8xf32>
    %c0_44 = arith.constant 0 : index
    %c16 = arith.constant 16 : index
    %105 = vector.load %arg22[%c0_44, %c16] : memref<4x32xf32, #tpu.memory_space<vmem>>, vector<4x8xf32>
    tpu.vector_store %arg22[%c0_44, %c16], %104 {strides = array<i32>} : memref<4x32xf32, #tpu.memory_space<vmem>>, vector<4x8xf32>,
    %106 = vector.extract_strided_slice %46 {offsets = [0, 24], sizes = [4, 8], strides = [1, 1]} : vector<4x32xf32> to vector<4x8xf32>
    %107 = vector.extract_strided_slice %47 {offsets = [0, 24], sizes = [4, 8], strides = [1, 1]} : vector<4x32xf32> to vector<4x8xf32>
    "tpu.trace_start"() <{level = 10 : i32, message = "qd,kd->qk"}> : () -> ()
    %cst_45 = arith.constant dense<0.000000e+00> : vector<4x4xf32>
    %108 = tpu.matmul %106, %107, %cst_45 {dimension_numbers = #tpu.dot_dimension_numbers<[1], [1], [0], [0], [0, 0, 1, 0], [], []>} : vector<4x8xf32>, vector<4x8xf32>, vector<4x4xf32> -> vector<4x4xf32>
    "tpu.trace_stop"() : () -> ()
    %cst_46 = arith.constant 0.353553385 : f32
    %109 = vector.broadcast %cst_46 : f32 to vector<4x4xf32>
    %110 = arith.mulf %108, %109 : vector<4x4xf32>
    %cst_47 = arith.constant dense<0xFF800000> : vector<4xf32>
    %111 = vector.multi_reduction <maximumf>, %110, %cst_47 [1] : vector<4x4xf32> to vector<4xf32>
    %cst_48 = arith.constant 0xFF800000 : f32
    %112 = vector.broadcast %cst_48 : f32 to vector<4xf32>
    %113 = arith.maximumf %112, %111 : vector<4xf32>
    %114 = vector.shape_cast %113 : vector<4xf32> to vector<4x1xf32>
    %115 = vector.broadcast %114 : vector<4x1xf32> to vector<4x4xf32>
    %116 = arith.subf %110, %115 : vector<4x4xf32>
    %117 = math.exp %116 : vector<4x4xf32>
    %cst_49 = arith.constant dense<0.000000e+00> : vector<4xf32>
    %118 = vector.multi_reduction <add>, %117, %cst_49 [1] : vector<4x4xf32> to vector<4xf32>
    %119 = vector.shape_cast %118 : vector<4xf32> to vector<4x1xf32>
    %120 = vector.broadcast %119 : vector<4x1xf32> to vector<4x4xf32>
    %121 = arith.divf %117, %120 : vector<4x4xf32>
    %122 = vector.extract_strided_slice %48 {offsets = [0, 24], sizes = [4, 8], strides = [1, 1]} : vector<4x32xf32> to vector<4x8xf32>
    %cst_50 = arith.constant dense<0.000000e+00> : vector<4x8xf32>
    %123 = tpu.matmul %121, %122, %cst_50 {dimension_numbers = #tpu.dot_dimension_numbers<[1], [0], [0], [1], [0, 0, 1, 1], [], []>} : vector<4x4xf32>, vector<4x8xf32>, vector<4x8xf32> -> vector<4x8xf32>
    %c0_51 = arith.constant 0 : index
    %c24 = arith.constant 24 : index
    %124 = vector.load %arg22[%c0_51, %c24] : memref<4x32xf32, #tpu.memory_space<vmem>>, vector<4x8xf32>
    tpu.vector_store %arg22[%c0_51, %c24], %123 {strides = array<i32>} : memref<4x32xf32, #tpu.memory_space<vmem>>, vector<4x8xf32>,
    %c0_52 = arith.constant 0 : index
    %c0_53 = arith.constant 0 : index
    %125 = vector.load %arg22[%c0_52, %c0_53] : memref<4x32xf32, #tpu.memory_space<vmem>>, vector<4x32xf32>
    %c0_54 = arith.constant 0 : index
    %c0_55 = arith.constant 0 : index
    %c0_56 = arith.constant 0 : index
    %126 = vector.load %arg7[%c0_54, %c0_55, %c0_56] : memref<2x32x32xf32, #tpu.memory_space<vmem>>, vector<1x32x32xf32>
    %127 = vector.shape_cast %126 : vector<1x32x32xf32> to vector<32x32xf32>
    %cst_57 = arith.constant dense<0.000000e+00> : vector<4x32xf32>
    %128 = tpu.matmul %125, %127, %cst_57 {dimension_numbers = #tpu.dot_dimension_numbers<[1], [0], [0], [1], [0, 0, 1, 1], [], []>} : vector<4x32xf32>, vector<32x32xf32>, vector<4x32xf32> -> vector<4x32xf32>
    %129 = vector.broadcast %13 : vector<1x32xf32> to vector<4x32xf32>
    %130 = arith.addf %128, %129 : vector<4x32xf32>
    %131 = arith.addf %8, %130 : vector<4x32xf32>
    %cst_58 = arith.constant dense<0.000000e+00> : vector<4xf32>
    %132 = vector.multi_reduction <add>, %131, %cst_58 [1] : vector<4x32xf32> to vector<4xf32>
    %133 = vector.shape_cast %132 : vector<4xf32> to vector<4x1xf32>
    %cst_59 = arith.constant 3.200000e+01 : f32
    %134 = vector.broadcast %cst_59 : f32 to vector<4x1xf32>
    %135 = arith.divf %133, %134 : vector<4x1xf32>
    %136 = vector.broadcast %135 : vector<4x1xf32> to vector<4x32xf32>
    %137 = arith.subf %131, %136 : vector<4x32xf32>
    %138 = arith.mulf %137, %137 : vector<4x32xf32>
    %cst_60 = arith.constant dense<0.000000e+00> : vector<4xf32>
    %139 = vector.multi_reduction <add>, %138, %cst_60 [1] : vector<4x32xf32> to vector<4xf32>
    %140 = vector.shape_cast %139 : vector<4xf32> to vector<4x1xf32>
    %cst_61 = arith.constant 3.200000e+01 : f32
    %141 = vector.broadcast %cst_61 : f32 to vector<4x1xf32>
    %142 = arith.divf %140, %141 : vector<4x1xf32>
    %143 = vector.broadcast %135 : vector<4x1xf32> to vector<4x32xf32>
    %144 = arith.subf %131, %143 : vector<4x32xf32>
    %cst_62 = arith.constant 9.99999997E-7 : f32
    %145 = vector.broadcast %cst_62 : f32 to vector<4x1xf32>
    %146 = arith.addf %142, %145 : vector<4x1xf32>
    %147 = math.rsqrt %146 : vector<4x1xf32>
    %148 = vector.broadcast %147 : vector<4x1xf32> to vector<4x32xf32>
    %149 = arith.mulf %144, %148 : vector<4x32xf32>
    %150 = vector.broadcast %14 : vector<1x32xf32> to vector<4x32xf32>
    %151 = arith.mulf %149, %150 : vector<4x32xf32>
    %152 = vector.broadcast %15 : vector<1x32xf32> to vector<4x32xf32>
    %153 = arith.addf %151, %152 : vector<4x32xf32>
    %c0_63 = arith.constant 0 : index
    %c0_64 = arith.constant 0 : index
    %c0_65 = arith.constant 0 : index
    %154 = vector.load %arg8[%c0_63, %c0_64, %c0_65] : memref<2x32x64xf32, #tpu.memory_space<vmem>>, vector<1x32x64xf32>
    %155 = vector.shape_cast %154 : vector<1x32x64xf32> to vector<32x64xf32>
    %cst_66 = arith.constant dense<0.000000e+00> : vector<4x64xf32>
    %156 = tpu.matmul %153, %155, %cst_66 {dimension_numbers = #tpu.dot_dimension_numbers<[1], [0], [0], [1], [0, 0, 1, 1], [], []>} : vector<4x32xf32>, vector<32x64xf32>, vector<4x64xf32> -> vector<4x64xf32>
    %c0_67 = arith.constant 0 : index
    %c0_68 = arith.constant 0 : index
    %c0_69 = arith.constant 0 : index
    %157 = vector.load %arg9[%c0_67, %c0_68, %c0_69] : memref<2x1x64xf32, #tpu.memory_space<vmem>>, vector<1x1x64xf32>
    %158 = vector.shape_cast %157 : vector<1x1x64xf32> to vector<1x64xf32>
    %159 = vector.broadcast %158 : vector<1x64xf32> to vector<4x64xf32>
    %160 = arith.addf %156, %159 : vector<4x64xf32>
    %cst_70 = arith.constant 5.000000e-01 : f32
    %161 = vector.broadcast %cst_70 : f32 to vector<4x64xf32>
    %162 = arith.mulf %161, %160 : vector<4x64xf32>
    %cst_71 = arith.constant 4.471500e-02 : f32
    %163 = vector.broadcast %cst_71 : f32 to vector<4x64xf32>
    %164 = arith.mulf %163, %160 : vector<4x64xf32>
    %165 = arith.mulf %164, %160 : vector<4x64xf32>
    %166 = arith.mulf %165, %160 : vector<4x64xf32>
    %167 = arith.addf %160, %166 : vector<4x64xf32>
    %cst_72 = arith.constant 0.797884583 : f32
    %168 = vector.broadcast %cst_72 : f32 to vector<4x64xf32>
    %169 = arith.mulf %168, %167 : vector<4x64xf32>
    %170 = math.tanh %169 : vector<4x64xf32>
    %cst_73 = arith.constant 1.000000e+00 : f32
    %171 = vector.broadcast %cst_73 : f32 to vector<4x64xf32>
    %172 = arith.addf %171, %170 : vector<4x64xf32>
    %173 = arith.mulf %162, %172 : vector<4x64xf32>
    %c0_74 = arith.constant 0 : index
    %c0_75 = arith.constant 0 : index
    %c0_76 = arith.constant 0 : index
    %174 = vector.load %arg10[%c0_74, %c0_75, %c0_76] : memref<2x64x32xf32, #tpu.memory_space<vmem>>, vector<1x64x32xf32>
    %175 = vector.shape_cast %174 : vector<1x64x32xf32> to vector<64x32xf32>
    %cst_77 = arith.constant dense<0.000000e+00> : vector<4x32xf32>
    %176 = tpu.matmul %173, %175, %cst_77 {dimension_numbers = #tpu.dot_dimension_numbers<[1], [0], [0], [1], [0, 0, 1, 1], [], []>} : vector<4x64xf32>, vector<64x32xf32>, vector<4x32xf32> -> vector<4x32xf32>
    %177 = vector.broadcast %16 : vector<1x32xf32> to vector<4x32xf32>
    %178 = arith.addf %176, %177 : vector<4x32xf32>
    %179 = arith.addf %131, %178 : vector<4x32xf32>
    %c1 = arith.constant 1 : index
    %c0_78 = arith.constant 0 : index
    %c0_79 = arith.constant 0 : index
    %180 = vector.load %arg11[%c1, %c0_78, %c0_79] : memref<2x6x32xf32, #tpu.memory_space<vmem>>, vector<1x6x32xf32>
    %181 = vector.shape_cast %180 : vector<1x6x32xf32> to vector<6x32xf32>
    %182 = vector.extract_strided_slice %181 {offsets = [0, 0], sizes = [1, 32], strides = [1, 1]} : vector<6x32xf32> to vector<1x32xf32>
    %183 = vector.extract_strided_slice %181 {offsets = [1, 0], sizes = [1, 32], strides = [1, 1]} : vector<6x32xf32> to vector<1x32xf32>
    %184 = vector.extract_strided_slice %181 {offsets = [2, 0], sizes = [1, 32], strides = [1, 1]} : vector<6x32xf32> to vector<1x32xf32>
    %185 = vector.extract_strided_slice %181 {offsets = [3, 0], sizes = [1, 32], strides = [1, 1]} : vector<6x32xf32> to vector<1x32xf32>
    %186 = vector.extract_strided_slice %181 {offsets = [4, 0], sizes = [1, 32], strides = [1, 1]} : vector<6x32xf32> to vector<1x32xf32>
    %187 = vector.extract_strided_slice %181 {offsets = [5, 0], sizes = [1, 32], strides = [1, 1]} : vector<6x32xf32> to vector<1x32xf32>
    %cst_80 = arith.constant dense<0.000000e+00> : vector<4xf32>
    %188 = vector.multi_reduction <add>, %179, %cst_80 [1] : vector<4x32xf32> to vector<4xf32>
    %189 = vector.shape_cast %188 : vector<4xf32> to vector<4x1xf32>
    %cst_81 = arith.constant 3.200000e+01 : f32
    %190 = vector.broadcast %cst_81 : f32 to vector<4x1xf32>
    %191 = arith.divf %189, %190 : vector<4x1xf32>
    %192 = vector.broadcast %191 : vector<4x1xf32> to vector<4x32xf32>
    %193 = arith.subf %179, %192 : vector<4x32xf32>
    %194 = arith.mulf %193, %193 : vector<4x32xf32>
    %cst_82 = arith.constant dense<0.000000e+00> : vector<4xf32>
    %195 = vector.multi_reduction <add>, %194, %cst_82 [1] : vector<4x32xf32> to vector<4xf32>
    %196 = vector.shape_cast %195 : vector<4xf32> to vector<4x1xf32>
    %cst_83 = arith.constant 3.200000e+01 : f32
    %197 = vector.broadcast %cst_83 : f32 to vector<4x1xf32>
    %198 = arith.divf %196, %197 : vector<4x1xf32>
    %199 = vector.broadcast %191 : vector<4x1xf32> to vector<4x32xf32>
    %200 = arith.subf %179, %199 : vector<4x32xf32>
    %cst_84 = arith.constant 9.99999997E-7 : f32
    %201 = vector.broadcast %cst_84 : f32 to vector<4x1xf32>
    %202 = arith.addf %198, %201 : vector<4x1xf32>
    %203 = math.rsqrt %202 : vector<4x1xf32>
    %204 = vector.broadcast %203 : vector<4x1xf32> to vector<4x32xf32>
    %205 = arith.mulf %200, %204 : vector<4x32xf32>
    %206 = vector.broadcast %182 : vector<1x32xf32> to vector<4x32xf32>
    %207 = arith.mulf %205, %206 : vector<4x32xf32>
    %208 = vector.broadcast %183 : vector<1x32xf32> to vector<4x32xf32>
    %209 = arith.addf %207, %208 : vector<4x32xf32>
    %c1_85 = arith.constant 1 : index
    %c0_86 = arith.constant 0 : index
    %c0_87 = arith.constant 0 : index
    %210 = vector.load %arg5[%c1_85, %c0_86, %c0_87] : memref<2x32x96xf32, #tpu.memory_space<vmem>>, vector<1x32x96xf32>
    %211 = vector.shape_cast %210 : vector<1x32x96xf32> to vector<32x96xf32>
    %cst_88 = arith.constant dense<0.000000e+00> : vector<4x96xf32>
    %212 = tpu.matmul %209, %211, %cst_88 {dimension_numbers = #tpu.dot_dimension_numbers<[1], [0], [0], [1], [0, 0, 1, 1], [], []>} : vector<4x32xf32>, vector<32x96xf32>, vector<4x96xf32> -> vector<4x96xf32>
    %c1_89 = arith.constant 1 : index
    %c0_90 = arith.constant 0 : index
    %c0_91 = arith.constant 0 : index
    %213 = vector.load %arg6[%c1_89, %c0_90, %c0_91] : memref<2x1x96xf32, #tpu.memory_space<vmem>>, vector<1x1x96xf32>
    %214 = vector.shape_cast %213 : vector<1x1x96xf32> to vector<1x96xf32>
    %215 = vector.broadcast %214 : vector<1x96xf32> to vector<4x96xf32>
    %216 = arith.addf %212, %215 : vector<4x96xf32>
    %217 = vector.extract_strided_slice %216 {offsets = [0, 0], sizes = [4, 32], strides = [1, 1]} : vector<4x96xf32> to vector<4x32xf32>
    %218 = vector.extract_strided_slice %216 {offsets = [0, 32], sizes = [4, 32], strides = [1, 1]} : vector<4x96xf32> to vector<4x32xf32>
    %219 = vector.extract_strided_slice %216 {offsets = [0, 64], sizes = [4, 32], strides = [1, 1]} : vector<4x96xf32> to vector<4x32xf32>
    %220 = vector.extract_strided_slice %217 {offsets = [0, 0], sizes = [4, 8], strides = [1, 1]} : vector<4x32xf32> to vector<4x8xf32>
    %221 = vector.extract_strided_slice %218 {offsets = [0, 0], sizes = [4, 8], strides = [1, 1]} : vector<4x32xf32> to vector<4x8xf32>
    "tpu.trace_start"() <{level = 10 : i32, message = "qd,kd->qk"}> : () -> ()
    %cst_92 = arith.constant dense<0.000000e+00> : vector<4x4xf32>
    %222 = tpu.matmul %220, %221, %cst_92 {dimension_numbers = #tpu.dot_dimension_numbers<[1], [1], [0], [0], [0, 0, 1, 0], [], []>} : vector<4x8xf32>, vector<4x8xf32>, vector<4x4xf32> -> vector<4x4xf32>
    "tpu.trace_stop"() : () -> ()
    %cst_93 = arith.constant 0.353553385 : f32
    %223 = vector.broadcast %cst_93 : f32 to vector<4x4xf32>
    %224 = arith.mulf %222, %223 : vector<4x4xf32>
    %cst_94 = arith.constant dense<0xFF800000> : vector<4xf32>
    %225 = vector.multi_reduction <maximumf>, %224, %cst_94 [1] : vector<4x4xf32> to vector<4xf32>
    %cst_95 = arith.constant 0xFF800000 : f32
    %226 = vector.broadcast %cst_95 : f32 to vector<4xf32>
    %227 = arith.maximumf %226, %225 : vector<4xf32>
    %228 = vector.shape_cast %227 : vector<4xf32> to vector<4x1xf32>
    %229 = vector.broadcast %228 : vector<4x1xf32> to vector<4x4xf32>
    %230 = arith.subf %224, %229 : vector<4x4xf32>
    %231 = math.exp %230 : vector<4x4xf32>
    %cst_96 = arith.constant dense<0.000000e+00> : vector<4xf32>
    %232 = vector.multi_reduction <add>, %231, %cst_96 [1] : vector<4x4xf32> to vector<4xf32>
    %233 = vector.shape_cast %232 : vector<4xf32> to vector<4x1xf32>
    %234 = vector.broadcast %233 : vector<4x1xf32> to vector<4x4xf32>
    %235 = arith.divf %231, %234 : vector<4x4xf32>
    %236 = vector.extract_strided_slice %219 {offsets = [0, 0], sizes = [4, 8], strides = [1, 1]} : vector<4x32xf32> to vector<4x8xf32>
    %cst_97 = arith.constant dense<0.000000e+00> : vector<4x8xf32>
    %237 = tpu.matmul %235, %236, %cst_97 {dimension_numbers = #tpu.dot_dimension_numbers<[1], [0], [0], [1], [0, 0, 1, 1], [], []>} : vector<4x4xf32>, vector<4x8xf32>, vector<4x8xf32> -> vector<4x8xf32>
    %c0_98 = arith.constant 0 : index
    %c0_99 = arith.constant 0 : index
    %238 = vector.load %arg22[%c0_98, %c0_99] : memref<4x32xf32, #tpu.memory_space<vmem>>, vector<4x8xf32>
    tpu.vector_store %arg22[%c0_98, %c0_99], %237 {strides = array<i32>} : memref<4x32xf32, #tpu.memory_space<vmem>>, vector<4x8xf32>,
    %239 = vector.extract_strided_slice %217 {offsets = [0, 8], sizes = [4, 8], strides = [1, 1]} : vector<4x32xf32> to vector<4x8xf32>
    %240 = vector.extract_strided_slice %218 {offsets = [0, 8], sizes = [4, 8], strides = [1, 1]} : vector<4x32xf32> to vector<4x8xf32>
    "tpu.trace_start"() <{level = 10 : i32, message = "qd,kd->qk"}> : () -> ()
    %cst_100 = arith.constant dense<0.000000e+00> : vector<4x4xf32>
    %241 = tpu.matmul %239, %240, %cst_100 {dimension_numbers = #tpu.dot_dimension_numbers<[1], [1], [0], [0], [0, 0, 1, 0], [], []>} : vector<4x8xf32>, vector<4x8xf32>, vector<4x4xf32> -> vector<4x4xf32>
    "tpu.trace_stop"() : () -> ()
    %cst_101 = arith.constant 0.353553385 : f32
    %242 = vector.broadcast %cst_101 : f32 to vector<4x4xf32>
    %243 = arith.mulf %241, %242 : vector<4x4xf32>
    %cst_102 = arith.constant dense<0xFF800000> : vector<4xf32>
    %244 = vector.multi_reduction <maximumf>, %243, %cst_102 [1] : vector<4x4xf32> to vector<4xf32>
    %cst_103 = arith.constant 0xFF800000 : f32
    %245 = vector.broadcast %cst_103 : f32 to vector<4xf32>
    %246 = arith.maximumf %245, %244 : vector<4xf32>
    %247 = vector.shape_cast %246 : vector<4xf32> to vector<4x1xf32>
    %248 = vector.broadcast %247 : vector<4x1xf32> to vector<4x4xf32>
    %249 = arith.subf %243, %248 : vector<4x4xf32>
    %250 = math.exp %249 : vector<4x4xf32>
    %cst_104 = arith.constant dense<0.000000e+00> : vector<4xf32>
    %251 = vector.multi_reduction <add>, %250, %cst_104 [1] : vector<4x4xf32> to vector<4xf32>
    %252 = vector.shape_cast %251 : vector<4xf32> to vector<4x1xf32>
    %253 = vector.broadcast %252 : vector<4x1xf32> to vector<4x4xf32>
    %254 = arith.divf %250, %253 : vector<4x4xf32>
    %255 = vector.extract_strided_slice %219 {offsets = [0, 8], sizes = [4, 8], strides = [1, 1]} : vector<4x32xf32> to vector<4x8xf32>
    %cst_105 = arith.constant dense<0.000000e+00> : vector<4x8xf32>
    %256 = tpu.matmul %254, %255, %cst_105 {dimension_numbers = #tpu.dot_dimension_numbers<[1], [0], [0], [1], [0, 0, 1, 1], [], []>} : vector<4x4xf32>, vector<4x8xf32>, vector<4x8xf32> -> vector<4x8xf32>
    %c0_106 = arith.constant 0 : index
    %c8_107 = arith.constant 8 : index
    %257 = vector.load %arg22[%c0_106, %c8_107] : memref<4x32xf32, #tpu.memory_space<vmem>>, vector<4x8xf32>
    tpu.vector_store %arg22[%c0_106, %c8_107], %256 {strides = array<i32>} : memref<4x32xf32, #tpu.memory_space<vmem>>, vector<4x8xf32>,
    %258 = vector.extract_strided_slice %217 {offsets = [0, 16], sizes = [4, 8], strides = [1, 1]} : vector<4x32xf32> to vector<4x8xf32>
    %259 = vector.extract_strided_slice %218 {offsets = [0, 16], sizes = [4, 8], strides = [1, 1]} : vector<4x32xf32> to vector<4x8xf32>
    "tpu.trace_start"() <{level = 10 : i32, message = "qd,kd->qk"}> : () -> ()
    %cst_108 = arith.constant dense<0.000000e+00> : vector<4x4xf32>
    %260 = tpu.matmul %258, %259, %cst_108 {dimension_numbers = #tpu.dot_dimension_numbers<[1], [1], [0], [0], [0, 0, 1, 0], [], []>} : vector<4x8xf32>, vector<4x8xf32>, vector<4x4xf32> -> vector<4x4xf32>
    "tpu.trace_stop"() : () -> ()
    %cst_109 = arith.constant 0.353553385 : f32
    %261 = vector.broadcast %cst_109 : f32 to vector<4x4xf32>
    %262 = arith.mulf %260, %261 : vector<4x4xf32>
    %cst_110 = arith.constant dense<0xFF800000> : vector<4xf32>
    %263 = vector.multi_reduction <maximumf>, %262, %cst_110 [1] : vector<4x4xf32> to vector<4xf32>
    %cst_111 = arith.constant 0xFF800000 : f32
    %264 = vector.broadcast %cst_111 : f32 to vector<4xf32>
    %265 = arith.maximumf %264, %263 : vector<4xf32>
    %266 = vector.shape_cast %265 : vector<4xf32> to vector<4x1xf32>
    %267 = vector.broadcast %266 : vector<4x1xf32> to vector<4x4xf32>
    %268 = arith.subf %262, %267 : vector<4x4xf32>
    %269 = math.exp %268 : vector<4x4xf32>
    %cst_112 = arith.constant dense<0.000000e+00> : vector<4xf32>
    %270 = vector.multi_reduction <add>, %269, %cst_112 [1] : vector<4x4xf32> to vector<4xf32>
    %271 = vector.shape_cast %270 : vector<4xf32> to vector<4x1xf32>
    %272 = vector.broadcast %271 : vector<4x1xf32> to vector<4x4xf32>
    %273 = arith.divf %269, %272 : vector<4x4xf32>
    %274 = vector.extract_strided_slice %219 {offsets = [0, 16], sizes = [4, 8], strides = [1, 1]} : vector<4x32xf32> to vector<4x8xf32>
    %cst_113 = arith.constant dense<0.000000e+00> : vector<4x8xf32>
    %275 = tpu.matmul %273, %274, %cst_113 {dimension_numbers = #tpu.dot_dimension_numbers<[1], [0], [0], [1], [0, 0, 1, 1], [], []>} : vector<4x4xf32>, vector<4x8xf32>, vector<4x8xf32> -> vector<4x8xf32>
    %c0_114 = arith.constant 0 : index
    %c16_115 = arith.constant 16 : index
    %276 = vector.load %arg22[%c0_114, %c16_115] : memref<4x32xf32, #tpu.memory_space<vmem>>, vector<4x8xf32>
    tpu.vector_store %arg22[%c0_114, %c16_115], %275 {strides = array<i32>} : memref<4x32xf32, #tpu.memory_space<vmem>>, vector<4x8xf32>,
    %277 = vector.extract_strided_slice %217 {offsets = [0, 24], sizes = [4, 8], strides = [1, 1]} : vector<4x32xf32> to vector<4x8xf32>
    %278 = vector.extract_strided_slice %218 {offsets = [0, 24], sizes = [4, 8], strides = [1, 1]} : vector<4x32xf32> to vector<4x8xf32>
    "tpu.trace_start"() <{level = 10 : i32, message = "qd,kd->qk"}> : () -> ()
    %cst_116 = arith.constant dense<0.000000e+00> : vector<4x4xf32>
    %279 = tpu.matmul %277, %278, %cst_116 {dimension_numbers = #tpu.dot_dimension_numbers<[1], [1], [0], [0], [0, 0, 1, 0], [], []>} : vector<4x8xf32>, vector<4x8xf32>, vector<4x4xf32> -> vector<4x4xf32>
    "tpu.trace_stop"() : () -> ()
    %cst_117 = arith.constant 0.353553385 : f32
    %280 = vector.broadcast %cst_117 : f32 to vector<4x4xf32>
    %281 = arith.mulf %279, %280 : vector<4x4xf32>
    %cst_118 = arith.constant dense<0xFF800000> : vector<4xf32>
    %282 = vector.multi_reduction <maximumf>, %281, %cst_118 [1] : vector<4x4xf32> to vector<4xf32>
    %cst_119 = arith.constant 0xFF800000 : f32
    %283 = vector.broadcast %cst_119 : f32 to vector<4xf32>
    %284 = arith.maximumf %283, %282 : vector<4xf32>
    %285 = vector.shape_cast %284 : vector<4xf32> to vector<4x1xf32>
    %286 = vector.broadcast %285 : vector<4x1xf32> to vector<4x4xf32>
    %287 = arith.subf %281, %286 : vector<4x4xf32>
    %288 = math.exp %287 : vector<4x4xf32>
    %cst_120 = arith.constant dense<0.000000e+00> : vector<4xf32>
    %289 = vector.multi_reduction <add>, %288, %cst_120 [1] : vector<4x4xf32> to vector<4xf32>
    %290 = vector.shape_cast %289 : vector<4xf32> to vector<4x1xf32>
    %291 = vector.broadcast %290 : vector<4x1xf32> to vector<4x4xf32>
    %292 = arith.divf %288, %291 : vector<4x4xf32>
    %293 = vector.extract_strided_slice %219 {offsets = [0, 24], sizes = [4, 8], strides = [1, 1]} : vector<4x32xf32> to vector<4x8xf32>
    %cst_121 = arith.constant dense<0.000000e+00> : vector<4x8xf32>
    %294 = tpu.matmul %292, %293, %cst_121 {dimension_numbers = #tpu.dot_dimension_numbers<[1], [0], [0], [1], [0, 0, 1, 1], [], []>} : vector<4x4xf32>, vector<4x8xf32>, vector<4x8xf32> -> vector<4x8xf32>
    %c0_122 = arith.constant 0 : index
    %c24_123 = arith.constant 24 : index
    %295 = vector.load %arg22[%c0_122, %c24_123] : memref<4x32xf32, #tpu.memory_space<vmem>>, vector<4x8xf32>
    tpu.vector_store %arg22[%c0_122, %c24_123], %294 {strides = array<i32>} : memref<4x32xf32, #tpu.memory_space<vmem>>, vector<4x8xf32>,
    %c0_124 = arith.constant 0 : index
    %c0_125 = arith.constant 0 : index
    %296 = vector.load %arg22[%c0_124, %c0_125] : memref<4x32xf32, #tpu.memory_space<vmem>>, vector<4x32xf32>
    %c1_126 = arith.constant 1 : index
    %c0_127 = arith.constant 0 : index
    %c0_128 = arith.constant 0 : index
    %297 = vector.load %arg7[%c1_126, %c0_127, %c0_128] : memref<2x32x32xf32, #tpu.memory_space<vmem>>, vector<1x32x32xf32>
    %298 = vector.shape_cast %297 : vector<1x32x32xf32> to vector<32x32xf32>
    %cst_129 = arith.constant dense<0.000000e+00> : vector<4x32xf32>
    %299 = tpu.matmul %296, %298, %cst_129 {dimension_numbers = #tpu.dot_dimension_numbers<[1], [0], [0], [1], [0, 0, 1, 1], [], []>} : vector<4x32xf32>, vector<32x32xf32>, vector<4x32xf32> -> vector<4x32xf32>
    %300 = vector.broadcast %184 : vector<1x32xf32> to vector<4x32xf32>
    %301 = arith.addf %299, %300 : vector<4x32xf32>
    %302 = arith.addf %179, %301 : vector<4x32xf32>
    %cst_130 = arith.constant dense<0.000000e+00> : vector<4xf32>
    %303 = vector.multi_reduction <add>, %302, %cst_130 [1] : vector<4x32xf32> to vector<4xf32>
    %304 = vector.shape_cast %303 : vector<4xf32> to vector<4x1xf32>
    %cst_131 = arith.constant 3.200000e+01 : f32
    %305 = vector.broadcast %cst_131 : f32 to vector<4x1xf32>
    %306 = arith.divf %304, %305 : vector<4x1xf32>
    %307 = vector.broadcast %306 : vector<4x1xf32> to vector<4x32xf32>
    %308 = arith.subf %302, %307 : vector<4x32xf32>
    %309 = arith.mulf %308, %308 : vector<4x32xf32>
    %cst_132 = arith.constant dense<0.000000e+00> : vector<4xf32>
    %310 = vector.multi_reduction <add>, %309, %cst_132 [1] : vector<4x32xf32> to vector<4xf32>
    %311 = vector.shape_cast %310 : vector<4xf32> to vector<4x1xf32>
    %cst_133 = arith.constant 3.200000e+01 : f32
    %312 = vector.broadcast %cst_133 : f32 to vector<4x1xf32>
    %313 = arith.divf %311, %312 : vector<4x1xf32>
    %314 = vector.broadcast %306 : vector<4x1xf32> to vector<4x32xf32>
    %315 = arith.subf %302, %314 : vector<4x32xf32>
    %cst_134 = arith.constant 9.99999997E-7 : f32
    %316 = vector.broadcast %cst_134 : f32 to vector<4x1xf32>
    %317 = arith.addf %313, %316 : vector<4x1xf32>
    %318 = math.rsqrt %317 : vector<4x1xf32>
    %319 = vector.broadcast %318 : vector<4x1xf32> to vector<4x32xf32>
    %320 = arith.mulf %315, %319 : vector<4x32xf32>
    %321 = vector.broadcast %185 : vector<1x32xf32> to vector<4x32xf32>
    %322 = arith.mulf %320, %321 : vector<4x32xf32>
    %323 = vector.broadcast %186 : vector<1x32xf32> to vector<4x32xf32>
    %324 = arith.addf %322, %323 : vector<4x32xf32>
    %c1_135 = arith.constant 1 : index
    %c0_136 = arith.constant 0 : index
    %c0_137 = arith.constant 0 : index
    %325 = vector.load %arg8[%c1_135, %c0_136, %c0_137] : memref<2x32x64xf32, #tpu.memory_space<vmem>>, vector<1x32x64xf32>
    %326 = vector.shape_cast %325 : vector<1x32x64xf32> to vector<32x64xf32>
    %cst_138 = arith.constant dense<0.000000e+00> : vector<4x64xf32>
    %327 = tpu.matmul %324, %326, %cst_138 {dimension_numbers = #tpu.dot_dimension_numbers<[1], [0], [0], [1], [0, 0, 1, 1], [], []>} : vector<4x32xf32>, vector<32x64xf32>, vector<4x64xf32> -> vector<4x64xf32>
    %c1_139 = arith.constant 1 : index
    %c0_140 = arith.constant 0 : index
    %c0_141 = arith.constant 0 : index
    %328 = vector.load %arg9[%c1_139, %c0_140, %c0_141] : memref<2x1x64xf32, #tpu.memory_space<vmem>>, vector<1x1x64xf32>
    %329 = vector.shape_cast %328 : vector<1x1x64xf32> to vector<1x64xf32>
    %330 = vector.broadcast %329 : vector<1x64xf32> to vector<4x64xf32>
    %331 = arith.addf %327, %330 : vector<4x64xf32>
    %cst_142 = arith.constant 5.000000e-01 : f32
    %332 = vector.broadcast %cst_142 : f32 to vector<4x64xf32>
    %333 = arith.mulf %332, %331 : vector<4x64xf32>
    %cst_143 = arith.constant 4.471500e-02 : f32
    %334 = vector.broadcast %cst_143 : f32 to vector<4x64xf32>
    %335 = arith.mulf %334, %331 : vector<4x64xf32>
    %336 = arith.mulf %335, %331 : vector<4x64xf32>
    %337 = arith.mulf %336, %331 : vector<4x64xf32>
    %338 = arith.addf %331, %337 : vector<4x64xf32>
    %cst_144 = arith.constant 0.797884583 : f32
    %339 = vector.broadcast %cst_144 : f32 to vector<4x64xf32>
    %340 = arith.mulf %339, %338 : vector<4x64xf32>
    %341 = math.tanh %340 : vector<4x64xf32>
    %cst_145 = arith.constant 1.000000e+00 : f32
    %342 = vector.broadcast %cst_145 : f32 to vector<4x64xf32>
    %343 = arith.addf %342, %341 : vector<4x64xf32>
    %344 = arith.mulf %333, %343 : vector<4x64xf32>
    %c1_146 = arith.constant 1 : index
    %c0_147 = arith.constant 0 : index
    %c0_148 = arith.constant 0 : index
    %345 = vector.load %arg10[%c1_146, %c0_147, %c0_148] : memref<2x64x32xf32, #tpu.memory_space<vmem>>, vector<1x64x32xf32>
    %346 = vector.shape_cast %345 : vector<1x64x32xf32> to vector<64x32xf32>
    %cst_149 = arith.constant dense<0.000000e+00> : vector<4x32xf32>
    %347 = tpu.matmul %344, %346, %cst_149 {dimension_numbers = #tpu.dot_dimension_numbers<[1], [0], [0], [1], [0, 0, 1, 1], [], []>} : vector<4x64xf32>, vector<64x32xf32>, vector<4x32xf32> -> vector<4x32xf32>
    %348 = vector.broadcast %187 : vector<1x32xf32> to vector<4x32xf32>
    %349 = arith.addf %347, %348 : vector<4x32xf32>
    %350 = arith.addf %302, %349 : vector<4x32xf32>
    %c0_150 = arith.constant 0 : index
    %c0_151 = arith.constant 0 : index
    %351 = vector.load %arg19[%c0_150, %c0_151] : memref<9x32xf32, #tpu.memory_space<vmem>>, vector<9x32xf32>
    %352 = vector.extract_strided_slice %351 {offsets = [0, 0], sizes = [1, 32], strides = [1, 1]} : vector<9x32xf32> to vector<1x32xf32>
    %353 = vector.extract_strided_slice %351 {offsets = [1, 0], sizes = [1, 32], strides = [1, 1]} : vector<9x32xf32> to vector<1x32xf32>
    %cst_152 = arith.constant dense<0.000000e+00> : vector<4xf32>
    %354 = vector.multi_reduction <add>, %350, %cst_152 [1] : vector<4x32xf32> to vector<4xf32>
    %355 = vector.shape_cast %354 : vector<4xf32> to vector<4x1xf32>
    %cst_153 = arith.constant 3.200000e+01 : f32
    %356 = vector.broadcast %cst_153 : f32 to vector<4x1xf32>
    %357 = arith.divf %355, %356 : vector<4x1xf32>
    %358 = vector.broadcast %357 : vector<4x1xf32> to vector<4x32xf32>
    %359 = arith.subf %350, %358 : vector<4x32xf32>
    %360 = arith.mulf %359, %359 : vector<4x32xf32>
    %cst_154 = arith.constant dense<0.000000e+00> : vector<4xf32>
    %361 = vector.multi_reduction <add>, %360, %cst_154 [1] : vector<4x32xf32> to vector<4xf32>
    %362 = vector.shape_cast %361 : vector<4xf32> to vector<4x1xf32>
    %cst_155 = arith.constant 3.200000e+01 : f32
    %363 = vector.broadcast %cst_155 : f32 to vector<4x1xf32>
    %364 = arith.divf %362, %363 : vector<4x1xf32>
    %365 = vector.broadcast %357 : vector<4x1xf32> to vector<4x32xf32>
    %366 = arith.subf %350, %365 : vector<4x32xf32>
    %cst_156 = arith.constant 9.99999997E-7 : f32
    %367 = vector.broadcast %cst_156 : f32 to vector<4x1xf32>
    %368 = arith.addf %364, %367 : vector<4x1xf32>
    %369 = math.rsqrt %368 : vector<4x1xf32>
    %370 = vector.broadcast %369 : vector<4x1xf32> to vector<4x32xf32>
    %371 = arith.mulf %366, %370 : vector<4x32xf32>
    %372 = vector.broadcast %352 : vector<1x32xf32> to vector<4x32xf32>
    %373 = arith.mulf %371, %372 : vector<4x32xf32>
    %374 = vector.broadcast %353 : vector<1x32xf32> to vector<4x32xf32>
    %375 = arith.addf %373, %374 : vector<4x32xf32>
    %c0_157 = arith.constant 0 : index
    %c0_158 = arith.constant 0 : index
    %c0_159 = arith.constant 0 : index
    %376 = vector.load %arg20[%c0_157, %c0_158, %c0_159] : memref<1x4x32xf32, #tpu.memory_space<vmem>>, vector<1x4x32xf32>
    %377 = vector.shape_cast %376 : vector<1x4x32xf32> to vector<4x32xf32>
    %378 = vector.shape_cast %375 : vector<4x32xf32> to vector<1x4x32xf32>
    tpu.vector_store %arg20[%c0_157, %c0_158, %c0_159], %378 {strides = array<i32>} : memref<1x4x32xf32, #tpu.memory_space<vmem>>, vector<1x4x32xf32>,
    %379 = vector.extract_strided_slice %351 {offsets = [2, 0], sizes = [1, 32], strides = [1, 1]} : vector<9x32xf32> to vector<1x32xf32>
    %380 = vector.extract_strided_slice %351 {offsets = [3, 0], sizes = [1, 32], strides = [1, 1]} : vector<9x32xf32> to vector<1x32xf32>
    %381 = vector.extract_strided_slice %351 {offsets = [4, 0], sizes = [1, 32], strides = [1, 1]} : vector<9x32xf32> to vector<1x32xf32>
    %382 = vector.extract_strided_slice %351 {offsets = [5, 0], sizes = [1, 32], strides = [1, 1]} : vector<9x32xf32> to vector<1x32xf32>
    %383 = vector.extract_strided_slice %351 {offsets = [6, 0], sizes = [1, 32], strides = [1, 1]} : vector<9x32xf32> to vector<1x32xf32>
    %384 = vector.extract_strided_slice %351 {offsets = [7, 0], sizes = [1, 32], strides = [1, 1]} : vector<9x32xf32> to vector<1x32xf32>
    %385 = vector.extract_strided_slice %351 {offsets = [8, 0], sizes = [1, 32], strides = [1, 1]} : vector<9x32xf32> to vector<1x32xf32>
    %c0_160 = arith.constant 0 : index
    %c0_161 = arith.constant 0 : index
    %386 = vector.load %arg12[%c0_160, %c0_161] : memref<1x32xf32, #tpu.memory_space<vmem>>, vector<1x32xf32>
    %c0_162 = arith.constant 0 : index
    %c0_163 = arith.constant 0 : index
    %387 = vector.load %arg13[%c0_162, %c0_163] : memref<32x32xf32, #tpu.memory_space<vmem>>, vector<32x32xf32>
    %cst_164 = arith.constant dense<0.000000e+00> : vector<1x32xf32>
    %388 = tpu.matmul %386, %387, %cst_164 {dimension_numbers = #tpu.dot_dimension_numbers<[1], [0], [0], [1], [0, 0, 1, 1], [], []>} : vector<1x32xf32>, vector<32x32xf32>, vector<1x32xf32> -> vector<1x32xf32>
    %389 = arith.addf %388, %379 : vector<1x32xf32>
    %c0_165 = arith.constant 0 : index
    %c0_166 = arith.constant 0 : index
    %390 = vector.load %arg14[%c0_165, %c0_166] : memref<32x64xf32, #tpu.memory_space<vmem>>, vector<32x64xf32>
    %cst_167 = arith.constant dense<0.000000e+00> : vector<4x64xf32>
    %391 = tpu.matmul %375, %390, %cst_167 {dimension_numbers = #tpu.dot_dimension_numbers<[1], [0], [0], [1], [0, 0, 1, 1], [], []>} : vector<4x32xf32>, vector<32x64xf32>, vector<4x64xf32> -> vector<4x64xf32>
    %392 = vector.extract_strided_slice %391 {offsets = [0, 0], sizes = [4, 32], strides = [1, 1]} : vector<4x64xf32> to vector<4x32xf32>
    %393 = vector.broadcast %380 : vector<1x32xf32> to vector<4x32xf32>
    %394 = arith.addf %392, %393 : vector<4x32xf32>
    %395 = vector.extract_strided_slice %391 {offsets = [0, 32], sizes = [4, 32], strides = [1, 1]} : vector<4x64xf32> to vector<4x32xf32>
    %396 = vector.broadcast %381 : vector<1x32xf32> to vector<4x32xf32>
    %397 = arith.addf %395, %396 : vector<4x32xf32>
    %398 = vector.extract_strided_slice %389 {offsets = [0, 0], sizes = [1, 8], strides = [1, 1]} : vector<1x32xf32> to vector<1x8xf32>
    %399 = vector.extract_strided_slice %394 {offsets = [0, 0], sizes = [4, 8], strides = [1, 1]} : vector<4x32xf32> to vector<4x8xf32>
    "tpu.trace_start"() <{level = 10 : i32, message = "qd,kd->qk"}> : () -> ()
    %cst_168 = arith.constant dense<0.000000e+00> : vector<1x4xf32>
    %400 = tpu.matmul %398, %399, %cst_168 {dimension_numbers = #tpu.dot_dimension_numbers<[1], [1], [0], [0], [0, 0, 1, 0], [], []>} : vector<1x8xf32>, vector<4x8xf32>, vector<1x4xf32> -> vector<1x4xf32>
    "tpu.trace_stop"() : () -> ()
    %cst_169 = arith.constant 0.353553385 : f32
    %401 = vector.broadcast %cst_169 : f32 to vector<1x4xf32>
    %402 = arith.mulf %400, %401 : vector<1x4xf32>
    %cst_170 = arith.constant dense<0xFF800000> : vector<1xf32>
    %403 = vector.multi_reduction <maximumf>, %402, %cst_170 [1] : vector<1x4xf32> to vector<1xf32>
    %cst_171 = arith.constant 0xFF800000 : f32
    %404 = vector.broadcast %cst_171 : f32 to vector<1xf32>
    %405 = arith.maximumf %404, %403 : vector<1xf32>
    %406 = vector.shape_cast %405 : vector<1xf32> to vector<1x1xf32>
    %407 = vector.broadcast %406 : vector<1x1xf32> to vector<1x4xf32>
    %408 = arith.subf %402, %407 : vector<1x4xf32>
    %409 = math.exp %408 : vector<1x4xf32>
    %cst_172 = arith.constant dense<0.000000e+00> : vector<1xf32>
    %410 = vector.multi_reduction <add>, %409, %cst_172 [1] : vector<1x4xf32> to vector<1xf32>
    %411 = vector.shape_cast %410 : vector<1xf32> to vector<1x1xf32>
    %412 = vector.broadcast %411 : vector<1x1xf32> to vector<1x4xf32>
    %413 = arith.divf %409, %412 : vector<1x4xf32>
    %414 = vector.extract_strided_slice %397 {offsets = [0, 0], sizes = [4, 8], strides = [1, 1]} : vector<4x32xf32> to vector<4x8xf32>
    %cst_173 = arith.constant dense<0.000000e+00> : vector<1x8xf32>
    %415 = tpu.matmul %413, %414, %cst_173 {dimension_numbers = #tpu.dot_dimension_numbers<[1], [0], [0], [1], [0, 0, 1, 1], [], []>} : vector<1x4xf32>, vector<4x8xf32>, vector<1x8xf32> -> vector<1x8xf32>
    %c0_174 = arith.constant 0 : index
    %c0_175 = arith.constant 0 : index
    %416 = vector.load %arg22[%c0_174, %c0_175] : memref<4x32xf32, #tpu.memory_space<vmem>>, vector<1x8xf32>
    tpu.vector_store %arg22[%c0_174, %c0_175], %415 {strides = array<i32>} : memref<4x32xf32, #tpu.memory_space<vmem>>, vector<1x8xf32>,
    %417 = vector.extract_strided_slice %389 {offsets = [0, 8], sizes = [1, 8], strides = [1, 1]} : vector<1x32xf32> to vector<1x8xf32>
    %418 = vector.extract_strided_slice %394 {offsets = [0, 8], sizes = [4, 8], strides = [1, 1]} : vector<4x32xf32> to vector<4x8xf32>
    "tpu.trace_start"() <{level = 10 : i32, message = "qd,kd->qk"}> : () -> ()
    %cst_176 = arith.constant dense<0.000000e+00> : vector<1x4xf32>
    %419 = tpu.matmul %417, %418, %cst_176 {dimension_numbers = #tpu.dot_dimension_numbers<[1], [1], [0], [0], [0, 0, 1, 0], [], []>} : vector<1x8xf32>, vector<4x8xf32>, vector<1x4xf32> -> vector<1x4xf32>
    "tpu.trace_stop"() : () -> ()
    %cst_177 = arith.constant 0.353553385 : f32
    %420 = vector.broadcast %cst_177 : f32 to vector<1x4xf32>
    %421 = arith.mulf %419, %420 : vector<1x4xf32>
    %cst_178 = arith.constant dense<0xFF800000> : vector<1xf32>
    %422 = vector.multi_reduction <maximumf>, %421, %cst_178 [1] : vector<1x4xf32> to vector<1xf32>
    %cst_179 = arith.constant 0xFF800000 : f32
    %423 = vector.broadcast %cst_179 : f32 to vector<1xf32>
    %424 = arith.maximumf %423, %422 : vector<1xf32>
    %425 = vector.shape_cast %424 : vector<1xf32> to vector<1x1xf32>
    %426 = vector.broadcast %425 : vector<1x1xf32> to vector<1x4xf32>
    %427 = arith.subf %421, %426 : vector<1x4xf32>
    %428 = math.exp %427 : vector<1x4xf32>
    %cst_180 = arith.constant dense<0.000000e+00> : vector<1xf32>
    %429 = vector.multi_reduction <add>, %428, %cst_180 [1] : vector<1x4xf32> to vector<1xf32>
    %430 = vector.shape_cast %429 : vector<1xf32> to vector<1x1xf32>
    %431 = vector.broadcast %430 : vector<1x1xf32> to vector<1x4xf32>
    %432 = arith.divf %428, %431 : vector<1x4xf32>
    %433 = vector.extract_strided_slice %397 {offsets = [0, 8], sizes = [4, 8], strides = [1, 1]} : vector<4x32xf32> to vector<4x8xf32>
    %cst_181 = arith.constant dense<0.000000e+00> : vector<1x8xf32>
    %434 = tpu.matmul %432, %433, %cst_181 {dimension_numbers = #tpu.dot_dimension_numbers<[1], [0], [0], [1], [0, 0, 1, 1], [], []>} : vector<1x4xf32>, vector<4x8xf32>, vector<1x8xf32> -> vector<1x8xf32>
    %c0_182 = arith.constant 0 : index
    %c8_183 = arith.constant 8 : index
    %435 = vector.load %arg22[%c0_182, %c8_183] : memref<4x32xf32, #tpu.memory_space<vmem>>, vector<1x8xf32>
    tpu.vector_store %arg22[%c0_182, %c8_183], %434 {strides = array<i32>} : memref<4x32xf32, #tpu.memory_space<vmem>>, vector<1x8xf32>,
    %436 = vector.extract_strided_slice %389 {offsets = [0, 16], sizes = [1, 8], strides = [1, 1]} : vector<1x32xf32> to vector<1x8xf32>
    %437 = vector.extract_strided_slice %394 {offsets = [0, 16], sizes = [4, 8], strides = [1, 1]} : vector<4x32xf32> to vector<4x8xf32>
    "tpu.trace_start"() <{level = 10 : i32, message = "qd,kd->qk"}> : () -> ()
    %cst_184 = arith.constant dense<0.000000e+00> : vector<1x4xf32>
    %438 = tpu.matmul %436, %437, %cst_184 {dimension_numbers = #tpu.dot_dimension_numbers<[1], [1], [0], [0], [0, 0, 1, 0], [], []>} : vector<1x8xf32>, vector<4x8xf32>, vector<1x4xf32> -> vector<1x4xf32>
    "tpu.trace_stop"() : () -> ()
    %cst_185 = arith.constant 0.353553385 : f32
    %439 = vector.broadcast %cst_185 : f32 to vector<1x4xf32>
    %440 = arith.mulf %438, %439 : vector<1x4xf32>
    %cst_186 = arith.constant dense<0xFF800000> : vector<1xf32>
    %441 = vector.multi_reduction <maximumf>, %440, %cst_186 [1] : vector<1x4xf32> to vector<1xf32>
    %cst_187 = arith.constant 0xFF800000 : f32
    %442 = vector.broadcast %cst_187 : f32 to vector<1xf32>
    %443 = arith.maximumf %442, %441 : vector<1xf32>
    %444 = vector.shape_cast %443 : vector<1xf32> to vector<1x1xf32>
    %445 = vector.broadcast %444 : vector<1x1xf32> to vector<1x4xf32>
    %446 = arith.subf %440, %445 : vector<1x4xf32>
    %447 = math.exp %446 : vector<1x4xf32>
    %cst_188 = arith.constant dense<0.000000e+00> : vector<1xf32>
    %448 = vector.multi_reduction <add>, %447, %cst_188 [1] : vector<1x4xf32> to vector<1xf32>
    %449 = vector.shape_cast %448 : vector<1xf32> to vector<1x1xf32>
    %450 = vector.broadcast %449 : vector<1x1xf32> to vector<1x4xf32>
    %451 = arith.divf %447, %450 : vector<1x4xf32>
    %452 = vector.extract_strided_slice %397 {offsets = [0, 16], sizes = [4, 8], strides = [1, 1]} : vector<4x32xf32> to vector<4x8xf32>
    %cst_189 = arith.constant dense<0.000000e+00> : vector<1x8xf32>
    %453 = tpu.matmul %451, %452, %cst_189 {dimension_numbers = #tpu.dot_dimension_numbers<[1], [0], [0], [1], [0, 0, 1, 1], [], []>} : vector<1x4xf32>, vector<4x8xf32>, vector<1x8xf32> -> vector<1x8xf32>
    %c0_190 = arith.constant 0 : index
    %c16_191 = arith.constant 16 : index
    %454 = vector.load %arg22[%c0_190, %c16_191] : memref<4x32xf32, #tpu.memory_space<vmem>>, vector<1x8xf32>
    tpu.vector_store %arg22[%c0_190, %c16_191], %453 {strides = array<i32>} : memref<4x32xf32, #tpu.memory_space<vmem>>, vector<1x8xf32>,
    %455 = vector.extract_strided_slice %389 {offsets = [0, 24], sizes = [1, 8], strides = [1, 1]} : vector<1x32xf32> to vector<1x8xf32>
    %456 = vector.extract_strided_slice %394 {offsets = [0, 24], sizes = [4, 8], strides = [1, 1]} : vector<4x32xf32> to vector<4x8xf32>
    "tpu.trace_start"() <{level = 10 : i32, message = "qd,kd->qk"}> : () -> ()
    %cst_192 = arith.constant dense<0.000000e+00> : vector<1x4xf32>
    %457 = tpu.matmul %455, %456, %cst_192 {dimension_numbers = #tpu.dot_dimension_numbers<[1], [1], [0], [0], [0, 0, 1, 0], [], []>} : vector<1x8xf32>, vector<4x8xf32>, vector<1x4xf32> -> vector<1x4xf32>
    "tpu.trace_stop"() : () -> ()
    %cst_193 = arith.constant 0.353553385 : f32
    %458 = vector.broadcast %cst_193 : f32 to vector<1x4xf32>
    %459 = arith.mulf %457, %458 : vector<1x4xf32>
    %cst_194 = arith.constant dense<0xFF800000> : vector<1xf32>
    %460 = vector.multi_reduction <maximumf>, %459, %cst_194 [1] : vector<1x4xf32> to vector<1xf32>
    %cst_195 = arith.constant 0xFF800000 : f32
    %461 = vector.broadcast %cst_195 : f32 to vector<1xf32>
    %462 = arith.maximumf %461, %460 : vector<1xf32>
    %463 = vector.shape_cast %462 : vector<1xf32> to vector<1x1xf32>
    %464 = vector.broadcast %463 : vector<1x1xf32> to vector<1x4xf32>
    %465 = arith.subf %459, %464 : vector<1x4xf32>
    %466 = math.exp %465 : vector<1x4xf32>
    %cst_196 = arith.constant dense<0.000000e+00> : vector<1xf32>
    %467 = vector.multi_reduction <add>, %466, %cst_196 [1] : vector<1x4xf32> to vector<1xf32>
    %468 = vector.shape_cast %467 : vector<1xf32> to vector<1x1xf32>
    %469 = vector.broadcast %468 : vector<1x1xf32> to vector<1x4xf32>
    %470 = arith.divf %466, %469 : vector<1x4xf32>
    %471 = vector.extract_strided_slice %397 {offsets = [0, 24], sizes = [4, 8], strides = [1, 1]} : vector<4x32xf32> to vector<4x8xf32>
    %cst_197 = arith.constant dense<0.000000e+00> : vector<1x8xf32>
    %472 = tpu.matmul %470, %471, %cst_197 {dimension_numbers = #tpu.dot_dimension_numbers<[1], [0], [0], [1], [0, 0, 1, 1], [], []>} : vector<1x4xf32>, vector<4x8xf32>, vector<1x8xf32> -> vector<1x8xf32>
    %c0_198 = arith.constant 0 : index
    %c24_199 = arith.constant 24 : index
    %473 = vector.load %arg22[%c0_198, %c24_199] : memref<4x32xf32, #tpu.memory_space<vmem>>, vector<1x8xf32>
    tpu.vector_store %arg22[%c0_198, %c24_199], %472 {strides = array<i32>} : memref<4x32xf32, #tpu.memory_space<vmem>>, vector<1x8xf32>,
    %c0_200 = arith.constant 0 : index
    %c0_201 = arith.constant 0 : index
    %474 = vector.load %arg22[%c0_200, %c0_201] : memref<4x32xf32, #tpu.memory_space<vmem>>, vector<1x32xf32>
    %c0_202 = arith.constant 0 : index
    %c0_203 = arith.constant 0 : index
    %475 = vector.load %arg15[%c0_202, %c0_203] : memref<32x32xf32, #tpu.memory_space<vmem>>, vector<32x32xf32>
    %cst_204 = arith.constant dense<0.000000e+00> : vector<1x32xf32>
    %476 = tpu.matmul %474, %475, %cst_204 {dimension_numbers = #tpu.dot_dimension_numbers<[1], [0], [0], [1], [0, 0, 1, 1], [], []>} : vector<1x32xf32>, vector<32x32xf32>, vector<1x32xf32> -> vector<1x32xf32>
    %477 = arith.addf %476, %382 : vector<1x32xf32>
    %cst_205 = arith.constant dense<0.000000e+00> : vector<1xf32>
    %478 = vector.multi_reduction <add>, %477, %cst_205 [1] : vector<1x32xf32> to vector<1xf32>
    %479 = vector.shape_cast %478 : vector<1xf32> to vector<1x1xf32>
    %cst_206 = arith.constant 3.200000e+01 : f32
    %480 = vector.broadcast %cst_206 : f32 to vector<1x1xf32>
    %481 = arith.divf %479, %480 : vector<1x1xf32>
    %482 = vector.broadcast %481 : vector<1x1xf32> to vector<1x32xf32>
    %483 = arith.subf %477, %482 : vector<1x32xf32>
    %484 = arith.mulf %483, %483 : vector<1x32xf32>
    %cst_207 = arith.constant dense<0.000000e+00> : vector<1xf32>
    %485 = vector.multi_reduction <add>, %484, %cst_207 [1] : vector<1x32xf32> to vector<1xf32>
    %486 = vector.shape_cast %485 : vector<1xf32> to vector<1x1xf32>
    %cst_208 = arith.constant 3.200000e+01 : f32
    %487 = vector.broadcast %cst_208 : f32 to vector<1x1xf32>
    %488 = arith.divf %486, %487 : vector<1x1xf32>
    %489 = vector.broadcast %481 : vector<1x1xf32> to vector<1x32xf32>
    %490 = arith.subf %477, %489 : vector<1x32xf32>
    %cst_209 = arith.constant 9.99999997E-7 : f32
    %491 = vector.broadcast %cst_209 : f32 to vector<1x1xf32>
    %492 = arith.addf %488, %491 : vector<1x1xf32>
    %493 = math.rsqrt %492 : vector<1x1xf32>
    %494 = vector.broadcast %493 : vector<1x1xf32> to vector<1x32xf32>
    %495 = arith.mulf %490, %494 : vector<1x32xf32>
    %496 = arith.mulf %495, %383 : vector<1x32xf32>
    %497 = arith.addf %496, %384 : vector<1x32xf32>
    %c0_210 = arith.constant 0 : index
    %c0_211 = arith.constant 0 : index
    %498 = vector.load %arg16[%c0_210, %c0_211] : memref<32x64xf32, #tpu.memory_space<vmem>>, vector<32x64xf32>
    %cst_212 = arith.constant dense<0.000000e+00> : vector<1x64xf32>
    %499 = tpu.matmul %497, %498, %cst_212 {dimension_numbers = #tpu.dot_dimension_numbers<[1], [0], [0], [1], [0, 0, 1, 1], [], []>} : vector<1x32xf32>, vector<32x64xf32>, vector<1x64xf32> -> vector<1x64xf32>
    %c0_213 = arith.constant 0 : index
    %c0_214 = arith.constant 0 : index
    %500 = vector.load %arg17[%c0_213, %c0_214] : memref<1x64xf32, #tpu.memory_space<vmem>>, vector<1x64xf32>
    %501 = arith.addf %499, %500 : vector<1x64xf32>
    %cst_215 = arith.constant 5.000000e-01 : f32
    %502 = vector.broadcast %cst_215 : f32 to vector<1x64xf32>
    %503 = arith.mulf %502, %501 : vector<1x64xf32>
    %cst_216 = arith.constant 4.471500e-02 : f32
    %504 = vector.broadcast %cst_216 : f32 to vector<1x64xf32>
    %505 = arith.mulf %504, %501 : vector<1x64xf32>
    %506 = arith.mulf %505, %501 : vector<1x64xf32>
    %507 = arith.mulf %506, %501 : vector<1x64xf32>
    %508 = arith.addf %501, %507 : vector<1x64xf32>
    %cst_217 = arith.constant 0.797884583 : f32
    %509 = vector.broadcast %cst_217 : f32 to vector<1x64xf32>
    %510 = arith.mulf %509, %508 : vector<1x64xf32>
    %511 = math.tanh %510 : vector<1x64xf32>
    %cst_218 = arith.constant 1.000000e+00 : f32
    %512 = vector.broadcast %cst_218 : f32 to vector<1x64xf32>
    %513 = arith.addf %512, %511 : vector<1x64xf32>
    %514 = arith.mulf %503, %513 : vector<1x64xf32>
    %c0_219 = arith.constant 0 : index
    %c0_220 = arith.constant 0 : index
    %515 = vector.load %arg18[%c0_219, %c0_220] : memref<64x32xf32, #tpu.memory_space<vmem>>, vector<64x32xf32>
    %cst_221 = arith.constant dense<0.000000e+00> : vector<1x32xf32>
    %516 = tpu.matmul %514, %515, %cst_221 {dimension_numbers = #tpu.dot_dimension_numbers<[1], [0], [0], [1], [0, 0, 1, 1], [], []>} : vector<1x64xf32>, vector<64x32xf32>, vector<1x32xf32> -> vector<1x32xf32>
    %517 = arith.addf %516, %385 : vector<1x32xf32>
    %518 = arith.addf %477, %517 : vector<1x32xf32>
    %c0_222 = arith.constant 0 : index
    %c0_223 = arith.constant 0 : index
    %c0_224 = arith.constant 0 : index
    %519 = vector.load %arg21[%c0_222, %c0_223, %c0_224] : memref<1x1x32xf32, #tpu.memory_space<vmem>>, vector<1x1x32xf32>
    %520 = vector.shape_cast %519 : vector<1x1x32xf32> to vector<1x32xf32>
    %521 = vector.shape_cast %518 : vector<1x32xf32> to vector<1x1x32xf32>
    tpu.vector_store %arg21[%c0_222, %c0_223, %c0_224], %521 {strides = array<i32>} : memref<1x1x32xf32, #tpu.memory_space<vmem>>, vector<1x1x32xf32>,
    return
  }
  func.func @transform_0(%arg0: i32) -> (i32, i32, i32) {
    %c0_i32 = arith.constant 0 : i32
    %c0_i32_0 = arith.constant 0 : i32
    %c0_i32_1 = arith.constant 0 : i32
    return %arg0, %c0_i32, %c0_i32_0 : i32, i32, i32
  }
  func.func @transform_1(%arg0: i32) -> (i32, i32) {
    %c0_i32 = arith.constant 0 : i32
    %c0_i32_0 = arith.constant 0 : i32
    %c0_i32_1 = arith.constant 0 : i32
    return %c0_i32, %c0_i32_0 : i32, i32
  }
  func.func @transform_2(%arg0: i32) -> (i32, i32) {
    %c0_i32 = arith.constant 0 : i32
    %c0_i32_0 = arith.constant 0 : i32
    %c0_i32_1 = arith.constant 0 : i32
    return %c0_i32, %c0_i32_0 : i32, i32
  }
  func.func @transform_3(%arg0: i32) -> (i32, i32) {
    %c0_i32 = arith.constant 0 : i32
    %c0_i32_0 = arith.constant 0 : i32
    %c0_i32_1 = arith.constant 0 : i32
    return %c0_i32, %c0_i32_0 : i32, i32
  }
  func.func @transform_4(%arg0: i32) -> (i32, i32, i32) {
    %c0_i32 = arith.constant 0 : i32
    %c0_i32_0 = arith.constant 0 : i32
    %c0_i32_1 = arith.constant 0 : i32
    %c0_i32_2 = arith.constant 0 : i32
    return %c0_i32, %c0_i32_0, %c0_i32_1 : i32, i32, i32
  }
  func.func @transform_5(%arg0: i32) -> (i32, i32, i32) {
    %c0_i32 = arith.constant 0 : i32
    %c0_i32_0 = arith.constant 0 : i32
    %c0_i32_1 = arith.constant 0 : i32
    %c0_i32_2 = arith.constant 0 : i32
    return %c0_i32, %c0_i32_0, %c0_i32_1 : i32, i32, i32
  }
  func.func @transform_6(%arg0: i32) -> (i32, i32, i32) {
    %c0_i32 = arith.constant 0 : i32
    %c0_i32_0 = arith.constant 0 : i32
    %c0_i32_1 = arith.constant 0 : i32
    %c0_i32_2 = arith.constant 0 : i32
    return %c0_i32, %c0_i32_0, %c0_i32_1 : i32, i32, i32
  }
  func.func @transform_7(%arg0: i32) -> (i32, i32, i32) {
    %c0_i32 = arith.constant 0 : i32
    %c0_i32_0 = arith.constant 0 : i32
    %c0_i32_1 = arith.constant 0 : i32
    %c0_i32_2 = arith.constant 0 : i32
    return %c0_i32, %c0_i32_0, %c0_i32_1 : i32, i32, i32
  }
  func.func @transform_8(%arg0: i32) -> (i32, i32, i32) {
    %c0_i32 = arith.constant 0 : i32
    %c0_i32_0 = arith.constant 0 : i32
    %c0_i32_1 = arith.constant 0 : i32
    %c0_i32_2 = arith.constant 0 : i32
    return %c0_i32, %c0_i32_0, %c0_i32_1 : i32, i32, i32
  }
  func.func @transform_9(%arg0: i32) -> (i32, i32, i32) {
    %c0_i32 = arith.constant 0 : i32
    %c0_i32_0 = arith.constant 0 : i32
    %c0_i32_1 = arith.constant 0 : i32
    %c0_i32_2 = arith.constant 0 : i32
    return %c0_i32, %c0_i32_0, %c0_i32_1 : i32, i32, i32
  }
  func.func @transform_10(%arg0: i32) -> (i32, i32, i32) {
    %c0_i32 = arith.constant 0 : i32
    %c0_i32_0 = arith.constant 0 : i32
    %c0_i32_1 = arith.constant 0 : i32
    %c0_i32_2 = arith.constant 0 : i32
    return %c0_i32, %c0_i32_0, %c0_i32_1 : i32, i32, i32
  }
  func.func @transform_11(%arg0: i32) -> (i32, i32) {
    %c0_i32 = arith.constant 0 : i32
    %c0_i32_0 = arith.constant 0 : i32
    %c0_i32_1 = arith.constant 0 : i32
    return %c0_i32, %c0_i32_0 : i32, i32
  }
  func.func @transform_12(%arg0: i32) -> (i32, i32) {
    %c0_i32 = arith.constant 0 : i32
    %c0_i32_0 = arith.constant 0 : i32
    %c0_i32_1 = arith.constant 0 : i32
    return %c0_i32, %c0_i32_0 : i32, i32
  }
  func.func @transform_13(%arg0: i32) -> (i32, i32) {
    %c0_i32 = arith.constant 0 : i32
    %c0_i32_0 = arith.constant 0 : i32
    %c0_i32_1 = arith.constant 0 : i32
    return %c0_i32, %c0_i32_0 : i32, i32
  }
  func.func @transform_14(%arg0: i32) -> (i32, i32) {
    %c0_i32 = arith.constant 0 : i32
    %c0_i32_0 = arith.constant 0 : i32
    %c0_i32_1 = arith.constant 0 : i32
    return %c0_i32, %c0_i32_0 : i32, i32
  }
  func.func @transform_15(%arg0: i32) -> (i32, i32) {
    %c0_i32 = arith.constant 0 : i32
    %c0_i32_0 = arith.constant 0 : i32
    %c0_i32_1 = arith.constant 0 : i32
    return %c0_i32, %c0_i32_0 : i32, i32
  }
  func.func @transform_16(%arg0: i32) -> (i32, i32) {
    %c0_i32 = arith.constant 0 : i32
    %c0_i32_0 = arith.constant 0 : i32
    %c0_i32_1 = arith.constant 0 : i32
    return %c0_i32, %c0_i32_0 : i32, i32
  }
  func.func @transform_17(%arg0: i32) -> (i32, i32) {
    %c0_i32 = arith.constant 0 : i32
    %c0_i32_0 = arith.constant 0 : i32
    %c0_i32_1 = arith.constant 0 : i32
    return %c0_i32, %c0_i32_0 : i32, i32
  }
  func.func @transform_18(%arg0: i32) -> (i32, i32) {
    %c0_i32 = arith.constant 0 : i32
    %c0_i32_0 = arith.constant 0 : i32
    %c0_i32_1 = arith.constant 0 : i32
    return %c0_i32, %c0_i32_0 : i32, i32
  }
  func.func @transform_19(%arg0: i32) -> (i32, i32, i32) {
    %c0_i32 = arith.constant 0 : i32
    %c0_i32_0 = arith.constant 0 : i32
    %c0_i32_1 = arith.constant 0 : i32
    return %arg0, %c0_i32, %c0_i32_0 : i32, i32, i32
  }
  func.func @transform_20(%arg0: i32) -> (i32, i32, i32) {
    %c0_i32 = arith.constant 0 : i32
    %c0_i32_0 = arith.constant 0 : i32
    %c0_i32_1 = arith.constant 0 : i32
    return %arg0, %c0_i32, %c0_i32_0 : i32, i32, i32
  }
}

</mosaic_0001>

<bundles_post_ra>
// kernel: siglip_vision_transformer.1
= control target key start
LH: loop header
LB: loop body
LE: loop exit
PB: predicated region body
PF: predicated region fallthrough
CT: control target
= control target key end

     0   :  { %s6079_s0 = inlined_call_operand.vmem [shape: f32[2,4,256], index: 0, kind: input, shape index: {}]   ;;  %s6080_s1 = inlined_call_operand.vmem [shape: f32[256,32], index: 1, kind: input, shape index: {}]   ;;  %s6081_s2 = inlined_call_operand.vmem [shape: f32[1,32], index: 2, kind: input, shape index: {}]   ;;  %s6082_s3 = inlined_call_operand.vmem [shape: f32[4,32], index: 3, kind: input, shape index: {}]   ;;  %s6083_s4 = inlined_call_operand.vmem [shape: f32[2,32,96], index: 4, kind: input, shape index: {}]   ;;  %s6084_s5 = inlined_call_operand.vmem [shape: f32[2,1,96], index: 5, kind: input, shape index: {}]   ;;  %s6085_s6 = inlined_call_operand.vmem [shape: f32[2,32,32], index: 6, kind: input, shape index: {}]   ;;  %s6086_s7 = inlined_call_operand.vmem [shape: f32[2,32,64], index: 7, kind: input, shape index: {}]   ;;  %s6087_s8 = inlined_call_operand.vmem [shape: f32[2,1,64], index: 8, kind: input, shape index: {}]   ;;  %s6088_s9 = inlined_call_operand.vmem [shape: f32[2,64,32], index: 9, kind: input, shape index: {}]   ;;  %s6089_s10 = inlined_call_operand.vmem [shape: f32[2,6,32], index: 10, kind: input, shape index: {}]   ;;  %s6090_s11 = inlined_call_operand.vmem [shape: f32[1,32], index: 11, kind: input, shape index: {}]   ;;  %s6091_s12 = inlined_call_operand.vmem [shape: f32[32,32], index: 12, kind: input, shape index: {}]   ;;  %s6092_s13 = inlined_call_operand.vmem [shape: f32[32,64], index: 13, kind: input, shape index: {}]   ;;  %s6093_s14 = inlined_call_operand.vmem [shape: f32[32,32], index: 14, kind: input, shape index: {}]   ;;  %s6094_s15 = inlined_call_operand.vmem [shape: f32[32,64], index: 15, kind: input, shape index: {}]   ;;  %s6095_s16 = inlined_call_operand.vmem [shape: f32[1,64], index: 16, kind: input, shape index: {}]   ;;  %s6096_s17 = inlined_call_operand.vmem [shape: f32[64,32], index: 17, kind: input, shape index: {}]   ;;  %s6097_s18 = inlined_call_operand.vmem [shape: f32[9,32], index: 18, kind: input, shape index: {}]   ;;  %s6098_s19 = inlined_call_operand.hbm [shape: f32[2,4,32], index: 19, kind: output, shape index: {0}]   ;;  %s6099_s20 = inlined_call_operand.hbm [shape: f32[2,1,32], index: 20, kind: output, shape index: {1}]  }
   0x1   :  { %6133 = sst [smem:[#allocation15_spill]] %s6079_s0 }
   0x2   :  { %6134 = sst [smem:[#allocation16_spill]] %s6080_s1 }
   0x3   :  { %6135 = sst [smem:[#allocation17_spill]] %s6081_s2 }
   0x4   :  { %6136 = sst [smem:[#allocation18_spill]] %s6082_s3 }
   0x5   :  { %6137 = sst [smem:[#allocation19_spill]] %s6083_s4 }
   0x6   :  { %6138 = sst [smem:[#allocation20_spill]] %s6084_s5 }
   0x7   :  { %6139 = sst [smem:[#allocation21_spill]] %s6085_s6 }
   0x8   :  { %6140 = sst [smem:[#allocation22_spill]] %s6086_s7 }
   0x9   :  { %6141 = sst [smem:[#allocation23_spill]] %s6087_s8 }
   0xa   :  { %6142 = sst [smem:[#allocation24_spill]] %s6098_s19 }
   0xb   :  { %6143 = sst [smem:[#allocation25_spill]] %s6099_s20 }
   0xc   :  { %26 = vsyncpa [#allocation4], 0 }
   0xd   :  { %28 = vsyncpa [#allocation4 + $0x1], 0 }
   0xe   :  { %29 = vsyncpa [#allocation6], 0 }
   0xf   :  { %31 = vsyncpa [#allocation6 + $0x1], 0  ;;  %s5225_s1 = smov 0   ;;  %s5227_s22 = smov 0  }
  0x10   :  { %s5229_s23 = smov 0   ;;  %s5231_s24 = smov 0  }
  0x11 LB: > { %6144 = sst [smem:[#allocation9_spill]] %s5086_s1  ;;  %s5246_s2 = sadd.s32 4294967295, %s5098_s24   ;;  %s5098_s24 = sphi %s5231_s24, %s6182_s24   ;;  %s5094_s23 = sphi %s5229_s23, %s6184_s23   ;;  %s5090_s22 = sphi %s5227_s22, %s6186_s22   ;;  %s5086_s1 = sphi %s5225_s1, %s6185_s1  }
  0x12   : > { %6145 = sst [smem:[#allocation10_spill]] %s5094_s23  ;;  %s4198_s25 = sadd.s32 4294967294, %s5098_s24  }
  0x13   : > { %6146 = sst [smem:[#allocation11_spill]] %s5098_s24  ;;  %s5250_s3 = sadd.s32 1, %s5098_s24  }
  0x14   : > { %6147 = sst [smem:[#allocation12_spill]] %s5250_s3  ;;  %s448_s26 = sadd.s32 1, %s5094_s23 }
  0x15   : > { %s445_s27 = ssub.s32 %s5098_s24, %s5250_s3  ;;  %p458_p0 = scmp.ne.s32.totalorder %s5094_s23, %s5090_s22 }
  0x16   : > { %p446_p1 = scmp.eq.s32.totalorder %s445_s27, 0  ;;  %p459_p2 = scmp.eq.s32.totalorder %s5246_s2, 1 }
  0x17   : > { %p464_p3 = scmp.ne.s32.totalorder %s5090_s22, %s5086_s1  ;;  %p465_p4 = scmp.eq.s32.totalorder %s4198_s25, 1 }
  0x18   : > { %s5261_s28 = scalar_select %p446_p1, %s5094_s23, %s448_s26  }
  0x19   : > { %p5263_p5 = por %p459_p2, %p458_p0  ;;  %p5267_p6 = por %p465_p4, %p464_p3 }
  0x1a   : > { %6148 = sst [smem:[#allocation13_spill]] %s5261_s28  ;;  %p4201_p7 = scmp.ge.s32.totalorder %s5098_s24, 1 }
  0x1b   : > { %s6150_s29 = scalar_select %p5267_p6, 1, 0 }
  0x1c   : > { %p571_p8 = scmp.lt.s32.totalorder %s5098_s24, 3 }
  0x1d   : > { %6151 = sst [smem:[#allocation14_spill]] %s6150_s29 }
  0x1e   : > { %p572_p9 = pnand %p4201_p7, %p571_p8 }
  0x1f   : > { %s6152_s21 = sld [smem:[#allocation16_spill]] (!%p572_p9)  ;;  %p633_p10 = scmp.lt.s32.totalorder (!%p572_p9), %s5246_s2, 1  ;;  %vm754_vm0 = vcmask (!%p572_p9), 257024   ;;  %vm5101_vm1 = vmmov (!%p572_p9), 0   ;;  %vm790_vm2 = vcmask (!%p572_p9), 261120   ;;  %vm867_vm3 = vcmask (!%p572_p9), 64512  }
  0x20   : > { %575 = sbr.rel (%p572_p9) target bundleno = 8871 (0x22a7), region = 96  ;;  %s6153_s20 = sld [smem:[#allocation15_spill]] (!%p572_p9)  ;;  %vm961_vm4 = vcmask (!%p572_p9), 1043456   ;;  %vm943_vm5 = vcmask (!%p572_p9), 27648   ;;  %vm957_vm6 = vcmask (!%p572_p9), 31744   ;;  %vm1034_vm7 = vcmask (!%p572_p9), 60416  }
  0x21   : > { %s6154_s0 = sld [smem:[#allocation17_spill]] (!%p572_p9)  ;;  %s6156_s23 = sld [smem:[#allocation19_spill]] (!%p572_p9)  ;;  %vm1207_vm8 = vcmask (!%p572_p9), 126016   ;;  %vm1380_vm9 = vcmask (!%p572_p9), 191616   ;;  %vm1553_vm10 = vcmask (!%p572_p9), 257216   ;;  %vm1766_vm11 = vcmask (!%p572_p9), 523264  }
  0x22   : > { %s6158_s5 = sld [smem:[#allocation20_spill]] (!%p572_p9)  ;;  %s6115_s27 = smov (!%p572_p9), 64   ;;  %vm3199_vm12 = vcmask (!%p572_p9), 24576   ;;  %vm3289_vm13 = vcmask (!%p572_p9), 57344   ;;  %vm3462_vm14 = vcmask (!%p572_p9), 122944   ;;  %vm3635_vm15 = vcmask (!%p572_p9), 188544  }
  0x23   : > { %s6129_s24 = smov (!%p572_p9), 88   ;;  %s6126_s29 = smov (!%p572_p9), 80  }
  0x24   : > { %s6116_s25 = smov (!%p572_p9), 104   ;;  %s6113_s26 = smov (!%p572_p9), 40  }
  0x25   : > { %v655_v0 = vld [vmem:[%s6152_s21 + $0x80] sm:$0xff] (!%p572_p9)  ;;  %v656_v1 = vld [vmem:[%s6152_s21 + $0x88] sm:$0xff] (!%p572_p9)  ;;  %v657_v5 = vld [vmem:[%s6152_s21 + $0x90] sm:$0xff] (!%p572_p9)  ;;  %s6110_s28 = smov (!%p572_p9), 8   ;;  %s6159_s6 = sld [smem:[#allocation21_spill]] (!%p572_p9) }
  0x26   : > { %v639_v2 = vld [vmem:[%s6152_s21] sm:$0xff] (!%p572_p9)  ;;  %v4747_v3 = vpack.c.bf16 (!%p572_p9), %v656_v1, %v655_v0  ;;  %v640_v4 = vld [vmem:[%s6152_s21 + $0x8] sm:$0xff] (!%p572_p9)  ;;  %v658_v6 = vld [vmem:[%s6152_s21 + $0x98] sm:$0xff] (!%p572_p9)  ;;  %s6160_s7 = sld [smem:[#allocation22_spill]] (!%p572_p9)  ;;  %s6161_s8 = sld [smem:[#allocation23_spill]] (!%p572_p9) }
  0x27   : > { %v4749_v7 = vpack.c.bf16 %v640_v4, %v639_v2  ;;  %v4751_v8 = vpack.c.bf16 %v658_v6, %v657_v5  ;;  %v641_v9 = vld [vmem:[%s6152_s21 + $0x10] sm:$0xff]  ;;  %v642_v10 = vld [vmem:[%s6152_s21 + $0x18] sm:$0xff]  ;;  %v659_v11 = vld [vmem:[%s6152_s21 + $0xa0] sm:$0xff]  ;;  %s634_s1 = scalar_select %p633_p10, %s5246_s2, 1  ;;  %v5100_v2 = vmov 0.0|0.0   ;;  %v5102_v5 = vmov 0.0  }
  0x28   : > { %4748 = vmatprep.subr.bf16.mxu0 %v4747_v3  ;;  %v660_v12 = vld [vmem:[%s6152_s21 + $0xa8] sm:$0xff]  ;;  %v4753_v13 = vpack.c.bf16 %v642_v10, %v641_v9  ;;  %v643_v15 = vld [vmem:[%s6152_s21 + $0x20] sm:$0xff]  ;;  %v661_v17 = vld [vmem:[%s6152_s21 + $0xb0] sm:$0xff]  ;;  %s6157_s3 = smov %s6156_s23  ;;  %4779 = vmatprep.subr.bf16.mxu1 %v5100_v2  ;;  %v769_v9 = vlaneseq }
  0x29   : > { %4750 = vmatpush3.bf16.msra.mxu0 %v4749_v7  ;;  %s4299_s30 = sshll.u32 %s634_s1, 3  ;;  %v4755_v14 = vpack.c.bf16 %v660_v12, %v659_v11  ;;  %v644_v16 = vld [vmem:[%s6152_s21 + $0x28] sm:$0xff]  ;;  %v662_v18 = vld [vmem:[%s6152_s21 + $0xb8] sm:$0xff]  ;;  %v645_v21 = vld [vmem:[%s6152_s21 + $0x30] sm:$0xff]  ;;  %4468 = vmatprep.mubr.msk.f32.mxu1 %vm5101_vm1, %v5102_v5  ;;  %s6120_s1 = smov 112  }
  0x2a   : > { %4752 = vmatprep.subr.bf16.mxu0 %v4751_v8  ;;  %s637_s19 = scalar_lea.vmem %s6153_s20, %s4299_s30  ;;  %v4757_v19 = vpack.c.bf16 %v644_v16, %v643_v15  ;;  %v4759_v20 = vpack.c.bf16 %v662_v18, %v661_v17  ;;  %v646_v22 = vld [vmem:[%s6152_s21 + $0x38] sm:$0xff]  ;;  %v663_v23 = vld [vmem:[%s6152_s21 + $0xc0] sm:$0xff]  ;;  %v664_v24 = vld [vmem:[%s6152_s21 + $0xc8] sm:$0xff]  ;;  %v5406_v11 = vshrl.u32 %v769_v9, 7  ;;  %s6130_s20 = smov 120  }
  0x2b   : > { %v638_v25 = vld [vmem:[%s637_s19] sm:$0xff]  ;;  %v4761_v27 = vpack.c.bf16 %v646_v22, %v645_v21  ;;  %v4763_v28 = vpack.c.bf16 %v664_v24, %v663_v23  ;;  %v648_v30 = vld [vmem:[%s6152_s21 + $0x48] sm:$0xff]  ;;  %v665_v31 = vld [vmem:[%s6152_s21 + $0xd0] sm:$0xff]  ;;  %s6155_s19 = sld [smem:[#allocation18_spill]]  ;;  %s6112_s30 = smov 56  }
  0x2c   : > { %v679_v26 = vcombine.high %v638_v25, %v638_v25  ;;  %v647_v29 = vld [vmem:[%s6152_s21 + $0x40] sm:$0xff]  ;;  %v666_v32 = vld [vmem:[%s6152_s21 + $0xd8] sm:$0xff]  ;;  %v649_v35 = vld [vmem:[%s6152_s21 + $0x50] sm:$0xff]  ;;  %v5409_v12 = vsub.s32 0, %v5406_v11 }
  0x2d   : > { %4754 = vmatpush3.bf16.msra.mxu0 %v4753_v13  ;;  %v4765_v33 = vpack.c.bf16 %v648_v30, %v647_v29  ;;  %v4767_v34 = vpack.c.bf16 %v666_v32, %v665_v31  ;;  %v650_v36 = vld [vmem:[%s6152_s21 + $0x58] sm:$0xff]  ;;  %v667_v37 = vld [vmem:[%s6152_s21 + $0xe0] sm:$0xff]  ;;  %v668_v38 = vld [vmem:[%s6152_s21 + $0xe8] sm:$0xff] }
  0x2e   : > { %4756 = vmatprep.subr.bf16.mxu0 %v4755_v14  ;;  %745 = vmatprep.mubr.f32.mxu0 %v679_v26  ;;  %v4769_v39 = vpack.c.bf16 %v650_v36, %v649_v35  ;;  %v4771_v40 = vpack.c.bf16 %v668_v38, %v667_v37  ;;  %v651_v41 = vld [vmem:[%s6152_s21 + $0x60] sm:$0xff]  ;;  %v652_v42 = vld [vmem:[%s6152_s21 + $0x68] sm:$0xff]  ;;  %v669_v43 = vld [vmem:[%s6152_s21 + $0xf0] sm:$0xff]  ;;  %v5417_v14 = vsub.s32 1, %v5406_v11 }
  0x2f   : > { %v670_v44 = vld [vmem:[%s6152_s21 + $0xf8] sm:$0xff]  ;;  %v4773_v45 = vpack.c.bf16 %v652_v42, %v651_v41  ;;  %v653_v47 = vld [vmem:[%s6152_s21 + $0x70] sm:$0xff]  ;;  %v4205_v51 = vld [vmem:[%s6154_s0] ss:$0 sm:$0xff]  ;;  %s6118_s0 = smov 72  }
  0x30   : > { %v4775_v46 = vpack.c.bf16 %v670_v44, %v669_v43  ;;  %v654_v48 = vld [vmem:[%s6152_s21 + $0x78] sm:$0xff]  ;;  %v779_v63 = vld [vmem:[%s6156_s23] sm:$0xff]  ;;  %v780_v0 = vld [vmem:[%s6157_s3 + $0x8] sm:$0xff]  ;;  %s6128_s23 = smov 96  }
  0x31   : > { %4758 = vmatpush3.bf16.msra.mxu0 %v4757_v19  ;;  %v4777_v49 = vpack.c.bf16 %v654_v48, %v653_v47  ;;  %v751_v54 = vld [vmem:[%s6155_s19] sm:$0xf]  ;;  %v781_v1 = vld [vmem:[%s6157_s3 + $0x10] sm:$0xff]  ;;  %v4780_v3 = vpack.c.bf16 %v780_v0, %v779_v63  ;;  %v782_v4 = vld [vmem:[%s6157_s3 + $0x18] sm:$0xff]  ;;  %s6114_s19 = smov 48  }
  0x32   : > { %4760 = vmatprep.subr.bf16.mxu0 %v4759_v20  ;;  %v4783_v6 = vpack.c.bf16 %v782_v4, %v781_v1  ;;  %v5414_v13 = vld [vmem:[%s6089_s10] sm:$0x3f] }
  0x33   : > { %4781 = vmatpush3.bf16.msra.mxu1 %v4780_v3  ;;  %v772_v15 = vrot.slane %v5414_v13, %v5409_v12  ;;  %v777_v18 = vrot.slane %v5414_v13, %v5417_v14  ;;  %v4206_v21 = vld [vmem:[%s6158_s5] ss:$0 sm:$0xff] }
  0x34   : > { %4782 = vmatprep.subr.bf16.mxu1 %v5100_v2 }
  0x35   : > { %4762 = vmatpush3.bf16.msra.mxu0 %v4761_v27 }
  0x36   : > { %4764 = vmatprep.subr.bf16.mxu0 %v4763_v28 }
  0x37   : > { %4784 = vmatpush3.bf16.msra.mxu1 %v4783_v6 }
  0x38   : > { %4471 = vmatprep.subr.mxu1 %v5102_v5 }
  0x39   : > { %4766 = vmatpush3.bf16.msra.mxu0 %v4765_v33 }
  0x3a   : > { %4768 = vmatprep.subr.bf16.mxu0 %v4767_v34 }
  0x3d   : > { %4770 = vmatpush3.bf16.msra.mxu0 %v4769_v39 }
  0x3e   : > { %4772 = vmatprep.subr.bf16.mxu0 %v4771_v40 }
  0x41   : > { %4774 = vmatpush3.bf16.msra.mxu0 %v4773_v45 }
  0x42   : > { %4776 = vmatprep.subr.bf16.mxu0 %v4775_v46 }
  0x45   : > { %4778 = vmatpush3.bf16.msra.mxu0 %v4777_v49 }
  0x46   : > { %4501 = vmatprep.subr.mxu0 %v5102_v5 }
  0x48   : > { %746 = vmatmul.mubr.f32.vlgmr.msra.gmra.mrb[0].mxu0 %v638_v25 }
  0x49   : > { %4503 = vmatprep.mubr.msk.f32.mxu0 %vm5101_vm1, %v5102_v5 }
 0x11b   : > { %v4332_v50 = vpop.f32.mrb[0].mxu0 }
 0x11c   : > { %v4333_v52 = vpop.f32.mrb[1].mxu0 }
 0x11d   : > { %v4334_v53 = vadd.f32 %v4333_v52, %v4332_v50 }
 0x11f   : > { %v748_v55 = vadd.f32 %v4334_v53, %v4205_v51 }
 0x121   : > { %v5380_v56 = vadd.f32 %v751_v54, %v748_v55 }
 0x123   : > { %v755_v57 = vsel %vm754_vm0, %v5380_v56, 0.0 }
 0x124   : > { %756 = vadd.xlane.f32.xlu0 %v755_v57 }
 0x1b1   : > { %v757_v58 = vpop.xlane.xlu0 %756 }
 0x1b2   : > { %v759_v59 = vmul.f32 0.03125, %v757_v58 }
 0x1b4   : > { %v760_v60 = vsub.f32 %v5380_v56, %v759_v59 }
 0x1b6   : > { %v761_v61 = vmul.f32 %v760_v60, %v760_v60 }
 0x1b8   : > { %v762_v62 = vsel %vm754_vm0, %v761_v61, 0.0 }
 0x1b9   : > { %763 = vadd.xlane.f32.xlu0 %v762_v62 }
 0x246   : > { %v764_v7 = vpop.xlane.xlu0 %763 }
 0x247   : > { %v765_v8 = vmul.f32 0.03125, %v764_v7 }
 0x249   : > { %v766_v10 = vadd.f32 1e-06, %v765_v8 }
 0x24b   : > { %4938 = vrsqrt.f32 %v766_v10 }
 0x255   : > { %v4939_v16 = vpop.eup %4938 }
 0x256   : > { %v768_v17 = vmul.f32 %v4939_v16, %v760_v60 }
 0x258   : > { %v773_v19 = vmul.f32 %v772_v15, %v768_v17 }
 0x25a   : > { %v778_v20 = vadd.f32 %v777_v18, %v773_v19 }
 0x25c   : > { %4469 = vmatmul.mubr.msk.f32.vlgmr.msra.gmra.mrb[0].mxu1 %vm790_vm2, %v778_v20 }
 0x25d   : > { %4473 = vmatprep.mubr.msk.f32.mxu1 %vm5101_vm1, %v5102_v5 }
 0x32f   : > { %v860_v22 = vpop.f32.mrb[0].mxu1 }
 0x330   : > { %v5429_v23 = vadd.f32 %v4206_v21, %v860_v22  ;;  %v4470_v24 = vpop.f32.mrb[1].mxu1 }
 0x332   : > { %955 = vrot.lane.b32.xlu0 %v5429_v23, %s6115_s27  ;;  %865 = vrot.lane.b32.xlu1 %v5429_v23, %s6128_s23  ;;  %s6170_s27 = smov 8  }
 0x336   : > { %1038 = vrot.lane.b32.xlu0 %v5429_v23, %s6129_s24 }
 0x3a4   : > { %v866_v25 = vpop.permute.xlu1 %865  ;;  %v956_v26 = vpop.permute.xlu0 %955 }
 0x3a5   : > { %4472 = vmatpush3.xpose.msk.msra.mxu1 %vm867_vm3, %v866_v25 }
 0x3a6   : > { %4476 = vmatprep.subr.mxu1 %v5102_v5 }
 0x3a8   : > { %4474 = vmatmul.mubr.msk.f32.vlgmr.msra.gmra.mrb[2].mxu1 %vm867_vm3, %v5429_v23  ;;  %v1039_v36 = vpop.permute.xlu0 %1038 }
 0x3a9   : > { %4477 = vmatpush3.msk.msra.mxu1 %vm961_vm4, %v956_v26  ;;  %4478 = vmatprep.mubr.msk.f32.mxu1 %vm5101_vm1, %v5102_v5 }
 0x3aa   : > { %4481 = vmatprep.subr.mxu1 %v5102_v5 }
 0x47b   : > { %v938_v27 = vpop.f32.mrb[2].mxu1 }
 0x47c   : > { %v942_v28 = vmul.f32 0.35355338, %v938_v27  ;;  %v4475_v29 = vpop.f32.mrb[3].mxu1 }
 0x47e   : > { %v944_v30 = vsel %vm943_vm5, %v942_v28, -inf }
 0x47f   : > { %945 = vmax.xlane.f32.xlu1 %v944_v30 }
 0x50c   : > { %v946_v31 = vpop.xlane.xlu1 %945 }
 0x50d   : > { %v947_v32 = vsub.f32 %v942_v28, %v946_v31 }
 0x50f   : > { %v948_v33 = vmul.f32 1.442695, %v947_v32  ;;  %v1556_v32 = vld [vmem:[%s6159_s6] sm:$0xff] }
 0x511   : > { %4940 = vpow2.f32 %v948_v33  ;;  %v1557_v33 = vld [vmem:[%s6159_s6 + $0x8] sm:$0xff] }
 0x51b   : > { %v4941_v34 = vpop.eup %4940 }
 0x51c   : > { %v950_v35 = vsel %vm943_vm5, %v4941_v34, 0.0 }
 0x51d   : > { %951 = vadd.xlane.f32.xlu0 %v950_v35  ;;  %v1558_v35 = vld [vmem:[%s6159_s6 + $0x10] sm:$0xff] }
 0x533   : > { %1036 = vrot.lane.b32.xlu0 %v5429_v23, %s6130_s20 }
 0x5aa   : > { %v952_v37 = vpop.xlane.xlu0 %951 }
 0x5ab   : > { %4942 = vrcp.f32 %v952_v37 }
 0x5ae   : > { %v1037_v40 = vpop.permute.xlu0 %1036 }
 0x5b5   : > { %v4943_v38 = vpop.eup %4942 }
 0x5b6   : > { %v954_v39 = vmul.f32 %v4943_v38, %v4941_v34  ;;  %v4786_v34 = vpack.c.bf16 %v1557_v33, %v1556_v32 }
 0x5b8   : > { %4479 = vmatmul.mubr.msk.f32.vlgmr.msra.gmra.mrb[4].mxu1 %vm957_vm6, %v954_v39 }
 0x5b9   : > { %4482 = vmatpush3.xpose.msk.msra.mxu1 %vm867_vm3, %v1039_v36  ;;  %4483 = vmatprep.mubr.msk.f32.mxu1 %vm5101_vm1, %v5102_v5  ;;  %v1559_v36 = vld [vmem:[%s6159_s6 + $0x18] sm:$0xff] }
 0x5ba   : > { %4486 = vmatprep.subr.mxu1 %v5102_v5  ;;  %v4789_v37 = vpack.c.bf16 %v1559_v36, %v1558_v35 }
 0x5bc   : > { %4484 = vmatmul.mubr.msk.f32.vlgmr.msra.gmra.mrb[6].mxu1 %vm867_vm3, %v1037_v40 }
 0x5bd   : > { %4488 = vmatprep.mubr.msk.f32.mxu1 %vm5101_vm1, %v5102_v5 }
 0x68b   : > { %v1030_v41 = vpop.f32.mrb[4].mxu1 }
 0x68c   : > { %1035 = vst.msk [vmem:[#allocation2] sm:$0xf] %vm1034_vm7, %v1030_v41  ;;  %v4480_v42 = vpop.f32.mrb[5].mxu1 }
 0x68f   : > { %v1110_v43 = vpop.f32.mrb[6].mxu1 }
 0x690   : > { %v1114_v44 = vmul.f32 0.35355338, %v1110_v43  ;;  %v4485_v45 = vpop.f32.mrb[7].mxu1 }
 0x691   : > { %v1562_v45 = vsub.s32 2, %v5406_v11 }
 0x692   : > { %v1115_v46 = vsel %vm943_vm5, %v1114_v44, -inf }
 0x693   : > { %1116 = vmax.xlane.f32.xlu1 %v1115_v46  ;;  %v1563_v46 = vrot.slane %v5414_v13, %v1562_v45 }
 0x6a4   : > { %1126 = vrot.lane.b32.xlu1 %v5429_v23, %s6112_s30  ;;  %s6124_s30 = smov 16  }
 0x6a8   : > { %1211 = vrot.lane.b32.xlu1 %v5429_v23, %s6126_s29  ;;  %s6166_s29 = smov 64  }
 0x6ac   : > { %1209 = vrot.lane.b32.xlu1 %v5429_v23, %s6120_s1  ;;  %s6162_s1 = smov 80  }
 0x6b0   : > { %1384 = vrot.lane.b32.xlu1 %v5429_v23, %s6118_s0  ;;  %s6163_s0 = smov 112  }
 0x720   : > { %v1117_v47 = vpop.xlane.xlu1 %1116 }
 0x721   : > { %v1118_v48 = vsub.f32 %v1114_v44, %v1117_v47 }
 0x723   : > { %v1119_v49 = vmul.f32 1.442695, %v1118_v48 }
 0x724   : > { %v1127_v50 = vpop.permute.xlu1 %1126 }
 0x725   : > { %4944 = vpow2.f32 %v1119_v49  ;;  %4487 = vmatpush3.msk.msra.mxu1 %vm961_vm4, %v1127_v50 }
 0x726   : > { %4491 = vmatprep.subr.mxu1 %v5102_v5 }
 0x728   : > { %v1212_v51 = vpop.permute.xlu1 %1211 }
 0x72c   : > { %v1210_v52 = vpop.permute.xlu1 %1209 }
 0x72f   : > { %v4945_v53 = vpop.eup %4944 }
 0x730   : > { %v1385_v54 = vpop.permute.xlu1 %1384  ;;  %v1121_v55 = vsel %vm943_vm5, %v4945_v53, 0.0 }
 0x731   : > { %1122 = vadd.xlane.f32.xlu0 %v1121_v55  ;;  %4502 = vmatpush3.xpose.msk.msra.mxu0 %vm867_vm3, %v1385_v54 }
 0x732   : > { %4797 = vmatprep.subr.bf16.mxu0 %v5100_v2 }
 0x747   : > { %1382 = vrot.lane.b32.xlu0 %v5429_v23, %s6116_s25  ;;  %s6164_s25 = smov 72  }
 0x7be   : > { %v1123_v57 = vpop.xlane.xlu0 %1122 }
 0x7bf   : > { %4946 = vrcp.f32 %v1123_v57 }
 0x7c2   : > { %v1383_v58 = vpop.permute.xlu0 %1382 }
 0x7c3   : > { %4504 = vmatmul.mubr.msk.f32.vlgmr.msra.gmra.mrb[2].mxu0 %vm867_vm3, %v1383_v58  ;;  %v1661_v58 = vld [vmem:[%s6160_s7] sm:$0xff] }
 0x7c4   : > { %4549 = vmatprep.mubr.msk.f32.mxu0 %vm5101_vm1, %v5102_v5 }
 0x7c9   : > { %v4947_v59 = vpop.eup %4946 }
 0x7ca   : > { %v1125_v60 = vmul.f32 %v4947_v59, %v4945_v53 }
 0x7cc   : > { %4489 = vmatmul.mubr.msk.f32.vlgmr.msra.gmra.mrb[8].mxu1 %vm957_vm6, %v1125_v60  ;;  %v1663_v60 = vld [vmem:[%s6160_s7 + $0x10] sm:$0xff] }
 0x7cd   : > { %4492 = vmatpush3.xpose.msk.msra.mxu1 %vm867_vm3, %v1212_v51  ;;  %4493 = vmatprep.mubr.msk.f32.mxu1 %vm5101_vm1, %v5102_v5 }
 0x7ce   : > { %4496 = vmatprep.subr.mxu1 %v5102_v5 }
 0x7d0   : > { %4494 = vmatmul.mubr.msk.f32.vlgmr.msra.gmra.mrb[10].mxu1 %vm867_vm3, %v1210_v52 }
 0x7d1   : > { %4498 = vmatprep.mubr.msk.f32.mxu1 %vm5101_vm1, %v5102_v5 }
 0x896   : > { %v1456_v61 = vpop.f32.mrb[2].mxu0 }
 0x897   : > { %v1460_v62 = vmul.f32 0.35355338, %v1456_v61  ;;  %v4505_v63 = vpop.f32.mrb[3].mxu0  ;;  %v1664_v61 = vld [vmem:[%s6160_s7 + $0x18] sm:$0xff] }
 0x899   : > { %v1461_v0 = vsel %vm943_vm5, %v1460_v62, -inf }
 0x89a   : > { %1462 = vmax.xlane.f32.xlu0 %v1461_v0 }
 0x89f   : > { %v1199_v1 = vpop.f32.mrb[8].mxu1 }
 0x8a0   : > { %v4490_v3 = vpop.f32.mrb[9].mxu1 }
 0x8a1   : > { %v5552_v3 = vsub.s32 3, %v5406_v11 }
 0x8a3   : > { %v1283_v4 = vpop.f32.mrb[10].mxu1 }
 0x8a4   : > { %v1287_v6 = vmul.f32 0.35355338, %v1283_v4  ;;  %v4495_v7 = vpop.f32.mrb[11].mxu1  ;;  %v5555_v4 = vsub.s32 4, %v5406_v11 }
 0x8a6   : > { %v1288_v8 = vsel %vm943_vm5, %v1287_v6, -inf }
 0x8a7   : > { %1289 = vmax.xlane.f32.xlu1 %v1288_v8 }
 0x8b0   : > { %1472 = vrot.lane.b32.xlu0 %v5429_v23, %s6113_s26  ;;  %s6122_s26 = smov 24  }
 0x927   : > { %v1463_v9 = vpop.xlane.xlu0 %1462 }
 0x928   : > { %v1464_v10 = vsub.f32 %v1460_v62, %v1463_v9  ;;  %v4795_v62 = vpack.c.bf16 %v1664_v61, %v1663_v60  ;;  %v1659_v9 = vrot.slane %v5414_v13, %v5555_v4 }
 0x92a   : > { %v1465_v15 = vmul.f32 1.442695, %v1464_v10 }
 0x92c   : > { %4948 = vpow2.f32 %v1465_v15 }
 0x934   : > { %v1290_v16 = vpop.xlane.xlu1 %1289 }
 0x935   : > { %v1291_v17 = vsub.f32 %v1287_v6, %v1290_v16  ;;  %v1654_v6 = vrot.slane %v5414_v13, %v5552_v3  ;;  %v1754_v16 = vld [vmem:[%s6088_s9] sm:$0xff] }
 0x936   : > { %v4949_v18 = vpop.eup %4948 }
 0x937   : > { %v1292_v19 = vmul.f32 1.442695, %v1291_v17  ;;  %v1467_v20 = vsel %vm943_vm5, %v4949_v18, 0.0  ;;  %v1755_v17 = vld [vmem:[%s6088_s9 + $0x8] sm:$0xff] }
 0x938   : > { %1468 = vadd.xlane.f32.xlu1 %v1467_v20  ;;  %v1757_v20 = vld [vmem:[%s6088_s9 + $0x18] sm:$0xff] }
 0x939   : > { %4950 = vpow2.f32 %v1292_v19  ;;  %v1756_v19 = vld [vmem:[%s6088_s9 + $0x10] sm:$0xff] }
 0x943   : > { %v4951_v21 = vpop.eup %4950 }
 0x944   : > { %v1294_v22 = vsel %vm943_vm5, %v4951_v21, 0.0 }
 0x945   : > { %1295 = vadd.xlane.f32.xlu1 %v1294_v22  ;;  %v1758_v22 = vld [vmem:[%s6088_s9 + $0x20] sm:$0xff] }
 0x956   : > { %1299 = vrot.lane.b32.xlu1 %v5429_v23, %s6114_s19  ;;  %v1473_v23 = vpop.permute.xlu0 %1472  ;;  %s6165_s19 = smov 104  }
 0x95a   : > { %1204 = vrot.lane.b32.xlu1 %v1199_v1, %s6110_s28  ;;  %s6167_s28 = smov 48  }
 0x9c5   : > { %v1469_v24 = vpop.xlane.xlu1 %1468 }
 0x9d2   : > { %v1296_v25 = vpop.xlane.xlu1 %1295 }
 0x9d3   : > { %4952 = vrcp.f32 %v1296_v25 }
 0x9d4   : > { %4954 = vrcp.f32 %v1469_v24  ;;  %v1759_v24 = vld [vmem:[%s6088_s9 + $0x28] sm:$0xff] }
 0x9d5   : > { %v4804_v25 = vpack.c.bf16 %v1759_v24, %v1758_v22 }
 0x9d6   : > { %v1300_v26 = vpop.permute.xlu1 %1299 }
 0x9d7   : > { %4497 = vmatpush3.msk.msra.mxu1 %vm961_vm4, %v1300_v26  ;;  %v1760_v26 = vld [vmem:[%s6088_s9 + $0x30] sm:$0xff] }
 0x9d8   : > { %4506 = vmatprep.subr.mxu1 %v5102_v5 }
 0x9da   : > { %v1205_v27 = vpop.permute.xlu1 %1204 }
 0x9db   : > { %1208 = vst.msk [vmem:[#allocation2] sm:$0xf] %vm1207_vm8, %v1205_v27  ;;  %v1761_v27 = vld [vmem:[%s6088_s9 + $0x38] sm:$0xff] }
 0x9dd   : > { %v4953_v28 = vpop.eup %4952 }
 0x9de   : > { %v1298_v29 = vmul.f32 %v4953_v28, %v4951_v21  ;;  %v4955_v30 = vpop.eup %4954  ;;  %v4801_v21 = vpack.c.bf16 %v1757_v20, %v1756_v19  ;;  %v4807_v28 = vpack.c.bf16 %v1761_v27, %v1760_v26 }
 0x9df   : > { %v1471_v31 = vmul.f32 %v4955_v30, %v4949_v18  ;;  %v4798_v18 = vpack.c.bf16 %v1755_v17, %v1754_v16 }
 0x9e0   : > { %4499 = vmatmul.mubr.msk.f32.vlgmr.msra.gmra.mrb[12].mxu1 %vm957_vm6, %v1298_v29  ;;  %v4225_v29 = vld [vmem:[%s6161_s8] ss:$0 sm:$0xff] }
 0x9e1   : > { %4507 = vmatpush3.msk.msra.mxu1 %vm961_vm4, %v1473_v23  ;;  %4508 = vmatprep.mubr.msk.f32.mxu1 %vm5101_vm1, %v5102_v5 }
 0x9e2   : > { %4785 = vmatprep.subr.bf16.mxu1 %v5100_v2  ;;  %4799 = vmatpush3.bf16.msra.mxu0 %v4798_v18 }
 0x9e3   : > { %4800 = vmatprep.subr.bf16.mxu0 %v5100_v2 }
 0x9e4   : > { %4509 = vmatmul.mubr.msk.f32.vlgmr.msra.gmra.mrb[14].mxu1 %vm957_vm6, %v1471_v31 }
 0x9e5   : > { %4519 = vmatprep.mubr.msk.f32.mxu1 %vm5101_vm1, %v5102_v5  ;;  %4787 = vmatpush3.bf16.msra.mxu1 %v4786_v34 }
 0x9e6   : > { %4788 = vmatprep.subr.bf16.mxu1 %v5100_v2  ;;  %4802 = vmatpush3.bf16.msra.mxu0 %v4801_v21 }
 0x9e7   : > { %4803 = vmatprep.subr.bf16.mxu0 %v5100_v2 }
 0x9e9   : > { %4790 = vmatpush3.bf16.msra.mxu1 %v4789_v37 }
 0x9ea   : > { %4791 = vmatprep.subr.bf16.mxu1 %v5100_v2  ;;  %4805 = vmatpush3.bf16.msra.mxu0 %v4804_v25 }
 0x9eb   : > { %4806 = vmatprep.subr.bf16.mxu0 %v5100_v2 }
 0x9ee   : > { %4808 = vmatpush3.bf16.msra.mxu0 %v4807_v28 }
 0x9ef   : > { %4573 = vmatprep.subr.mxu0 %v5102_v5 }
 0xab3   : > { %v1372_v38 = vpop.f32.mrb[12].mxu1 }
 0xab4   : > { %1377 = vrot.lane.b32.xlu1 %v1372_v38, %s6124_s30  ;;  %v4500_v39 = vpop.f32.mrb[13].mxu1  ;;  %s6168_s30 = smov 40  }
 0xab7   : > { %v1545_v40 = vpop.f32.mrb[14].mxu1 }
 0xab8   : > { %1550 = vrot.lane.b32.xlu1 %v1545_v40, %s6122_s26  ;;  %v4510_v41 = vpop.f32.mrb[15].mxu1  ;;  %s6169_s26 = smov 56  }
 0xab9   : > { %v1764_v41 = vsub.s32 5, %v5406_v11  ;;  %v2951_v11 = vld [vmem:[%s6091_s12] sm:$0xff] }
 0xb26   : > { %v1378_v42 = vpop.permute.xlu1 %1377 }
 0xb27   : > { %1381 = vst.msk [vmem:[#allocation2] sm:$0xf] %vm1380_vm9, %v1378_v42  ;;  %v1765_v42 = vrot.slane %v5414_v13, %v1764_v41  ;;  %v4229_v13 = vld [vmem:[%s6157_s3 + $0x20] sm:$0xff] }
 0xb2a   : > { %v1551_v43 = vpop.permute.xlu1 %1550 }
 0xb2b   : > { %1554 = vst.msk [vmem:[#allocation2] sm:$0xf] %vm1553_vm10, %v1551_v43 }
 0xb32   : > { %v1555_v44 = vld [vmem:[#allocation2] sm:$0xf] }
 0xb33   : > { %4520 = vmatmul.mubr.msk.f32.vlgmr.msra.gmra.mrb[16].mxu1 %vm790_vm2, %v1555_v44 }
 0xb34   : > { %4530 = vmatprep.mubr.msk.f32.mxu1 %vm5101_vm1, %v5102_v5 }
 0xc06   : > { %v1633_v47 = vpop.f32.mrb[16].mxu1 }
 0xc07   : > { %v1634_v48 = vadd.f32 %v1633_v47, %v1563_v46  ;;  %v4521_v49 = vpop.f32.mrb[17].mxu1 }
 0xc09   : > { %v5531_v50 = vadd.f32 %v1634_v48, %v5380_v56  ;;  %v1662_v56 = vld [vmem:[%s6160_s7 + $0x8] sm:$0xff] }
 0xc0a   : > { %v4792_v59 = vpack.c.bf16 %v1662_v56, %v1661_v58  ;;  %v4232_v58 = vld [vmem:[%s6157_s3 + $0x38] sm:$0xff] }
 0xc0b   : > { %v1638_v51 = vsel %vm754_vm0, %v5531_v50, 0.0 }
 0xc0c   : > { %1639 = vadd.xlane.f32.xlu1 %v1638_v51  ;;  %4793 = vmatpush3.bf16.msra.mxu1 %v4792_v59 }
 0xc0d   : > { %4794 = vmatprep.subr.bf16.mxu1 %v5100_v2 }
 0xc10   : > { %4796 = vmatpush3.bf16.msra.mxu1 %v4795_v62  ;;  %v5626_v62 = vld [vmem:[%s6089_s10 + $0x8] sm:$0x3f] }
 0xc11   : > { %4809 = vmatprep.subr.bf16.mxu1 %v5100_v2 }
 0xc99   : > { %v1640_v52 = vpop.xlane.xlu1 %1639 }
 0xc9a   : > { %v1641_v53 = vmul.f32 0.03125, %v1640_v52 }
 0xc9c   : > { %v1642_v54 = vsub.f32 %v5531_v50, %v1641_v53 }
 0xc9e   : > { %v1643_v55 = vmul.f32 %v1642_v54, %v1642_v54 }
 0xca0   : > { %v1644_v57 = vsel %vm754_vm0, %v1643_v55, 0.0 }
 0xca1   : > { %1645 = vadd.xlane.f32.xlu0 %v1644_v57  ;;  %v4231_v57 = vld [vmem:[%s6157_s3 + $0x30] sm:$0xff] }
 0xca2   : > { %v4813_v56 = vpack.c.bf16 %v4232_v58, %v4231_v57 }
 0xd2e   : > { %v1646_v63 = vpop.xlane.xlu0 %1645 }
 0xd2f   : > { %v1647_v0 = vmul.f32 0.03125, %v1646_v63  ;;  %v1859_v63 = vrot.slane %v5626_v62, %v5409_v12 }
 0xd31   : > { %v1648_v1 = vadd.f32 1e-06, %v1647_v0 }
 0xd33   : > { %4956 = vrsqrt.f32 %v1648_v1 }
 0xd3d   : > { %v4957_v7 = vpop.eup %4956 }
 0xd3e   : > { %v1650_v8 = vmul.f32 %v4957_v7, %v1642_v54 }
 0xd40   : > { %v1655_v10 = vmul.f32 %v1654_v6, %v1650_v8  ;;  %v1864_v6 = vrot.slane %v5626_v62, %v5417_v14 }
 0xd42   : > { %v1660_v15 = vadd.f32 %v1659_v9, %v1655_v10  ;;  %v4234_v9 = vld [vmem:[%s6158_s5 + $0x1] ss:$0 sm:$0xff]  ;;  %s5846_s5 = sand.u32 1, %s5090_s22  }
 0xd44   : > { %4531 = vmatmul.mubr.msk.f32.vlgmr.msra.gmra.mrb[18].mxu1 %vm790_vm2, %v1660_v15 }
 0xd45   : > { %4560 = vmatprep.mubr.msk.f32.mxu1 %vm5101_vm1, %v5102_v5 }
 0xe17   : > { %v1741_v30 = vpop.f32.mrb[18].mxu1 }
 0xe18   : > { %v1742_v23 = vadd.f32 %v4225_v29, %v1741_v30  ;;  %v4532_v31 = vpop.f32.mrb[19].mxu1 }
 0xe1a   : > { %v1746_v32 = vmul.f32 0.044715, %v1742_v23  ;;  %v1745_v38 = vmul.f32 0.5, %v1742_v23 }
 0xe1c   : > { %v1747_v33 = vmul.f32 %v1746_v32, %v1742_v23 }
 0xe1e   : > { %v1748_v34 = vmul.f32 %v1747_v33, %v1742_v23 }
 0xe20   : > { %v1749_v35 = vadd.f32 %v1748_v34, %v1742_v23 }
 0xe22   : > { %v1750_v36 = vmul.f32 0.7978846, %v1749_v35 }
 0xe24   : > { %4958 = vtanh.f32 %v1750_v36 }
 0xe2e   : > { %v4959_v37 = vpop.eup %4958 }
 0xe2f   : > { %v1752_v39 = vadd.f32 1.0, %v4959_v37 }
 0xe31   : > { %v1753_v40 = vmul.f32 %v1752_v39, %v1745_v38 }
 0xe33   : > { %4550 = vmatmul.mubr.msk.f32.vlgmr.msra.gmra.mrb[4].mxu0 %vm1766_vm11, %v1753_v40 }
 0xe34   : > { %4575 = vmatprep.mubr.msk.f32.mxu0 %vm5101_vm1, %v5102_v5 }
 0xf06   : > { %v1836_v43 = vpop.f32.mrb[4].mxu0 }
 0xf07   : > { %v1837_v44 = vadd.f32 %v1836_v43, %v1765_v42  ;;  %v4551_v46 = vpop.f32.mrb[5].mxu0 }
 0xf09   : > { %v5603_v47 = vadd.f32 %v1837_v44, %v5531_v50  ;;  %v4230_v50 = vld [vmem:[%s6157_s3 + $0x28] sm:$0xff] }
 0xf0a   : > { %v4810_v55 = vpack.c.bf16 %v4230_v50, %v4229_v13 }
 0xf0b   : > { %v1843_v48 = vsel %vm754_vm0, %v5603_v47, 0.0 }
 0xf0c   : > { %1844 = vadd.xlane.f32.xlu0 %v1843_v48  ;;  %4811 = vmatpush3.bf16.msra.mxu1 %v4810_v55 }
 0xf0d   : > { %4812 = vmatprep.subr.bf16.mxu1 %v5100_v2 }
 0xf10   : > { %4814 = vmatpush3.bf16.msra.mxu1 %v4813_v56 }
 0xf11   : > { %4563 = vmatprep.subr.mxu1 %v5102_v5 }
 0xf99   : > { %v1845_v49 = vpop.xlane.xlu0 %1844 }
 0xf9a   : > { %v1846_v51 = vmul.f32 0.03125, %v1845_v49 }
 0xf9c   : > { %v1847_v52 = vsub.f32 %v5603_v47, %v1846_v51 }
 0xf9e   : > { %v1848_v53 = vmul.f32 %v1847_v52, %v1847_v52 }
 0xfa0   : > { %v1849_v54 = vsel %vm754_vm0, %v1848_v53, 0.0 }
 0xfa1   : > { %1850 = vadd.xlane.f32.xlu1 %v1849_v54 }
0x102e   : > { %v1851_v59 = vpop.xlane.xlu1 %1850 }
0x102f   : > { %v1852_v60 = vmul.f32 0.03125, %v1851_v59 }
0x1031   : > { %v1853_v61 = vadd.f32 1e-06, %v1852_v60 }
0x1033   : > { %4960 = vrsqrt.f32 %v1853_v61 }
0x103d   : > { %v4961_v0 = vpop.eup %4960 }
0x103e   : > { %v1855_v1 = vmul.f32 %v4961_v0, %v1847_v52 }
0x1040   : > { %v1860_v7 = vmul.f32 %v1859_v63, %v1855_v1 }
0x1042   : > { %v1865_v8 = vadd.f32 %v1864_v6, %v1860_v7 }
0x1044   : > { %4561 = vmatmul.mubr.msk.f32.vlgmr.msra.gmra.mrb[20].mxu1 %vm790_vm2, %v1865_v8 }
0x1045   : > { %4565 = vmatprep.mubr.msk.f32.mxu1 %vm5101_vm1, %v5102_v5 }
0x1117   : > { %v1948_v10 = vpop.f32.mrb[20].mxu1 }
0x1118   : > { %v5638_v15 = vadd.f32 %v4234_v9, %v1948_v10  ;;  %v4562_v16 = vpop.f32.mrb[21].mxu1 }
0x111a   : > { %2121 = vrot.lane.b32.xlu1 %v5638_v15, %s6129_s24  ;;  %1953 = vrot.lane.b32.xlu0 %v5638_v15, %s6128_s23  ;;  %s6171_s23 = smov 16   ;;  %s6172_s24 = smov 24  }
0x111e   : > { %2119 = vrot.lane.b32.xlu1 %v5638_v15, %s6130_s20  ;;  %2293 = vrot.lane.b32.xlu0 %v5638_v15, %s6162_s1  ;;  %s6173_s20 = smov 120  }
0x1122   : > { %2291 = vrot.lane.b32.xlu1 %v5638_v15, %s6163_s0  ;;  %2465 = vrot.lane.b32.xlu0 %v5638_v15, %s6164_s25 }
0x1126   : > { %2463 = vrot.lane.b32.xlu1 %v5638_v15, %s6165_s19 }
0x118c   : > { %v2122_v17 = vpop.permute.xlu1 %2121  ;;  %v1954_v18 = vpop.permute.xlu0 %1953 }
0x118d   : > { %4564 = vmatpush3.xpose.msk.msra.mxu1 %vm867_vm3, %v1954_v18  ;;  %4574 = vmatpush3.xpose.msk.msra.mxu0 %vm867_vm3, %v2122_v17 }
0x118e   : > { %4583 = vmatprep.subr.mxu0 %v5102_v5  ;;  %4568 = vmatprep.subr.mxu1 %v5102_v5 }
0x1190   : > { %v2120_v19 = vpop.permute.xlu1 %2119  ;;  %4566 = vmatmul.mubr.msk.f32.vlgmr.msra.gmra.mrb[22].mxu1 %vm867_vm3, %v5638_v15  ;;  %v2294_v20 = vpop.permute.xlu0 %2293 }
0x1191   : > { %4576 = vmatmul.mubr.msk.f32.vlgmr.msra.gmra.mrb[6].mxu0 %vm867_vm3, %v2120_v19  ;;  %4570 = vmatprep.mubr.msk.f32.mxu1 %vm5101_vm1, %v5102_v5 }
0x1192   : > { %4584 = vmatpush3.xpose.msk.msra.mxu0 %vm867_vm3, %v2294_v20  ;;  %4585 = vmatprep.mubr.msk.f32.mxu0 %vm5101_vm1, %v5102_v5 }
0x1193   : > { %4593 = vmatprep.subr.mxu0 %v5102_v5 }
0x1194   : > { %v2292_v21 = vpop.permute.xlu1 %2291  ;;  %v2466_v22 = vpop.permute.xlu0 %2465 }
0x1195   : > { %4586 = vmatmul.mubr.msk.f32.vlgmr.msra.gmra.mrb[8].mxu0 %vm867_vm3, %v2292_v21 }
0x1196   : > { %4594 = vmatpush3.xpose.msk.msra.mxu0 %vm867_vm3, %v2466_v22  ;;  %4595 = vmatprep.mubr.msk.f32.mxu0 %vm5101_vm1, %v5102_v5 }
0x1197   : > { %4815 = vmatprep.subr.bf16.mxu0 %v5100_v2 }
0x1198   : > { %v2464_v24 = vpop.permute.xlu1 %2463 }
0x1199   : > { %4596 = vmatmul.mubr.msk.f32.vlgmr.msra.gmra.mrb[10].mxu0 %vm867_vm3, %v2464_v24  ;;  %v4252_v24 = vld [vmem:[%s6159_s6 + $0x20] sm:$0xff] }
0x119a   : > { %4611 = vmatprep.mubr.msk.f32.mxu0 %vm5101_vm1, %v5102_v5 }
0x1263   : > { %v2025_v25 = vpop.f32.mrb[22].mxu1 }
0x1264   : > { %v2029_v26 = vmul.f32 0.35355338, %v2025_v25  ;;  %v4567_v27 = vpop.f32.mrb[23].mxu1  ;;  %v2193_v28 = vpop.f32.mrb[6].mxu0  ;;  %v4253_v25 = vld [vmem:[%s6159_s6 + $0x28] sm:$0xff] }
0x1265   : > { %v2197_v29 = vmul.f32 0.35355338, %v2193_v28  ;;  %v4577_v30 = vpop.f32.mrb[7].mxu0  ;;  %v4816_v27 = vpack.c.bf16 %v4253_v25, %v4252_v24  ;;  %v4254_v28 = vld [vmem:[%s6159_s6 + $0x30] sm:$0xff]  ;;  %v4262_v25 = vld [vmem:[%s6161_s8 + $0x1] ss:$0 sm:$0xff] }
0x1266   : > { %v2030_v23 = vsel %vm943_vm5, %v2029_v26, -inf }
0x1267   : > { %2031 = vmax.xlane.f32.xlu0 %v2030_v23  ;;  %v2198_v31 = vsel %vm943_vm5, %v2197_v29, -inf  ;;  %4817 = vmatpush3.bf16.msra.mxu0 %v4816_v27 }
0x1268   : > { %2199 = vmax.xlane.f32.xlu1 %v2198_v31  ;;  %v2365_v32 = vpop.f32.mrb[8].mxu0  ;;  %4818 = vmatprep.subr.bf16.mxu0 %v5100_v2 }
0x1269   : > { %v2369_v33 = vmul.f32 0.35355338, %v2365_v32  ;;  %v4587_v34 = vpop.f32.mrb[9].mxu0 }
0x126b   : > { %v2370_v35 = vsel %vm943_vm5, %v2369_v33, -inf }
0x126c   : > { %v2537_v36 = vpop.f32.mrb[10].mxu0  ;;  %2371 = vmax.xlane.f32.xlu0 %v2370_v35 }
0x126d   : > { %v2541_v37 = vmul.f32 0.35355338, %v2537_v36  ;;  %v4597_v38 = vpop.f32.mrb[11].mxu0 }
0x126f   : > { %v2542_v39 = vsel %vm943_vm5, %v2541_v37, -inf }
0x1270   : > { %2543 = vmax.xlane.f32.xlu0 %v2542_v39 }
0x1279   : > { %2041 = vrot.lane.b32.xlu1 %v5638_v15, %s6166_s29  ;;  %s6175_s29 = smov 96  }
0x12f4   : > { %v2032_v40 = vpop.xlane.xlu0 %2031 }
0x12f5   : > { %v2033_v42 = vsub.f32 %v2029_v26, %v2032_v40  ;;  %v2200_v43 = vpop.xlane.xlu1 %2199 }
0x12f6   : > { %v2201_v44 = vsub.f32 %v2197_v29, %v2200_v43  ;;  %v4255_v29 = vld [vmem:[%s6159_s6 + $0x38] sm:$0xff]  ;;  %s4202_s6 = sshll.u32 %s5846_s5, 2 }
0x12f7   : > { %v2034_v46 = vmul.f32 1.442695, %v2033_v42  ;;  %v4819_v23 = vpack.c.bf16 %v4255_v29, %v4254_v28  ;;  %v2644_v42 = vrot.slane %v5626_v62, %v1562_v45  ;;  %v4257_v45 = vld [vmem:[%s6160_s7 + $0x20] sm:$0xff]  ;;  %s5854_s3 = scalar_lea.vmem [#allocation3], %s4202_s6  ;;  %s6176_s6 = sld [smem:[#allocation24_spill]] }
0x12f8   : > { %v2202_v48 = vmul.f32 1.442695, %v2201_v44 }
0x12f9   : > { %4962 = vpow2.f32 %v2034_v46  ;;  %v2042_v49 = vpop.permute.xlu1 %2041  ;;  %v2372_v51 = vpop.xlane.xlu0 %2371  ;;  %4820 = vmatpush3.bf16.msra.mxu0 %v4819_v23 }
0x12fa   : > { %4964 = vpow2.f32 %v2202_v48  ;;  %v2373_v52 = vsub.f32 %v2369_v33, %v2372_v51  ;;  %4569 = vmatpush3.msk.msra.mxu1 %vm961_vm4, %v2042_v49  ;;  %4827 = vmatprep.subr.bf16.mxu0 %v5100_v2 }
0x12fb   : > { %4578 = vmatprep.subr.mxu1 %v5102_v5 }
0x12fc   : > { %v2374_v53 = vmul.f32 1.442695, %v2373_v52 }
0x12fd   : > { %v2544_v54 = vpop.xlane.xlu0 %2543 }
0x12fe   : > { %4966 = vpow2.f32 %v2374_v53  ;;  %v2545_v13 = vsub.f32 %v2541_v37, %v2544_v54 }
0x1300   : > { %v2546_v50 = vmul.f32 1.442695, %v2545_v13 }
0x1302   : > { %4968 = vpow2.f32 %v2546_v50 }
0x1303   : > { %v4963_v55 = vpop.eup %4962 }
0x1304   : > { %v4965_v57 = vpop.eup %4964  ;;  %v2036_v58 = vsel %vm943_vm5, %v4963_v55, 0.0 }
0x1305   : > { %2037 = vadd.xlane.f32.xlu1 %v2036_v58  ;;  %v2204_v56 = vsel %vm943_vm5, %v4965_v57, 0.0 }
0x1306   : > { %2205 = vadd.xlane.f32.xlu0 %v2204_v56 }
0x1308   : > { %v4967_v59 = vpop.eup %4966 }
0x1309   : > { %v2376_v60 = vsel %vm943_vm5, %v4967_v59, 0.0 }
0x130a   : > { %2377 = vadd.xlane.f32.xlu1 %v2376_v60 }
0x130c   : > { %v4969_v61 = vpop.eup %4968 }
0x130d   : > { %v2548_v63 = vsel %vm943_vm5, %v4969_v61, 0.0 }
0x130e   : > { %2549 = vadd.xlane.f32.xlu0 %v2548_v63 }
0x131b   : > { %2381 = vrot.lane.b32.xlu1 %v5638_v15, %s6167_s28 }
0x131f   : > { %2553 = vrot.lane.b32.xlu1 %v5638_v15, %s6168_s30 }
0x1324   : > { %2209 = vrot.lane.b32.xlu0 %v5638_v15, %s6169_s26 }
0x1392   : > { %v2038_v0 = vpop.xlane.xlu1 %2037 }
0x1393   : > { %4970 = vrcp.f32 %v2038_v0  ;;  %v2206_v1 = vpop.xlane.xlu0 %2205 }
0x1394   : > { %4972 = vrcp.f32 %v2206_v1  ;;  %v2740_v1 = vrot.slane %v5626_v62, %v5555_v4 }
0x1397   : > { %v2378_v6 = vpop.xlane.xlu1 %2377 }
0x1398   : > { %4974 = vrcp.f32 %v2378_v6 }
0x139b   : > { %v2550_v7 = vpop.xlane.xlu0 %2549  ;;  %v2382_v17 = vpop.permute.xlu1 %2381 }
0x139c   : > { %4976 = vrcp.f32 %v2550_v7 }
0x139d   : > { %v4971_v8 = vpop.eup %4970 }
0x139e   : > { %v2040_v9 = vmul.f32 %v4971_v8, %v4963_v55  ;;  %v4973_v10 = vpop.eup %4972  ;;  %v4259_v55 = vld [vmem:[%s6160_s7 + $0x30] sm:$0xff]  ;;  %v4264_v8 = vld [vmem:[%s6088_s9 + $0x40] sm:$0xff] }
0x139f   : > { %v2210_v16 = vpop.permute.xlu0 %2209  ;;  %v2208_v15 = vmul.f32 %v4973_v10, %v4965_v57  ;;  %v2554_v21 = vpop.permute.xlu1 %2553  ;;  %v4260_v57 = vld [vmem:[%s6160_s7 + $0x38] sm:$0xff] }
0x13a0   : > { %4571 = vmatmul.mubr.msk.f32.vlgmr.msra.gmra.mrb[24].mxu1 %vm957_vm6, %v2040_v9  ;;  %v4825_v58 = vpack.c.bf16 %v4260_v57, %v4259_v55  ;;  %v4265_v9 = vld [vmem:[%s6088_s9 + $0x48] sm:$0xff]  ;;  %v3033_v55 = vld [vmem:[%s6092_s13 + $0x10] sm:$0xff]  ;;  %v3034_v57 = vld [vmem:[%s6092_s13 + $0x18] sm:$0xff] }
0x13a1   : > { %4579 = vmatpush3.msk.msra.mxu1 %vm961_vm4, %v2210_v16  ;;  %4580 = vmatprep.mubr.msk.f32.mxu1 %vm5101_vm1, %v5102_v5  ;;  %v4828_v10 = vpack.c.bf16 %v4265_v9, %v4264_v8  ;;  %v4266_v16 = vld [vmem:[%s6088_s9 + $0x50] sm:$0xff] }
0x13a2   : > { %4588 = vmatprep.subr.mxu1 %v5102_v5  ;;  %v4975_v18 = vpop.eup %4974 }
0x13a3   : > { %v2380_v19 = vmul.f32 %v4975_v18, %v4967_v59  ;;  %v4268_v18 = vld [vmem:[%s6088_s9 + $0x60] sm:$0xff] }
0x13a4   : > { %4581 = vmatmul.mubr.msk.f32.vlgmr.msra.gmra.mrb[26].mxu1 %vm957_vm6, %v2208_v15  ;;  %v4267_v15 = vld [vmem:[%s6088_s9 + $0x58] sm:$0xff] }
0x13a5   : > { %4589 = vmatpush3.msk.msra.mxu1 %vm961_vm4, %v2382_v17  ;;  %4590 = vmatprep.mubr.msk.f32.mxu1 %vm5101_vm1, %v5102_v5  ;;  %v4831_v17 = vpack.c.bf16 %v4267_v15, %v4266_v16 }
0x13a6   : > { %4598 = vmatprep.subr.mxu1 %v5102_v5  ;;  %v4977_v20 = vpop.eup %4976 }
0x13a7   : > { %v2552_v22 = vmul.f32 %v4977_v20, %v4969_v61  ;;  %v2735_v61 = vrot.slane %v5626_v62, %v5552_v3 }
0x13a8   : > { %4591 = vmatmul.mubr.msk.f32.vlgmr.msra.gmra.mrb[28].mxu1 %vm957_vm6, %v2380_v19  ;;  %v4269_v19 = vld [vmem:[%s6088_s9 + $0x68] sm:$0xff] }
0x13a9   : > { %4599 = vmatpush3.msk.msra.mxu1 %vm961_vm4, %v2554_v21  ;;  %4600 = vmatprep.mubr.msk.f32.mxu1 %vm5101_vm1, %v5102_v5  ;;  %v4834_v20 = vpack.c.bf16 %v4269_v19, %v4268_v18  ;;  %v4270_v21 = vld [vmem:[%s6088_s9 + $0x70] sm:$0xff] }
0x13aa   : > { %4821 = vmatprep.subr.bf16.mxu1 %v5100_v2 }
0x13ac   : > { %4601 = vmatmul.mubr.msk.f32.vlgmr.msra.gmra.mrb[30].mxu1 %vm957_vm6, %v2552_v22  ;;  %v4271_v22 = vld [vmem:[%s6088_s9 + $0x78] sm:$0xff] }
0x13ad   : > { %4622 = vmatprep.mubr.msk.f32.mxu1 %vm5101_vm1, %v5102_v5  ;;  %v4837_v24 = vpack.c.bf16 %v4271_v22, %v4270_v21 }
0x1473   : > { %v2114_v26 = vpop.f32.mrb[24].mxu1 }
0x1474   : > { %2118 = vst.msk [vmem:[#allocation2] sm:$0xf] %vm1034_vm7, %v2114_v26  ;;  %v4572_v30 = vpop.f32.mrb[25].mxu1 }
0x1477   : > { %v2282_v31 = vpop.f32.mrb[26].mxu1 }
0x1478   : > { %2287 = vrot.lane.b32.xlu0 %v2282_v31, %s6170_s27  ;;  %v4582_v32 = vpop.f32.mrb[27].mxu1 }
0x147b   : > { %v2454_v33 = vpop.f32.mrb[28].mxu1 }
0x147c   : > { %2459 = vrot.lane.b32.xlu1 %v2454_v33, %s6171_s23  ;;  %v4592_v34 = vpop.f32.mrb[29].mxu1 }
0x147f   : > { %v2626_v35 = vpop.f32.mrb[30].mxu1 }
0x1480   : > { %2631 = vrot.lane.b32.xlu0 %v2626_v35, %s6172_s24  ;;  %v4602_v36 = vpop.f32.mrb[31].mxu1 }
0x14ea   : > { %v2288_v37 = vpop.permute.xlu0 %2287 }
0x14eb   : > { %2290 = vst.msk [vmem:[#allocation2] sm:$0xf] %vm1207_vm8, %v2288_v37  ;;  %v2849_v37 = vrot.slane %v5626_v62, %v1764_v41  ;;  %v2952_v41 = vld [vmem:[%s6091_s12 + $0x8] sm:$0xff] }
0x14ec   : > { %v4840_v62 = vpack.c.bf16 %v2952_v41, %v2951_v11 }
0x14ee   : > { %v2460_v38 = vpop.permute.xlu1 %2459 }
0x14ef   : > { %2462 = vst.msk [vmem:[#allocation2] sm:$0xf] %vm1380_vm9, %v2460_v38 }
0x14f2   : > { %v2632_v39 = vpop.permute.xlu0 %2631 }
0x14f3   : > { %2634 = vst.msk [vmem:[#allocation2] sm:$0xf] %vm1553_vm10, %v2632_v39 }
0x14fa   : > { %v2635_v40 = vld [vmem:[#allocation2] sm:$0xf] }
0x14fb   : > { %4612 = vmatmul.mubr.msk.f32.vlgmr.msra.gmra.mrb[12].mxu0 %vm790_vm2, %v2635_v40 }
0x14fc   : > { %4641 = vmatprep.mubr.msk.f32.mxu0 %vm5101_vm1, %v5102_v5  ;;  %4829 = vmatpush3.bf16.msra.mxu0 %v4828_v10 }
0x14fd   : > { %4830 = vmatprep.subr.bf16.mxu0 %v5100_v2 }
0x1500   : > { %4832 = vmatpush3.bf16.msra.mxu0 %v4831_v17 }
0x1501   : > { %4833 = vmatprep.subr.bf16.mxu0 %v5100_v2 }
0x1504   : > { %4835 = vmatpush3.bf16.msra.mxu0 %v4834_v20 }
0x1505   : > { %4836 = vmatprep.subr.bf16.mxu0 %v5100_v2 }
0x1508   : > { %4838 = vmatpush3.bf16.msra.mxu0 %v4837_v24 }
0x1509   : > { %4666 = vmatprep.subr.mxu0 %v5102_v5 }
0x15ce   : > { %v2714_v43 = vpop.f32.mrb[12].mxu0 }
0x15cf   : > { %v2715_v44 = vadd.f32 %v2714_v43, %v2644_v42  ;;  %v4613_v46 = vpop.f32.mrb[13].mxu0 }
0x15d1   : > { %v5739_v48 = vadd.f32 %v2715_v44, %v5603_v47  ;;  %v4258_v47 = vld [vmem:[%s6160_s7 + $0x28] sm:$0xff]  ;;  %s4295_s7 = sshll.u32 %s5246_s2, 6 }
0x15d2   : > { %v4822_v50 = vpack.c.bf16 %v4258_v47, %v4257_v45  ;;  %v3032_v45 = vld [vmem:[%s6092_s13 + $0x8] sm:$0xff]  ;;  %v2950_v47 = vld [vmem:[%s6090_s11] sm:$0x1] }
0x15d3   : > { %v2719_v49 = vsel %vm754_vm0, %v5739_v48, 0.0 }
0x15d4   : > { %2720 = vadd.xlane.f32.xlu1 %v2719_v49  ;;  %4823 = vmatpush3.bf16.msra.mxu1 %v4822_v50 }
0x15d5   : > { %4824 = vmatprep.subr.bf16.mxu1 %v5100_v2 }
0x15d8   : > { %4826 = vmatpush3.bf16.msra.mxu1 %v4825_v58  ;;  %v4849_v58 = vpack.c.bf16 %v3034_v57, %v3033_v55 }
0x15d9   : > { %4839 = vmatprep.subr.bf16.mxu1 %v5100_v2 }
0x1661   : > { %v2721_v51 = vpop.xlane.xlu1 %2720 }
0x1662   : > { %v2722_v52 = vmul.f32 0.03125, %v2721_v51 }
0x1664   : > { %v2723_v53 = vsub.f32 %v5739_v48, %v2722_v52 }
0x1666   : > { %v2724_v54 = vmul.f32 %v2723_v53, %v2723_v53 }
0x1668   : > { %v2725_v13 = vsel %vm754_vm0, %v2724_v54, 0.0 }
0x1669   : > { %2726 = vadd.xlane.f32.xlu0 %v2725_v13  ;;  %v3031_v13 = vld [vmem:[%s6092_s13] sm:$0xff] }
0x166a   : > { %v4846_v50 = vpack.c.bf16 %v3032_v45, %v3031_v13 }
0x16f6   : > { %v2727_v56 = vpop.xlane.xlu0 %2726 }
0x16f7   : > { %v2728_v59 = vmul.f32 0.03125, %v2727_v56 }
0x16f9   : > { %v2729_v60 = vadd.f32 1e-06, %v2728_v59 }
0x16fb   : > { %4978 = vrsqrt.f32 %v2729_v60 }
0x1705   : > { %v4979_v63 = vpop.eup %4978 }
0x1706   : > { %v2731_v0 = vmul.f32 %v4979_v63, %v2723_v53  ;;  %v2954_v53 = vld [vmem:[%s6091_s12 + $0x18] sm:$0xff] }
0x1708   : > { %v2736_v6 = vmul.f32 %v2735_v61, %v2731_v0  ;;  %v5843_v61 = vld [vmem:[%s6097_s18] sm:$0xff] }
0x1709   : > { %v2942_v63 = vrot.slane %v5843_v61, %v5409_v12  ;;  %v2956_v12 = vrot.slane %v5843_v61, 2 }
0x170a   : > { %v2741_v7 = vadd.f32 %v2740_v1, %v2736_v6  ;;  %v2947_v6 = vrot.slane %v5843_v61, %v5417_v14  ;;  %v3111_v14 = vrot.slane %v5843_v61, %v5552_v3 }
0x170c   : > { %4623 = vmatmul.mubr.msk.f32.vlgmr.msra.gmra.mrb[32].mxu1 %vm790_vm2, %v2741_v7 }
0x170d   : > { %4652 = vmatprep.mubr.msk.f32.mxu1 %vm5101_vm1, %v5102_v5  ;;  %4841 = vmatpush3.bf16.msra.mxu1 %v4840_v62 }
0x170e   : > { %4842 = vmatprep.subr.bf16.mxu1 %v5100_v2 }
0x17df   : > { %v2824_v26 = vpop.f32.mrb[32].mxu1 }
0x17e0   : > { %v2825_v27 = vadd.f32 %v4262_v25, %v2824_v26  ;;  %v4624_v28 = vpop.f32.mrb[33].mxu1 }
0x17e2   : > { %v2829_v29 = vmul.f32 0.044715, %v2825_v27  ;;  %v2828_v34 = vmul.f32 0.5, %v2825_v27 }
0x17e4   : > { %v2830_v30 = vmul.f32 %v2829_v29, %v2825_v27 }
0x17e6   : > { %v2831_v23 = vmul.f32 %v2830_v30, %v2825_v27 }
0x17e8   : > { %v2832_v31 = vadd.f32 %v2831_v23, %v2825_v27 }
0x17ea   : > { %v2833_v32 = vmul.f32 0.7978846, %v2832_v31 }
0x17ec   : > { %4980 = vtanh.f32 %v2833_v32 }
0x17f6   : > { %v4981_v33 = vpop.eup %4980 }
0x17f7   : > { %v2835_v35 = vadd.f32 1.0, %v4981_v33 }
0x17f9   : > { %v2836_v36 = vmul.f32 %v2835_v35, %v2828_v34 }
0x17fb   : > { %4642 = vmatmul.mubr.msk.f32.vlgmr.msra.gmra.mrb[14].mxu0 %vm1766_vm11, %v2836_v36 }
0x17fc   : > { %4668 = vmatprep.mubr.msk.f32.mxu0 %vm5101_vm1, %v5102_v5 }
0x18ce   : > { %v2919_v38 = vpop.f32.mrb[14].mxu0 }
0x18cf   : > { %v2920_v39 = vadd.f32 %v2919_v38, %v2849_v37  ;;  %v4643_v40 = vpop.f32.mrb[15].mxu0 }
0x18d0   : > { %v3116_v40 = vrot.slane %v5843_v61, %v5555_v4 }
0x18d1   : > { %v2923_v42 = vadd.f32 %v2920_v39, %v5739_v48  ;;  %v2953_v48 = vld [vmem:[%s6091_s12 + $0x10] sm:$0xff] }
0x18d2   : > { %v4843_v54 = vpack.c.bf16 %v2954_v53, %v2953_v48 }
0x18d3   : > { %v2926_v43 = vsel %vm754_vm0, %v2923_v42, 0.0 }
0x18d4   : > { %2927 = vadd.xlane.f32.xlu0 %v2926_v43  ;;  %4844 = vmatpush3.bf16.msra.mxu1 %v4843_v54 }
0x18d5   : > { %4845 = vmatprep.subr.bf16.mxu1 %v5100_v2 }
0x18d7   : > { %4653 = vmatmul.mubr.msk.f32.vlgmr.msra.gmra.mrb[34].mxu1 %vm790_vm2, %v2950_v47 }
0x18d8   : > { %4847 = vmatpush3.bf16.msra.mxu1 %v4846_v50  ;;  %4663 = vmatprep.mubr.msk.f32.mxu1 %vm5101_vm1, %v5102_v5 }
0x18d9   : > { %4848 = vmatprep.subr.bf16.mxu1 %v5100_v2 }
0x18dc   : > { %4850 = vmatpush3.bf16.msra.mxu1 %v4849_v58 }
0x18dd   : > { %4671 = vmatprep.subr.mxu1 %v5102_v5 }
0x1961   : > { %v2928_v44 = vpop.xlane.xlu0 %2927 }
0x1962   : > { %v2929_v46 = vmul.f32 0.03125, %v2928_v44 }
0x1964   : > { %v2930_v49 = vsub.f32 %v2923_v42, %v2929_v46 }
0x1966   : > { %v2931_v51 = vmul.f32 %v2930_v49, %v2930_v49 }
0x1968   : > { %v2932_v52 = vsel %vm754_vm0, %v2931_v51, 0.0 }
0x1969   : > { %2933 = vadd.xlane.f32.xlu1 %v2932_v52 }
0x19aa   : > { %v3027_v9 = vpop.f32.mrb[34].mxu1 }
0x19ab   : > { %v3028_v10 = vadd.f32 %v3027_v9, %v2956_v12  ;;  %v4654_v16 = vpop.f32.mrb[35].mxu1 }
0x19ad   : > { %3291 = vrot.lane.b32.xlu1 %v3028_v10, %s6173_s20 }
0x19f6   : > { %v2934_v56 = vpop.xlane.xlu1 %2933 }
0x19f7   : > { %v2935_v59 = vmul.f32 0.03125, %v2934_v56 }
0x19f9   : > { %v2936_v60 = vadd.f32 1e-06, %v2935_v59 }
0x19fb   : > { %4982 = vrsqrt.f32 %v2936_v60 }
0x1a05   : > { %v4983_v0 = vpop.eup %4982 }
0x1a06   : > { %v2938_v1 = vmul.f32 %v4983_v0, %v2930_v49 }
0x1a08   : > { %v2943_v7 = vmul.f32 %v2942_v63, %v2938_v1 }
0x1a0a   : > { %v2948_v8 = vadd.f32 %v2947_v6, %v2943_v7 }
0x1a0c   : > { %4664 = vmatmul.mubr.msk.f32.vlgmr.msra.gmra.mrb[36].mxu1 %vm790_vm2, %v2948_v8  ;;  %2949 = vst.msk [vmem:[%s5854_s3] sm:$0xf] %vm754_vm0, %v2948_v8  ;;  %vm3808_vm0 = vcmask 254144  }
0x1a0d   : > { %4673 = vmatprep.mubr.msk.f32.mxu1 %vm5101_vm1, %v5102_v5 }
0x1a1f   : > { %v3292_v3 = vpop.permute.xlu1 %3291 }
0x1adf   : > { %v5864_v15 = vpop.f32.mrb[36].mxu1 }
0x1ae0   : > { %v3112_v17 = vadd.f32 %v3111_v14, %v5864_v15  ;;  %v4665_v18 = vpop.f32.mrb[37].mxu1 }
0x1ae2   : > { %3466 = vrot.lane.b32.xlu1 %v3112_v17, %s6163_s0  ;;  %3293 = vrot.lane.b32.xlu0 %v3112_v17, %s6173_s20 }
0x1ae3   : > { %4667 = vmatpush3.xpose.msk.msra.mxu0 %vm867_vm3, %v3112_v17 }
0x1ae4   : > { %4676 = vmatprep.subr.mxu0 %v5102_v5 }
0x1ae6   : > { %4669 = vmatmul.mubr.msk.f32.vlgmr.msra.gmra.mrb[16].mxu0 %vm867_vm3, %v3028_v10  ;;  %3639 = vrot.lane.b32.xlu1 %v3112_v17, %s6165_s19 }
0x1ae7   : > { %3464 = vrot.lane.b32.xlu0 %v3028_v10, %s6163_s0  ;;  %4678 = vmatprep.mubr.msk.f32.mxu0 %vm5101_vm1, %v5102_v5  ;;  %s5117_s0 = smov 32  }
0x1aeb   : > { %3637 = vrot.lane.b32.xlu0 %v3028_v10, %s6165_s19  ;;  %s6174_s19 = smov 88  }
0x1b54   : > { %v3294_v19 = vpop.permute.xlu0 %3293  ;;  %v3467_v20 = vpop.permute.xlu1 %3466 }
0x1b55   : > { %4677 = vmatpush3.xpose.msk.msra.mxu0 %vm867_vm3, %v3294_v19  ;;  %v3812_v19 = vld [vmem:[%s6093_s14 + $0x8] sm:$0xff] }
0x1b56   : > { %4686 = vmatprep.subr.mxu0 %v5102_v5 }
0x1b58   : > { %4679 = vmatmul.mubr.msk.f32.vlgmr.msra.gmra.mrb[18].mxu0 %vm867_vm3, %v3292_v3  ;;  %v3640_v22 = vpop.permute.xlu1 %3639  ;;  %v3811_v3 = vld [vmem:[%s6093_s14] sm:$0xff] }
0x1b59   : > { %v3465_v21 = vpop.permute.xlu0 %3464  ;;  %4687 = vmatpush3.xpose.msk.msra.mxu0 %vm867_vm3, %v3467_v20  ;;  %4688 = vmatprep.mubr.msk.f32.mxu0 %vm5101_vm1, %v5102_v5 }
0x1b5a   : > { %4696 = vmatprep.subr.mxu0 %v5102_v5 }
0x1b5c   : > { %4689 = vmatmul.mubr.msk.f32.vlgmr.msra.gmra.mrb[20].mxu0 %vm867_vm3, %v3465_v21  ;;  %v4852_v21 = vpack.c.bf16 %v3812_v19, %v3811_v3 }
0x1b5d   : > { %4697 = vmatpush3.xpose.msk.msra.mxu0 %vm867_vm3, %v3640_v22  ;;  %4698 = vmatprep.mubr.msk.f32.mxu0 %vm5101_vm1, %v5102_v5  ;;  %v3638_v24 = vpop.permute.xlu0 %3637  ;;  %v3813_v22 = vld [vmem:[%s6093_s14 + $0x10] sm:$0xff] }
0x1b5e   : > { %4851 = vmatprep.subr.bf16.mxu0 %v5100_v2 }
0x1b60   : > { %4699 = vmatmul.mubr.msk.f32.vlgmr.msra.gmra.mrb[22].mxu0 %vm867_vm3, %v3638_v24  ;;  %v3814_v24 = vld [vmem:[%s6093_s14 + $0x18] sm:$0xff]  ;;  %vm3890_vm3 = vcmask 253952  }
0x1b61   : > { %4714 = vmatprep.mubr.msk.f32.mxu0 %vm5101_vm1, %v5102_v5  ;;  %4853 = vmatpush3.bf16.msra.mxu0 %v4852_v21 }
0x1b62   : > { %4854 = vmatprep.subr.bf16.mxu0 %v5100_v2 }
0x1bb9   : > { %v3194_v25 = vpop.f32.mrb[16].mxu0 }
0x1bba   : > { %v3198_v26 = vmul.f32 0.35355338, %v3194_v25  ;;  %v4670_v27 = vpop.f32.mrb[17].mxu0 }
0x1bbc   : > { %v3200_v28 = vsel %vm3199_vm12, %v3198_v26, -inf }
0x1bbd   : > { %3201 = vmax.xlane.f32.xlu1 %v3200_v28 }
0x1c2b   : > { %v3365_v29 = vpop.f32.mrb[18].mxu0 }
0x1c2c   : > { %v3369_v30 = vmul.f32 0.35355338, %v3365_v29  ;;  %v4680_v23 = vpop.f32.mrb[19].mxu0 }
0x1c2e   : > { %v3370_v31 = vsel %vm3199_vm12, %v3369_v30, -inf }
0x1c2f   : > { %3371 = vmax.xlane.f32.xlu0 %v3370_v31  ;;  %v3538_v32 = vpop.f32.mrb[20].mxu0 }
0x1c30   : > { %v3542_v33 = vmul.f32 0.35355338, %v3538_v32  ;;  %v4690_v34 = vpop.f32.mrb[21].mxu0 }
0x1c32   : > { %v3543_v35 = vsel %vm3199_vm12, %v3542_v33, -inf }
0x1c33   : > { %3544 = vmax.xlane.f32.xlu0 %v3543_v35  ;;  %v3711_v36 = vpop.f32.mrb[22].mxu0 }
0x1c34   : > { %v3715_v37 = vmul.f32 0.35355338, %v3711_v36  ;;  %v4700_v38 = vpop.f32.mrb[23].mxu0  ;;  %v3815_v36 = vrot.slane %v5843_v61, 5 }
0x1c36   : > { %v3716_v39 = vsel %vm3199_vm12, %v3715_v37, -inf }
0x1c37   : > { %3717 = vmax.xlane.f32.xlu1 %v3716_v39 }
0x1c49   : > { %3118 = vrot.lane.b32.xlu0 %v3116_v40, %s5117_s0  ;;  %s5118_s0 = smov [#allocation3]  }
0x1c4a   : > { %v3202_v42 = vpop.xlane.xlu1 %3201 }
0x1c4b   : > { %v3203_v43 = vsub.f32 %v3198_v26, %v3202_v42  ;;  %v4855_v26 = vpack.c.bf16 %v3814_v24, %v3813_v22 }
0x1c4d   : > { %v3204_v44 = vmul.f32 1.442695, %v3203_v43  ;;  %4856 = vmatpush3.bf16.msra.mxu0 %v4855_v26 }
0x1c4e   : > { %4863 = vmatprep.subr.bf16.mxu0 %v5100_v2 }
0x1c4f   : > { %4984 = vpow2.f32 %v3204_v44 }
0x1c59   : > { %v4985_v46 = vpop.eup %4984 }
0x1c5a   : > { %v3206_v49 = vsel %vm3199_vm12, %v4985_v46, 0.0 }
0x1c5b   : > { %3207 = vadd.xlane.f32.xlu1 %v3206_v49 }
0x1cbc   : > { %v3372_v51 = vpop.xlane.xlu0 %3371 }
0x1cbd   : > { %v3373_v52 = vsub.f32 %v3369_v30, %v3372_v51  ;;  %v3911_v51 = vld [vmem:[%s6094_s15 + $0x8] sm:$0xff] }
0x1cbf   : > { %v3374_v11 = vmul.f32 1.442695, %v3373_v52 }
0x1cc0   : > { %v3545_v41 = vpop.xlane.xlu0 %3544 }
0x1cc1   : > { %4986 = vpow2.f32 %v3374_v11  ;;  %v3546_v62 = vsub.f32 %v3542_v33, %v3545_v41  ;;  %v3912_v11 = vld [vmem:[%s6094_s15 + $0x10] sm:$0xff]  ;;  %v3913_v41 = vld [vmem:[%s6094_s15 + $0x18] sm:$0xff] }
0x1cc3   : > { %v3547_v48 = vmul.f32 1.442695, %v3546_v62  ;;  %v4861_v62 = vpack.c.bf16 %v3913_v41, %v3912_v11 }
0x1cc4   : > { %v3119_v53 = vpop.permute.xlu0 %3118  ;;  %v3718_v54 = vpop.xlane.xlu1 %3717 }
0x1cc5   : > { %4988 = vpow2.f32 %v3547_v48  ;;  %v3121_v4 = vadd.f32 %v3119_v53, %v5864_v15  ;;  %v3719_v13 = vsub.f32 %v3715_v37, %v3718_v54 }
0x1cc7   : > { %v3720_v45 = vmul.f32 1.442695, %v3719_v13  ;;  %3381 = vrot.lane.b32.xlu0 %v3121_v4, %s6174_s19  ;;  %s5008_s19 = sshll.u32 %s5118_s0, 4  ;;  %s5009_s19 = int_to_ptr.vmem [resolvable:$false] %s5008_s19 }
0x1cc9   : > { %4990 = vpow2.f32 %v3720_v45 }
0x1ccb   : > { %v4987_v47 = vpop.eup %4986  ;;  %3554 = vrot.lane.b32.xlu0 %v3121_v4, %s6162_s1 }
0x1ccc   : > { %v3376_v50 = vsel %vm3199_vm12, %v4987_v47, 0.0 }
0x1ccd   : > { %3377 = vadd.xlane.f32.xlu1 %v3376_v50 }
0x1ccf   : > { %v4989_v55 = vpop.eup %4988  ;;  %3727 = vrot.lane.b32.xlu0 %v3121_v4, %s6164_s25 }
0x1cd0   : > { %v3549_v57 = vsel %vm3199_vm12, %v4989_v55, 0.0 }
0x1cd1   : > { %3550 = vadd.xlane.f32.xlu1 %v3549_v57  ;;  %v3997_v57 = vld [vmem:[%s6096_s17] sm:$0xff] }
0x1cd3   : > { %v4991_v58 = vpop.eup %4990 }
0x1cd4   : > { %v3722_v56 = vsel %vm3199_vm12, %v4991_v58, 0.0 }
0x1cd5   : > { %3723 = vadd.xlane.f32.xlu1 %v3722_v56 }
0x1ce6   : > { %3212 = vrot.lane.b32.xlu1 %v3121_v4, %s6175_s29  ;;  %v3904_v4 = vrot.slane %v5843_v61, 6  ;;  %s5010_s29 = scalar_lea.vmem %s5009_s19, 128 }
0x1ce8   : > { %v3208_v59 = vpop.xlane.xlu1 %3207 }
0x1ce9   : > { %4992 = vrcp.f32 %v3208_v59  ;;  %v3999_v59 = vld [vmem:[%s6096_s17 + $0x10] sm:$0xff] }
0x1cf3   : > { %v4993_v1 = vpop.eup %4992 }
0x1cf4   : > { %v3210_v7 = vmul.f32 %v4993_v1, %v4985_v46 }
0x1d39   : > { %v3382_v6 = vpop.permute.xlu0 %3381 }
0x1d3d   : > { %v3555_v9 = vpop.permute.xlu0 %3554 }
0x1d41   : > { %v3728_v17 = vpop.permute.xlu0 %3727 }
0x1d5a   : > { %v3378_v60 = vpop.xlane.xlu1 %3377 }
0x1d5b   : > { %4994 = vrcp.f32 %v3378_v60 }
0x1d5e   : > { %v3551_v63 = vpop.xlane.xlu1 %3550 }
0x1d5f   : > { %4996 = vrcp.f32 %v3551_v63  ;;  %v4001_v63 = vld [vmem:[%s6096_s17 + $0x20] sm:$0xff] }
0x1d62   : > { %v3724_v0 = vpop.xlane.xlu1 %3723 }
0x1d63   : > { %4998 = vrcp.f32 %v3724_v0  ;;  %v4002_v0 = vld [vmem:[%s6096_s17 + $0x28] sm:$0xff] }
0x1d64   : > { %v4870_v1 = vpack.c.bf16 %v4002_v0, %v4001_v63 }
0x1d65   : > { %v4995_v12 = vpop.eup %4994 }
0x1d66   : > { %v3213_v8 = vpop.permute.xlu1 %3212  ;;  %v3380_v10 = vmul.f32 %v4995_v12, %v4987_v47  ;;  %v3907_v47 = vrot.slane %v5843_v61, 7  ;;  %v4000_v61 = vld [vmem:[%s6096_s17 + $0x18] sm:$0xff]  ;;  %v3914_v12 = vld [vmem:[%s6095_s16] sm:$0x1] }
0x1d67   : > { %4672 = vmatpush3.msk.msra.mxu1 %vm961_vm4, %v3213_v8  ;;  %v4867_v60 = vpack.c.bf16 %v4000_v61, %v3999_v59 }
0x1d68   : > { %4674 = vmatmul.mubr.msk.f32.vlgmr.msra.gmra.mrb[38].mxu1 %vm957_vm6, %v3210_v7  ;;  %4681 = vmatprep.subr.mxu1 %v5102_v5  ;;  %v4004_v7 = vld [vmem:[%s6096_s17 + $0x38] sm:$0xff] }
0x1d69   : > { %4682 = vmatpush3.msk.msra.mxu1 %vm961_vm4, %v3382_v6  ;;  %4683 = vmatprep.mubr.msk.f32.mxu1 %vm5101_vm1, %v5102_v5  ;;  %v4997_v16 = vpop.eup %4996  ;;  %v4003_v6 = vld [vmem:[%s6096_s17 + $0x30] sm:$0xff] }
0x1d6a   : > { %4691 = vmatprep.subr.mxu1 %v5102_v5  ;;  %v3553_v14 = vmul.f32 %v4997_v16, %v4989_v55  ;;  %v4873_v8 = vpack.c.bf16 %v4004_v7, %v4003_v6 }
0x1d6c   : > { %4684 = vmatmul.mubr.msk.f32.vlgmr.msra.gmra.mrb[40].mxu1 %vm957_vm6, %v3380_v10 }
0x1d6d   : > { %4692 = vmatpush3.msk.msra.mxu1 %vm961_vm4, %v3555_v9  ;;  %4693 = vmatprep.mubr.msk.f32.mxu1 %vm5101_vm1, %v5102_v5  ;;  %v4999_v15 = vpop.eup %4998 }
0x1d6e   : > { %4701 = vmatprep.subr.mxu1 %v5102_v5  ;;  %v3726_v18 = vmul.f32 %v4999_v15, %v4991_v58  ;;  %v3998_v58 = vld [vmem:[%s6096_s17 + $0x8] sm:$0xff] }
0x1d6f   : > { %v4864_v56 = vpack.c.bf16 %v3998_v58, %v3997_v57 }
0x1d70   : > { %4694 = vmatmul.mubr.msk.f32.vlgmr.msra.gmra.mrb[42].mxu1 %vm957_vm6, %v3553_v14 }
0x1d71   : > { %4702 = vmatpush3.msk.msra.mxu1 %vm961_vm4, %v3728_v17  ;;  %4703 = vmatprep.mubr.msk.f32.mxu1 %vm5101_vm1, %v5102_v5 }
0x1d72   : > { %4857 = vmatprep.subr.bf16.mxu1 %v5100_v2 }
0x1d74   : > { %4704 = vmatmul.mubr.msk.f32.vlgmr.msra.gmra.mrb[44].mxu1 %vm957_vm6, %v3726_v18 }
0x1d75   : > { %4725 = vmatprep.mubr.msk.f32.mxu1 %vm5101_vm1, %v5102_v5 }
0x1e3b   : > { %v3285_v20 = vpop.f32.mrb[38].mxu1 }
0x1e3c   : > { %3290 = vst.msk [vmem:[#allocation2] sm:$0x1] %vm3289_vm13, %v3285_v20  ;;  %v4675_v25 = vpop.f32.mrb[39].mxu1 }
0x1e3f   : > { %v3454_v27 = vpop.f32.mrb[40].mxu1 }
0x1e40   : > { %3459 = vrot.lane.b32.xlu0 %v3454_v27, %s6170_s27  ;;  %v4685_v28 = vpop.f32.mrb[41].mxu1  ;;  %s6005_s27 = scalar_lea.hbm %s6176_s6, %s4295_s7 }
0x1e43   : > { %v3627_v29 = vpop.f32.mrb[42].mxu1 }
0x1e44   : > { %3632 = vrot.lane.b32.xlu1 %v3627_v29, %s6171_s23  ;;  %v4695_v30 = vpop.f32.mrb[43].mxu1  ;;  %s4098_s23 = sshll.u32 %s5854_s3, 4  ;;  %s4099_s23 = int_to_ptr.vmem [resolvable:$true] %s4098_s23 }
0x1e45   : > { %s5004_s20 = scalar_lea.vmem %s4099_s23, 64  ;;  %p5011_p0 = scmp.lt.s32.totalorder %s4099_s23, %s5009_s19 }
0x1e46   : > { %p5005_p11 = scmp.ne.s32.totalorder %s4099_s23, %s5004_s20  ;;  %p5012_p1 = scmp.lt.s32.totalorder %s5010_s29, %s5004_s20 }
0x1e47   : > { %v3800_v23 = vpop.f32.mrb[44].mxu1 }
0x1e48   : > { %3805 = vrot.lane.b32.xlu0 %v3800_v23, %s6172_s24  ;;  %v4705_v31 = vpop.f32.mrb[45].mxu1  ;;  %s4081_s24 = scalar_lea.sflag [#allocation4], %s5846_s5  ;;  %p5006_p12 = pnand %p5005_p11, %p5263_p5 }
0x1e49   : > { %p5013_p2 = por %p5012_p1, %p5011_p0 }
0x1e4a   : > { %p5007_p13 = pneg %p5006_p12 }
0x1e4c   : > { %p5014_p3 = pnand %p5013_p2, %p5007_p13 }
0x1eb2   : > { %v3460_v32 = vpop.permute.xlu0 %3459 }
0x1eb3   : > { %3463 = vst.msk [vmem:[#allocation2] sm:$0x1] %vm3462_vm14, %v3460_v32 }
0x1eb6   : > { %v3633_v33 = vpop.permute.xlu1 %3632 }
0x1eb7   : > { %3636 = vst.msk [vmem:[#allocation2] sm:$0x1] %vm3635_vm15, %v3633_v33 }
0x1eba   : > { %v3806_v34 = vpop.permute.xlu0 %3805 }
0x1ebb   : > { %3809 = vst.msk [vmem:[#allocation2] sm:$0x1] %vm3808_vm0, %v3806_v34 }
0x1ec2   : > { %v3810_v35 = vld [vmem:[#allocation2] sm:$0x1] }
0x1ec3   : > { %4715 = vmatmul.mubr.msk.f32.vlgmr.msra.gmra.mrb[24].mxu0 %vm790_vm2, %v3810_v35 }
0x1ec4   : > { %4744 = vmatprep.mubr.msk.f32.mxu0 %vm5101_vm1, %v5102_v5  ;;  %v3910_v5 = vld [vmem:[%s6094_s15] sm:$0xff]  ;;  %4865 = vmatpush3.bf16.msra.mxu0 %v4864_v56 }
0x1ec5   : > { %v4858_v52 = vpack.c.bf16 %v3911_v51, %v3910_v5  ;;  %4866 = vmatprep.subr.bf16.mxu0 %v5100_v2 }
0x1ec7   : > { %4859 = vmatpush3.bf16.msra.mxu1 %v4858_v52 }
0x1ec8   : > { %4860 = vmatprep.subr.bf16.mxu1 %v5100_v2  ;;  %4868 = vmatpush3.bf16.msra.mxu0 %v4867_v60 }
0x1ec9   : > { %4869 = vmatprep.subr.bf16.mxu0 %v5100_v2 }
0x1ecb   : > { %4862 = vmatpush3.bf16.msra.mxu1 %v4861_v62 }
0x1ecc   : > { %4871 = vmatpush3.bf16.msra.mxu0 %v4870_v1 }
0x1ecd   : > { %4872 = vmatprep.subr.bf16.mxu0 %v5100_v2 }
0x1ed0   : > { %4874 = vmatpush3.bf16.msra.mxu0 %v4873_v8 }
0x1f96   : > { %v3886_v37 = vpop.f32.mrb[24].mxu0 }
0x1f97   : > { %v5948_v38 = vadd.f32 %v3886_v37, %v3815_v36  ;;  %v4716_v39 = vpop.f32.mrb[25].mxu0 }
0x1f99   : > { %v3891_v40 = vsel %vm3890_vm3, %v5948_v38, 0.0 }
0x1f9a   : > { %3892 = vadd.xlane.f32.xlu1 %v3891_v40 }
0x2027   : > { %v3893_v42 = vpop.xlane.xlu1 %3892 }
0x2028   : > { %v3894_v43 = vmul.f32 0.03125, %v3893_v42 }
0x202a   : > { %v3895_v44 = vsub.f32 %v5948_v38, %v3894_v43 }
0x202c   : > { %v3896_v46 = vmul.f32 %v3895_v44, %v3895_v44 }
0x202e   : > { %v3897_v49 = vsel %vm3890_vm3, %v3896_v46, 0.0 }
0x202f   : > { %3898 = vadd.xlane.f32.xlu0 %v3897_v49 }
0x20bc   : > { %v3899_v48 = vpop.xlane.xlu0 %3898 }
0x20bd   : > { %v3900_v53 = vmul.f32 0.03125, %v3899_v48 }
0x20bf   : > { %v3901_v54 = vadd.f32 1e-06, %v3900_v53 }
0x20c1   : > { %5000 = vrsqrt.f32 %v3901_v54 }
0x20cb   : > { %v5001_v13 = vpop.eup %5000 }
0x20cc   : > { %v3903_v45 = vmul.f32 %v5001_v13, %v3895_v44 }
0x20ce   : > { %v3906_v50 = vmul.f32 %v3904_v4, %v3903_v45 }
0x20d0   : > { %v3909_v55 = vadd.f32 %v3907_v47, %v3906_v50 }
0x20d2   : > { %4726 = vmatmul.mubr.msk.f32.vlgmr.msra.gmra.mrb[46].mxu1 %vm790_vm2, %v3909_v55 }
0x21a5   : > { %v3984_v9 = vpop.f32.mrb[46].mxu1 }
0x21a6   : > { %v3985_v10 = vadd.f32 %v3984_v9, %v3914_v12  ;;  %v4727_v16 = vpop.f32.mrb[47].mxu1 }
0x21a8   : > { %v3989_v14 = vmul.f32 0.044715, %v3985_v10  ;;  %v3988_v2 = vmul.f32 0.5, %v3985_v10 }
0x21aa   : > { %v3990_v15 = vmul.f32 %v3989_v14, %v3985_v10 }
0x21ac   : > { %v3991_v17 = vmul.f32 %v3990_v15, %v3985_v10 }
0x21ae   : > { %v3992_v18 = vadd.f32 %v3991_v17, %v3985_v10 }
0x21b0   : > { %v3993_v3 = vmul.f32 0.7978846, %v3992_v18 }
0x21b2   : > { %5002 = vtanh.f32 %v3993_v3 }
0x21bc   : > { %v5003_v19 = vpop.eup %5002 }
0x21bd   : > { %v3995_v20 = vadd.f32 1.0, %v5003_v19 }
0x21bf   : > { %v3996_v21 = vmul.f32 %v3995_v20, %v3988_v2 }
0x21c1   : > { %4745 = vmatmul.mubr.msk.f32.vlgmr.msra.gmra.mrb[26].mxu0 %vm1766_vm11, %v3996_v21 }
0x21c2   : > { %5017 = shalt.err (!%p5014_p3)
}
0x21c3   : > { %s5018_s3 = scalar_lea.hbm %s6005_s27, 64  ;;  %s5022_s28 = scalar_lea.hbm %s6176_s6, 128 }
0x21c4   : > { %p5019_p4 = scmp.ne.s32.totalorder %s6005_s27, %s5018_s3  ;;  %p5023_p9 = scmp.lt.u32.totalorder %s6005_s27, %s6176_s6 }
0x21c5   : > { %p5024_p10 = scmp.lt.u32.totalorder %s5022_s28, %s5018_s3  ;;  %p5026_p12 = scmp.lt.u32.totalorder %s5018_s3, %s6005_s27 }
0x21c6   : > { %p5020_p7 = pnand %p5019_p4, %p5263_p5 }
0x21c7   : > { %p5025_p11 = por %p5024_p10, %p5023_p9 }
0x21c8   : > { %p5021_p8 = pneg %p5020_p7 }
0x21c9   : > { %p5027_p13 = por %p5026_p12, %p5025_p11 }
0x21cb   : > { %p5028_p0 = pnand %p5027_p13, %p5021_p8 }
0x21cd   : > { %5031 = shalt.err (!%p5028_p0)
}
0x21ce   : > { %4875 = dma.vmem_to_hbm [thread:$0]  (%p5263_p5), %s4099_s23, 64, %s6005_s27, %s4081_s24   ;;  %v2925_v22 = vld [vmem:[%s6097_s18 + $0x8] sm:$0x1] }
0x21cf   : > { %s4296_s20 = sshll.u32 %s5246_s2, 4  ;;  %s632_s0 = scalar_lea.vmem [#allocation5], %s5846_s5 }
0x21d0   : > { %s4111_s19 = sshll.u32 %s632_s0, 4  ;;  %s6177_s1 = sld [smem:[#allocation25_spill]]  ;;  %s6037_s19 = int_to_ptr.vmem [resolvable:$true] %s4111_s19 }
0x21d1   : > { %s4086_s27 = scalar_lea.sflag [#allocation6], %s5846_s5  ;;  %s5032_s2 = scalar_lea.vmem %s6037_s19, 16 }
0x21d2   : > { %p5033_p1 = scmp.ne.s32.totalorder %s6037_s19, %s5032_s2  ;;  %s5119_s23 = smov [#allocation5]  }
0x21d3   : > { %s5036_s24 = sshll.u32 %s5119_s23, 4  ;;  %s5037_s24 = int_to_ptr.vmem [resolvable:$false] %s5036_s24 }
0x21d4   : > { %p5034_p2 = pnand %p5033_p1, %p5263_p5  ;;  %s5038_s30 = scalar_lea.vmem %s5037_s24, 32 }
0x21d5   : > { %p5039_p4 = scmp.lt.s32.totalorder %s6037_s19, %s5037_s24  ;;  %p5040_p7 = scmp.lt.s32.totalorder %s5038_s30, %s5032_s2 }
0x21d6   : > { %s6178_s25 = smov %s6177_s1  ;;  %s6035_s28 = scalar_lea.hbm %s6177_s1, %s4296_s20 }
0x21d7   : > { %p5035_p3 = pneg %p5034_p2  ;;  %p5041_p8 = por %p5040_p7, %p5039_p4 }
0x21d9   : > { %p5042_p9 = pnand %p5041_p8, %p5035_p3 }
0x2294   : > { %v4074_v24 = vpop.f32.mrb[26].mxu0 }
0x2295   : > { %v4075_v25 = vadd.f32 %v4074_v24, %v2925_v22  ;;  %v4746_v26 = vpop.f32.mrb[27].mxu0 }
0x2297   : > { %v4078_v27 = vadd.f32 %v4075_v25, %v5948_v38 }
0x2299   : > { %4079 = vst.msk [vmem:[%s632_s0] sm:$0x1] %vm3890_vm3, %v4078_v27 }
0x229a   : > { %5045 = shalt.err (!%p5042_p9)
}
0x229b   : > { %s5046_s5 = scalar_lea.hbm %s6035_s28, 16  ;;  %s5050_s26 = scalar_lea.hbm %s6178_s25, 32 }
0x229c   : > { %p5047_p10 = scmp.ne.s32.totalorder %s6035_s28, %s5046_s5  ;;  %p5051_p13 = scmp.lt.u32.totalorder %s6035_s28, %s6178_s25 }
0x229d   : > { %p5052_p0 = scmp.lt.u32.totalorder %s5050_s26, %s5046_s5  ;;  %p5054_p2 = scmp.lt.u32.totalorder %s5046_s5, %s6035_s28 }
0x229e   : > { %p5048_p11 = pnand %p5047_p10, %p5263_p5 }
0x229f   : > { %p5053_p1 = por %p5052_p0, %p5051_p13 }
0x22a0   : > { %p5049_p12 = pneg %p5048_p11 }
0x22a1   : > { %p5055_p3 = por %p5054_p2, %p5053_p1 }
0x22a3   : > { %p5056_p4 = pnand %p5055_p3, %p5049_p12 }
0x22a5   : > { %5059 = shalt.err (!%p5056_p4)
}
0x22a6   : > { %4876 = dma.vmem_to_hbm [thread:$0]  (%p5263_p5), %s6037_s19, 16, %s6035_s28, %s4086_s27  }
0x22a7 PF: > { %s6179_s29 = sld [smem:[#allocation11_spill]]  ;;  %s6180_s3 = sld [smem:[#allocation9_spill]] }
0x22ad   : > { %p4886_p7 = scmp.ge.s32.totalorder %s6179_s29, 2  ;;  %s4123_s2 = sand.u32 1, %s6180_s3  }
0x22ae   : > { %s4124_s23 = scalar_lea.sflag [#allocation4], %s4123_s2 }
0x22af   : > { %p4880_p8 = pnand %p4886_p7, %p5267_p6 }
0x22b1   : > { %5077 = dma.done.wait (!%p4880_p8), %s4124_s23, 64  }
0x22b2   : > { %5079 = vsyncadd (!%p4880_p8), %s4124_s23, 4294967232  ;;  %s4133_s24 = scalar_lea.sflag [#allocation6], %s4123_s2 }
0x22b3   : > { %5081 = dma.done.wait (!%p4880_p8), %s4133_s24, 16  }
0x22b4   : > { %5083 = vsyncadd (!%p4880_p8), %s4133_s24, 4294967280  ;;  %s6182_s24 = sld [smem:[#allocation12_spill]]  ;;  %s6183_s4 = sld [smem:[#allocation10_spill]] }
0x22b5   : > { %s6184_s23 = sld [smem:[#allocation13_spill]]  ;;  %s6185_s1 = smov %s5090_s22 }
0x22ba   : > { %p34_p5 = scmp.ge.s32.totalorder %s6182_s24, 4   ;;  %s6186_s22 = smov %s6183_s4 }
0x22bc   :  { %36 = sbr.rel (!%p34_p5) target bundleno = 17 (0x11), region = 155 }
0x22c3   :  { %4137 = vsyncpa [#allocation4], 1 }
0x22c4   :  { %4139 = vsyncpa [#allocation4 + $0x1], 1 }
0x22c5   :  { %4140 = vsyncpa [#allocation6], 1 }
0x22c6   :  { %4142 = vsyncpa [#allocation6 + $0x1], 1 }

</bundles_post_ra>
